<compile_context>
chip_gen: v5e
topology: v5e:2x2
jax: 0.10.0
libtpu: 0.0.40
codegen_flags: <defaults>
</compile_context>

<pallas_src>
from functools import partial

import jax
import jax.numpy as jnp
from jax import lax
from jax.experimental import pallas as pl
from jax.experimental.pallas import tpu as pltpu

EPS = 1e-5
LANE = 128


def _round_up(x, m):
    return (x + m - 1) // m * m


# ---------------------------------------------------------------------------
# In-kernel helpers
# ---------------------------------------------------------------------------
def _conv3x3_rowcat(xpad, w_ref, h, w):
    """3x3 'same' conv as 3 matmuls with K = 3*Cin (dj taps folded into K).

    xpad : (h+2, w+2, Cin) bf16 array, spatially zero-padded.
    w_ref: (3, 3*Cin, Cout) bf16 ref; w_ref[di][dj*Cin + c, o] = W[o, c, di, dj].
    Returns (h*w, Cout) float32.
    """
    # Width-shifted copies concatenated along channels.  Built ONCE per conv:
    # 2 sublane-unaligned slices (dj = 1, 2) instead of 9 per-tap copies.
    xw = jnp.concatenate([xpad[:, dj:dj + w, :] for dj in range(3)], axis=-1)
    k = xw.shape[-1]                                  # 3*Cin
    acc = None
    for di in range(3):
        a = xw[di:di + h]                             # leading-axis slice: cheap
        a = a.reshape(h * w, k)                       # free when w % 8 == 0
        p = jnp.dot(a, w_ref[di], preferred_element_type=jnp.float32)
        acc = p if acc is None else acc + p
    return acc


def _partial_stats(acc, stats_ref):
    """Per-image per-channel [sum; sum-of-squares] -> stats_ref[0] (2, C)."""
    s = jnp.sum(acc, axis=0, keepdims=True)
    ss = jnp.sum(acc * acc, axis=0, keepdims=True)
    stats_ref[0] = jnp.concatenate([s, ss], axis=0)


# ---------------------------------------------------------------------------
# Pallas kernels (one image per grid step)
# ---------------------------------------------------------------------------
def _conv_stats_kernel(x_ref, w_ref, y_ref, stats_ref, *, h, w):
    """conv1 (3x3, pad 1) on a halo-padded bf16 NHWC tile + BN1 partial stats.
    Conv bias b1 omitted: it cancels exactly under batch-stat BatchNorm."""
    acc = _conv3x3_rowcat(x_ref[0], w_ref, h, w)          # (h*w, cp) f32
    y_ref[0] = acc.astype(jnp.bfloat16)                   # bf16 intermediate
    _partial_stats(acc, stats_ref)                        # stats from f32 acc


def _bn_relu_conv_stats_kernel(y1_ref, scale_ref, shift_ref, w_ref,
                               y2_ref, stats_ref, pad_ref, *, h, w):
    """BN1 scale/shift + ReLU, write interior into a bf16 halo scratch (only
    halo strips re-zeroed), conv2 (3x3, pad 1) + BN2 partial stats.
    Conv bias b2 omitted (cancels under BN)."""
    cp = pad_ref.shape[-1]
    y1n = jnp.maximum(
        y1_ref[0].astype(jnp.float32) * scale_ref[...] + shift_ref[...], 0.0)

    # Zero only the four halo strips (interior is fully overwritten below).
    pad_ref[0, :, :] = jnp.zeros((w + 2, cp), jnp.bfloat16)
    pad_ref[h + 1, :, :] = jnp.zeros((w + 2, cp), jnp.bfloat16)
    pad_ref[1:h + 1, 0:1, :] = jnp.zeros((h, 1, cp), jnp.bfloat16)
    pad_ref[1:h + 1, w + 1:w + 2, :] = jnp.zeros((h, 1, cp), jnp.bfloat16)
    # Interior written once, pre-cast to bf16.
    pad_ref[1:h + 1, 1:w + 1, :] = y1n.astype(jnp.bfloat16).reshape(h, w, cp)

    acc = _conv3x3_rowcat(pad_ref[...], w_ref, h, w)      # (h*w, cp) f32
    y2_ref[0] = acc.astype(jnp.bfloat16)
    _partial_stats(acc, stats_ref)


def _bn_down_add_relu_kernel(y2_ref, x_ref, scale_ref, shift_ref,
                             wd_ref, bd_ref, o_ref):
    """BN2 scale/shift + 1x1 downsample (+bd) on the unpadded flattened input
    + residual add + ReLU, all fused."""
    y2n = y2_ref[0].astype(jnp.float32) * scale_ref[...] + shift_ref[...]
    res = jnp.dot(x_ref[0], wd_ref[...],
                  preferred_element_type=jnp.float32) + bd_ref[...]
    o_ref[0] = jnp.maximum(y2n + res, 0.0)


# ---------------------------------------------------------------------------
# Wrapper (layout prep is plain-JAX glue; conv/BN-apply/ReLU math is in-kernel)
# ---------------------------------------------------------------------------
def _bn_scale_shift(stats, gamma_p, beta_p, count):
    """Global BN(batch stats) -> per-channel scale/shift (tiny JAX op)."""
    s = jnp.sum(stats[:, 0, :], axis=0)
    ss = jnp.sum(stats[:, 1, :], axis=0)
    mean = s / count
    var = jnp.maximum(ss / count - mean * mean, 0.0)      # biased variance
    scale = gamma_p * lax.rsqrt(var + EPS)
    shift = beta_p - mean * scale
    return (scale.reshape(1, -1).astype(jnp.float32),
            shift.reshape(1, -1).astype(jnp.float32))


def basic_block_forward(x_nchw, params):
    n, cin, h, w = x_nchw.shape
    cout = params["w1"].shape[0]
    cp = _round_up(cout, LANE)            # lane-dense output channels
    hw = h * w
    hp, wp = h + 2, w + 2

    # ---- layout prep: NHWC; halo pad (NO Cin padding); bf16 weights/inputs --
    x_nhwc = jnp.transpose(x_nchw, (0, 2, 3, 1)).astype(jnp.float32)
    x_pad = jnp.pad(x_nhwc, ((0, 0), (1, 1), (1, 1), (0, 0))
                    ).astype(jnp.bfloat16)                # (N, H+2, W+2, Cin)
    x_flat = x_nhwc.reshape(n, hw, cin).astype(jnp.bfloat16)   # residual path

    def conv_w(wt, ci_pad):
        # (Cout, Cin, 3, 3) -> (3, 3*ci_pad, cp) bf16, dj taps folded into K.
        co, ci = wt.shape[0], wt.shape[1]
        wt = jnp.transpose(wt, (2, 3, 1, 0))              # (3, 3, Cin, Cout)
        wt = jnp.pad(wt, ((0, 0), (0, 0), (0, ci_pad - ci), (0, cp - co)))
        return wt.reshape(3, 3 * ci_pad, cp).astype(jnp.bfloat16)

    w1c = conv_w(params["w1"], cin)       # K = 3*cin (unpadded Cin)
    w2c = conv_w(params["w2"], cp)        # y1 is stored cp-wide -> K = 3*cp
    wdp = jnp.pad(params["wd"].reshape(cout, cin).T,
                  ((0, 0), (0, cp - cout))).astype(jnp.bfloat16)   # (cin, cp)
    bdp = jnp.pad(params["bd"], (0, cp - cout)).reshape(1, cp).astype(jnp.float32)

    g1 = jnp.pad(params["gamma1"], (0, cp - cout))
    be1 = jnp.pad(params["beta1"], (0, cp - cout))
    g2 = jnp.pad(params["gamma2"], (0, cp - cout))
    be2 = jnp.pad(params["beta2"], (0, cp - cout))
    # b1 / b2 intentionally unused: bias-then-BatchNorm(batch stats) cancels.

    cparams = pltpu.CompilerParams(
        dimension_semantics=("parallel",),          # v7x: shard images on 2 TCs
        vmem_limit_bytes=32 * 1024 * 1024)          # sized to need, v7x headroom

    # ---- stage 1: conv1 (3 matmuls, K=3*cin) + per-image BN1 partial stats --
    y1raw, st1 = pl.pallas_call(
        partial(_conv_stats_kernel, h=h, w=w),
        grid=(n,),
        in_specs=[pl.BlockSpec((1, hp, wp, cin), lambda b: (b, 0, 0, 0)),
                  pl.BlockSpec((3, 3 * cin, cp), lambda b: (0, 0, 0))],
        out_specs=[pl.BlockSpec((1, hw, cp), lambda b: (b, 0, 0)),
                   pl.BlockSpec((1, 2, cp), lambda b: (b, 0, 0))],
        out_shape=[jax.ShapeDtypeStruct((n, hw, cp), jnp.bfloat16),
                   jax.ShapeDtypeStruct((n, 2, cp), jnp.float32)],
        compiler_params=cparams,
        cost_estimate=pl.CostEstimate(
            flops=2 * n * hw * 9 * cin * cp, transcendentals=0,
            bytes_accessed=x_pad.size * 2 + w1c.size * 2
            + n * hw * cp * 2 + n * 2 * cp * 4),
    )(x_pad, w1c)
    scale1, shift1 = _bn_scale_shift(st1, g1, be1, float(n * hw))

    # ---- stage 2: BN1-apply + ReLU + conv2 (K=3*cp) + BN2 partial stats ----
    y2raw, st2 = pl.pallas_call(
        partial(_bn_relu_conv_stats_kernel, h=h, w=w),
        grid=(n,),
        in_specs=[pl.BlockSpec((1, hw, cp), lambda b: (b, 0, 0)),
                  pl.BlockSpec((1, cp), lambda b: (0, 0)),
                  pl.BlockSpec((1, cp), lambda b: (0, 0)),
                  pl.BlockSpec((3, 3 * cp, cp), lambda b: (0, 0, 0))],
        out_specs=[pl.BlockSpec((1, hw, cp), lambda b: (b, 0, 0)),
                   pl.BlockSpec((1, 2, cp), lambda b: (b, 0, 0))],
        out_shape=[jax.ShapeDtypeStruct((n, hw, cp), jnp.bfloat16),
                   jax.ShapeDtypeStruct((n, 2, cp), jnp.float32)],
        scratch_shapes=[pltpu.VMEM((hp, wp, cp), jnp.bfloat16)],   # bf16 scratch
        compiler_params=cparams,
        cost_estimate=pl.CostEstimate(
            flops=2 * n * hw * 9 * cp * cp, transcendentals=0,
            bytes_accessed=n * hw * cp * 4 + w2c.size * 2 + n * 2 * cp * 4),
    )(y1raw, scale1, shift1, w2c)
    scale2, shift2 = _bn_scale_shift(st2, g2, be2, float(n * hw))

    # ---- stage 3: BN2-apply + 1x1 downsample + residual add + ReLU ---------
    out_p = pl.pallas_call(
        _bn_down_add_relu_kernel,
        grid=(n,),
        in_specs=[pl.BlockSpec((1, hw, cp), lambda b: (b, 0, 0)),
                  pl.BlockSpec((1, hw, cin), lambda b: (b, 0, 0)),
                  pl.BlockSpec((1, cp), lambda b: (0, 0)),
                  pl.BlockSpec((1, cp), lambda b: (0, 0)),
                  pl.BlockSpec((cin, cp), lambda b: (0, 0)),
                  pl.BlockSpec((1, cp), lambda b: (0, 0))],
        out_specs=pl.BlockSpec((1, hw, cp), lambda b: (b, 0, 0)),
        out_shape=jax.ShapeDtypeStruct((n, hw, cp), jnp.float32),
        compiler_params=cparams,
        cost_estimate=pl.CostEstimate(
            flops=2 * n * hw * cin * cp, transcendentals=0,
            bytes_accessed=n * hw * cp * 2 + x_flat.size * 2
            + wdp.size * 2 + n * hw * cp * 4),
    )(y2raw, x_flat, scale2, shift2, wdp, bdp)

    out = out_p.reshape(n, h, w, cp)[..., :cout]
    return jnp.transpose(out, (0, 3, 1, 2))               # back to NCHW


# ---------------------------------------------------------------------------
# Pure-JAX reference (mirrors the PyTorch module in training mode, all f32)
# ---------------------------------------------------------------------------
def _conv_nchw(x, w, b, pad):
    y = lax.conv_general_dilated(
        x, w, window_strides=(1, 1), padding=((pad, pad), (pad, pad)),
        dimension_numbers=("NCHW", "OIHW", "NCHW"))
    return y + b.reshape(1, -1, 1, 1)


def _bn_train(x, gamma, beta):
    mean = jnp.mean(x, axis=(0, 2, 3), keepdims=True)
    var = jnp.mean((x - mean) ** 2, axis=(0, 2, 3), keepdims=True)
    xn = (x - mean) * lax.rsqrt(var + EPS)
    return xn * gamma.reshape(1, -1, 1, 1) + beta.reshape(1, -1, 1, 1)


def basic_block_reference(x, p):
    x_ = x
    y = _conv_nchw(x, p["w1"], p["b1"], 1)
    y = jnp.maximum(_bn_train(y, p["gamma1"], p["beta1"]), 0.0)
    y = _conv_nchw(y, p["w2"], p["b2"], 1)
    y = _bn_train(y, p["gamma2"], p["beta2"])
    x_ = _conv_nchw(x_, p["wd"], p["bd"], 0)
    return jnp.maximum(y + x_, 0.0)


# ---------------------------------------------------------------------------
if __name__ == "__main__":
    key = jax.random.PRNGKey(0)
    N, CIN, COUT, H, W, K = 2, 4, 8, 16, 16, 3

    keys = jax.random.split(key, 11)
    params = {
        "w1": 0.1 * jax.random.normal(keys[0], (COUT, CIN, K, K), jnp.float32),
        "b1": 0.1 * jax.random.normal(keys[1], (COUT,), jnp.float32),
        "w2": 0.1 * jax.random.normal(keys[2], (COUT, COUT, K, K), jnp.float32),
        "b2": 0.1 * jax.random.normal(keys[3], (COUT,), jnp.float32),
        "wd": 0.1 * jax.random.normal(keys[4], (COUT, CIN, 1, 1), jnp.float32),
        "bd": 0.1 * jax.random.normal(keys[5], (COUT,), jnp.float32),
        "gamma1": 1.0 + 0.1 * jax.random.normal(keys[6], (COUT,), jnp.float32),
        "beta1": 0.1 * jax.random.normal(keys[7], (COUT,), jnp.float32),
        "gamma2": 1.0 + 0.1 * jax.random.normal(keys[8], (COUT,), jnp.float32),
        "beta2": 0.1 * jax.random.normal(keys[9], (COUT,), jnp.float32),
    }
    x = jax.random.normal(keys[10], (N, CIN, H, W), jnp.float32)

    fwd = jax.jit(basic_block_forward)
    out = jax.block_until_ready(fwd(x, params))
    ref = jax.block_until_ready(basic_block_reference(x, params))

    assert out.shape == (N, COUT, H, W), out.shape
    # bf16 MXU inputs + bf16 inter-stage activations with f32 accumulation /
    # f32 BatchNorm: ~1e-2-level deviation from the all-f32 reference is
    # expected; structural/semantic errors would be O(1).
    assert jnp.allclose(out, ref, atol=1e-1, rtol=5e-2), (
        float(jnp.max(jnp.abs(out - ref))))
    print("KERNEL_OK")
</pallas_src>

<mosaic_0001>
module attributes {stable_mosaic.version = 11 : i64} {
  func.func @_conv_stats_kernel(%arg0: i32, %arg1: memref<1x18x18x4xbf16, #tpu.memory_space<vmem>>, %arg2: memref<3x12x128xbf16, #tpu.memory_space<vmem>>, %arg3: memref<1x256x128xbf16, #tpu.memory_space<vmem>>, %arg4: memref<1x2x128xf32, #tpu.memory_space<vmem>>) attributes {dimension_semantics = [#tpu.dimension_semantics<parallel>], iteration_bounds = array<i64: 2>, scalar_prefetch = 0 : i64, scratch_operands = 0 : i64, tpu.core_type = #tpu.core_type<tc>, window_params = [{transform_indices = @transform_0, window_bounds = array<i64: 1, 18, 18, 4>}, {pipeline_mode = #tpu.pipeline_mode<synchronous>, transform_indices = @transform_1, window_bounds = array<i64: 3, 12, 128>}, {transform_indices = @transform_2, window_bounds = array<i64: 1, 256, 128>}, {transform_indices = @transform_3, window_bounds = array<i64: 1, 2, 128>}]} {
    %c0 = arith.constant 0 : index
    %c0_0 = arith.constant 0 : index
    %c0_1 = arith.constant 0 : index
    %c0_2 = arith.constant 0 : index
    %0 = vector.load %arg1[%c0, %c0_0, %c0_1, %c0_2] : memref<1x18x18x4xbf16, #tpu.memory_space<vmem>>, vector<1x18x18x4xbf16>
    %1 = vector.shape_cast %0 : vector<1x18x18x4xbf16> to vector<18x18x4xbf16>
    %2 = vector.extract_strided_slice %1 {offsets = [0, 0, 0], sizes = [18, 16, 4], strides = [1, 1, 1]} : vector<18x18x4xbf16> to vector<18x16x4xbf16>
    %3 = vector.extract_strided_slice %1 {offsets = [0, 1, 0], sizes = [18, 16, 4], strides = [1, 1, 1]} : vector<18x18x4xbf16> to vector<18x16x4xbf16>
    %4 = vector.extract_strided_slice %1 {offsets = [0, 2, 0], sizes = [18, 16, 4], strides = [1, 1, 1]} : vector<18x18x4xbf16> to vector<18x16x4xbf16>
    %5 = tpu.concatenate %2, %3, %4 in 2 : vector<18x16x4xbf16>, vector<18x16x4xbf16>, vector<18x16x4xbf16> -> vector<18x16x12xbf16>
    %6 = vector.extract_strided_slice %5 {offsets = [0, 0, 0], sizes = [16, 16, 12], strides = [1, 1, 1]} : vector<18x16x12xbf16> to vector<16x16x12xbf16>
    %7 = vector.shape_cast %6 : vector<16x16x12xbf16> to vector<256x12xbf16>
    %c0_3 = arith.constant 0 : index
    %c0_4 = arith.constant 0 : index
    %c0_5 = arith.constant 0 : index
    %8 = vector.load %arg2[%c0_3, %c0_4, %c0_5] : memref<3x12x128xbf16, #tpu.memory_space<vmem>>, vector<1x12x128xbf16>
    %9 = vector.shape_cast %8 : vector<1x12x128xbf16> to vector<12x128xbf16>
    %cst = arith.constant dense<0.000000e+00> : vector<256x128xf32>
    %10 = tpu.matmul %7, %9, %cst {dimension_numbers = #tpu.dot_dimension_numbers<[1], [0], [0], [1], [0, 0, 1, 1], [], []>} : vector<256x12xbf16>, vector<12x128xbf16>, vector<256x128xf32> -> vector<256x128xf32>
    %11 = vector.extract_strided_slice %5 {offsets = [1, 0, 0], sizes = [16, 16, 12], strides = [1, 1, 1]} : vector<18x16x12xbf16> to vector<16x16x12xbf16>
    %12 = vector.shape_cast %11 : vector<16x16x12xbf16> to vector<256x12xbf16>
    %c1 = arith.constant 1 : index
    %c0_6 = arith.constant 0 : index
    %c0_7 = arith.constant 0 : index
    %13 = vector.load %arg2[%c1, %c0_6, %c0_7] : memref<3x12x128xbf16, #tpu.memory_space<vmem>>, vector<1x12x128xbf16>
    %14 = vector.shape_cast %13 : vector<1x12x128xbf16> to vector<12x128xbf16>
    %cst_8 = arith.constant dense<0.000000e+00> : vector<256x128xf32>
    %15 = tpu.matmul %12, %14, %cst_8 {dimension_numbers = #tpu.dot_dimension_numbers<[1], [0], [0], [1], [0, 0, 1, 1], [], []>} : vector<256x12xbf16>, vector<12x128xbf16>, vector<256x128xf32> -> vector<256x128xf32>
    %16 = arith.addf %10, %15 : vector<256x128xf32>
    %17 = vector.extract_strided_slice %5 {offsets = [2, 0, 0], sizes = [16, 16, 12], strides = [1, 1, 1]} : vector<18x16x12xbf16> to vector<16x16x12xbf16>
    %18 = vector.shape_cast %17 : vector<16x16x12xbf16> to vector<256x12xbf16>
    %c2 = arith.constant 2 : index
    %c0_9 = arith.constant 0 : index
    %c0_10 = arith.constant 0 : index
    %19 = vector.load %arg2[%c2, %c0_9, %c0_10] : memref<3x12x128xbf16, #tpu.memory_space<vmem>>, vector<1x12x128xbf16>
    %20 = vector.shape_cast %19 : vector<1x12x128xbf16> to vector<12x128xbf16>
    %cst_11 = arith.constant dense<0.000000e+00> : vector<256x128xf32>
    %21 = tpu.matmul %18, %20, %cst_11 {dimension_numbers = #tpu.dot_dimension_numbers<[1], [0], [0], [1], [0, 0, 1, 1], [], []>} : vector<256x12xbf16>, vector<12x128xbf16>, vector<256x128xf32> -> vector<256x128xf32>
    %22 = arith.addf %16, %21 : vector<256x128xf32>
    %23 = arith.truncf %22 : vector<256x128xf32> to vector<256x128xbf16>
    %c0_12 = arith.constant 0 : index
    %c0_13 = arith.constant 0 : index
    %c0_14 = arith.constant 0 : index
    %24 = vector.load %arg3[%c0_12, %c0_13, %c0_14] : memref<1x256x128xbf16, #tpu.memory_space<vmem>>, vector<1x256x128xbf16>
    %25 = vector.shape_cast %24 : vector<1x256x128xbf16> to vector<256x128xbf16>
    %26 = vector.shape_cast %23 : vector<256x128xbf16> to vector<1x256x128xbf16>
    tpu.vector_store %arg3[%c0_12, %c0_13, %c0_14], %26 {strides = array<i32>} : memref<1x256x128xbf16, #tpu.memory_space<vmem>>, vector<1x256x128xbf16>,
    %cst_15 = arith.constant dense<0.000000e+00> : vector<128xf32>
    %27 = vector.multi_reduction <add>, %22, %cst_15 [0] : vector<256x128xf32> to vector<128xf32>
    %28 = vector.shape_cast %27 : vector<128xf32> to vector<1x128xf32>
    %29 = arith.mulf %22, %22 : vector<256x128xf32>
    %cst_16 = arith.constant dense<0.000000e+00> : vector<128xf32>
    %30 = vector.multi_reduction <add>, %29, %cst_16 [0] : vector<256x128xf32> to vector<128xf32>
    %31 = vector.shape_cast %30 : vector<128xf32> to vector<1x128xf32>
    %32 = tpu.concatenate %28, %31 in 0 : vector<1x128xf32>, vector<1x128xf32> -> vector<2x128xf32>
    %c0_17 = arith.constant 0 : index
    %c0_18 = arith.constant 0 : index
    %c0_19 = arith.constant 0 : index
    %33 = vector.load %arg4[%c0_17, %c0_18, %c0_19] : memref<1x2x128xf32, #tpu.memory_space<vmem>>, vector<1x2x128xf32>
    %34 = vector.shape_cast %33 : vector<1x2x128xf32> to vector<2x128xf32>
    %35 = vector.shape_cast %32 : vector<2x128xf32> to vector<1x2x128xf32>
    tpu.vector_store %arg4[%c0_17, %c0_18, %c0_19], %35 {strides = array<i32>} : memref<1x2x128xf32, #tpu.memory_space<vmem>>, vector<1x2x128xf32>,
    return
  }
  func.func @transform_0(%arg0: i32) -> (i32, i32, i32, i32) {
    %c0_i32 = arith.constant 0 : i32
    %c0_i32_0 = arith.constant 0 : i32
    %c0_i32_1 = arith.constant 0 : i32
    %c0_i32_2 = arith.constant 0 : i32
    return %arg0, %c0_i32, %c0_i32_0, %c0_i32_1 : i32, i32, i32, i32
  }
  func.func @transform_1(%arg0: i32) -> (i32, i32, i32) {
    %c0_i32 = arith.constant 0 : i32
    %c0_i32_0 = arith.constant 0 : i32
    %c0_i32_1 = arith.constant 0 : i32
    %c0_i32_2 = arith.constant 0 : i32
    return %c0_i32, %c0_i32_0, %c0_i32_1 : i32, i32, i32
  }
  func.func @transform_2(%arg0: i32) -> (i32, i32, i32) {
    %c0_i32 = arith.constant 0 : i32
    %c0_i32_0 = arith.constant 0 : i32
    %c0_i32_1 = arith.constant 0 : i32
    return %arg0, %c0_i32, %c0_i32_0 : i32, i32, i32
  }
  func.func @transform_3(%arg0: i32) -> (i32, i32, i32) {
    %c0_i32 = arith.constant 0 : i32
    %c0_i32_0 = arith.constant 0 : i32
    %c0_i32_1 = arith.constant 0 : i32
    return %arg0, %c0_i32, %c0_i32_0 : i32, i32, i32
  }
}

module attributes {stable_mosaic.version = 11 : i64} {
  func.func @_bn_relu_conv_stats_kernel(%arg0: i32, %arg1: memref<1x256x128xbf16, #tpu.memory_space<vmem>>, %arg2: memref<1x128xf32, #tpu.memory_space<vmem>>, %arg3: memref<1x128xf32, #tpu.memory_space<vmem>>, %arg4: memref<3x384x128xbf16, #tpu.memory_space<vmem>>, %arg5: memref<1x256x128xbf16, #tpu.memory_space<vmem>>, %arg6: memref<1x2x128xf32, #tpu.memory_space<vmem>>, %arg7: memref<18x18x128xbf16, #tpu.memory_space<vmem>>) attributes {dimension_semantics = [#tpu.dimension_semantics<parallel>], iteration_bounds = array<i64: 2>, scalar_prefetch = 0 : i64, scratch_operands = 1 : i64, tpu.core_type = #tpu.core_type<tc>, window_params = [{transform_indices = @transform_0, window_bounds = array<i64: 1, 256, 128>}, {pipeline_mode = #tpu.pipeline_mode<synchronous>, transform_indices = @transform_1, window_bounds = array<i64: 1, 128>}, {pipeline_mode = #tpu.pipeline_mode<synchronous>, transform_indices = @transform_2, window_bounds = array<i64: 1, 128>}, {pipeline_mode = #tpu.pipeline_mode<synchronous>, transform_indices = @transform_3, window_bounds = array<i64: 3, 384, 128>}, {transform_indices = @transform_4, window_bounds = array<i64: 1, 256, 128>}, {transform_indices = @transform_5, window_bounds = array<i64: 1, 2, 128>}]} {
    %c0 = arith.constant 0 : index
    %c0_0 = arith.constant 0 : index
    %c0_1 = arith.constant 0 : index
    %0 = vector.load %arg1[%c0, %c0_0, %c0_1] : memref<1x256x128xbf16, #tpu.memory_space<vmem>>, vector<1x256x128xbf16>
    %1 = vector.shape_cast %0 : vector<1x256x128xbf16> to vector<256x128xbf16>
    %2 = arith.extf %1 : vector<256x128xbf16> to vector<256x128xf32>
    %c0_2 = arith.constant 0 : index
    %c0_3 = arith.constant 0 : index
    %3 = vector.load %arg2[%c0_2, %c0_3] : memref<1x128xf32, #tpu.memory_space<vmem>>, vector<1x128xf32>
    %4 = vector.broadcast %3 : vector<1x128xf32> to vector<256x128xf32>
    %5 = arith.mulf %2, %4 : vector<256x128xf32>
    %c0_4 = arith.constant 0 : index
    %c0_5 = arith.constant 0 : index
    %6 = vector.load %arg3[%c0_4, %c0_5] : memref<1x128xf32, #tpu.memory_space<vmem>>, vector<1x128xf32>
    %7 = vector.broadcast %6 : vector<1x128xf32> to vector<256x128xf32>
    %8 = arith.addf %5, %7 : vector<256x128xf32>
    %cst = arith.constant 0.000000e+00 : f32
    %9 = vector.broadcast %cst : f32 to vector<256x128xf32>
    %10 = arith.maximumf %8, %9 : vector<256x128xf32>
    %cst_6 = arith.constant 0.000000e+00 : bf16
    %11 = vector.broadcast %cst_6 : bf16 to vector<18x128xbf16>
    %c0_7 = arith.constant 0 : index
    %c0_8 = arith.constant 0 : index
    %c0_9 = arith.constant 0 : index
    %12 = vector.load %arg7[%c0_7, %c0_8, %c0_9] : memref<18x18x128xbf16, #tpu.memory_space<vmem>>, vector<1x18x128xbf16>
    %13 = vector.shape_cast %12 : vector<1x18x128xbf16> to vector<18x128xbf16>
    %14 = vector.shape_cast %11 : vector<18x128xbf16> to vector<1x18x128xbf16>
    tpu.vector_store %arg7[%c0_7, %c0_8, %c0_9], %14 {strides = array<i32>} : memref<18x18x128xbf16, #tpu.memory_space<vmem>>, vector<1x18x128xbf16>,
    %cst_10 = arith.constant 0.000000e+00 : bf16
    %15 = vector.broadcast %cst_10 : bf16 to vector<18x128xbf16>
    %c17 = arith.constant 17 : index
    %c0_11 = arith.constant 0 : index
    %c0_12 = arith.constant 0 : index
    %16 = vector.load %arg7[%c17, %c0_11, %c0_12] : memref<18x18x128xbf16, #tpu.memory_space<vmem>>, vector<1x18x128xbf16>
    %17 = vector.shape_cast %16 : vector<1x18x128xbf16> to vector<18x128xbf16>
    %18 = vector.shape_cast %15 : vector<18x128xbf16> to vector<1x18x128xbf16>
    tpu.vector_store %arg7[%c17, %c0_11, %c0_12], %18 {strides = array<i32>} : memref<18x18x128xbf16, #tpu.memory_space<vmem>>, vector<1x18x128xbf16>,
    %cst_13 = arith.constant 0.000000e+00 : bf16
    %19 = vector.broadcast %cst_13 : bf16 to vector<16x1x128xbf16>
    %c1 = arith.constant 1 : index
    %c0_14 = arith.constant 0 : index
    %c0_15 = arith.constant 0 : index
    %20 = vector.load %arg7[%c1, %c0_14, %c0_15] : memref<18x18x128xbf16, #tpu.memory_space<vmem>>, vector<16x1x128xbf16>
    tpu.vector_store %arg7[%c1, %c0_14, %c0_15], %19 {strides = array<i32>} : memref<18x18x128xbf16, #tpu.memory_space<vmem>>, vector<16x1x128xbf16>,
    %cst_16 = arith.constant 0.000000e+00 : bf16
    %21 = vector.broadcast %cst_16 : bf16 to vector<16x1x128xbf16>
    %c1_17 = arith.constant 1 : index
    %c17_18 = arith.constant 17 : index
    %c0_19 = arith.constant 0 : index
    %22 = vector.load %arg7[%c1_17, %c17_18, %c0_19] : memref<18x18x128xbf16, #tpu.memory_space<vmem>>, vector<16x1x128xbf16>
    tpu.vector_store %arg7[%c1_17, %c17_18, %c0_19], %21 {strides = array<i32>} : memref<18x18x128xbf16, #tpu.memory_space<vmem>>, vector<16x1x128xbf16>,
    %23 = arith.truncf %10 : vector<256x128xf32> to vector<256x128xbf16>
    %24 = vector.shape_cast %23 : vector<256x128xbf16> to vector<16x16x128xbf16>
    %c1_20 = arith.constant 1 : index
    %c1_21 = arith.constant 1 : index
    %c0_22 = arith.constant 0 : index
    %25 = vector.load %arg7[%c1_20, %c1_21, %c0_22] : memref<18x18x128xbf16, #tpu.memory_space<vmem>>, vector<16x16x128xbf16>
    tpu.vector_store %arg7[%c1_20, %c1_21, %c0_22], %24 {strides = array<i32>} : memref<18x18x128xbf16, #tpu.memory_space<vmem>>, vector<16x16x128xbf16>,
    %c0_23 = arith.constant 0 : index
    %c0_24 = arith.constant 0 : index
    %c0_25 = arith.constant 0 : index
    %26 = vector.load %arg7[%c0_23, %c0_24, %c0_25] : memref<18x18x128xbf16, #tpu.memory_space<vmem>>, vector<18x18x128xbf16>
    %27 = vector.extract_strided_slice %26 {offsets = [0, 0, 0], sizes = [18, 16, 128], strides = [1, 1, 1]} : vector<18x18x128xbf16> to vector<18x16x128xbf16>
    %28 = vector.extract_strided_slice %26 {offsets = [0, 1, 0], sizes = [18, 16, 128], strides = [1, 1, 1]} : vector<18x18x128xbf16> to vector<18x16x128xbf16>
    %29 = vector.extract_strided_slice %26 {offsets = [0, 2, 0], sizes = [18, 16, 128], strides = [1, 1, 1]} : vector<18x18x128xbf16> to vector<18x16x128xbf16>
    %30 = tpu.concatenate %27, %28, %29 in 2 : vector<18x16x128xbf16>, vector<18x16x128xbf16>, vector<18x16x128xbf16> -> vector<18x16x384xbf16>
    %31 = vector.extract_strided_slice %30 {offsets = [0, 0, 0], sizes = [16, 16, 384], strides = [1, 1, 1]} : vector<18x16x384xbf16> to vector<16x16x384xbf16>
    %32 = vector.shape_cast %31 : vector<16x16x384xbf16> to vector<256x384xbf16>
    %c0_26 = arith.constant 0 : index
    %c0_27 = arith.constant 0 : index
    %c0_28 = arith.constant 0 : index
    %33 = vector.load %arg4[%c0_26, %c0_27, %c0_28] : memref<3x384x128xbf16, #tpu.memory_space<vmem>>, vector<1x384x128xbf16>
    %34 = vector.shape_cast %33 : vector<1x384x128xbf16> to vector<384x128xbf16>
    %cst_29 = arith.constant dense<0.000000e+00> : vector<256x128xf32>
    %35 = tpu.matmul %32, %34, %cst_29 {dimension_numbers = #tpu.dot_dimension_numbers<[1], [0], [0], [1], [0, 0, 1, 1], [], []>} : vector<256x384xbf16>, vector<384x128xbf16>, vector<256x128xf32> -> vector<256x128xf32>
    %36 = vector.extract_strided_slice %30 {offsets = [1, 0, 0], sizes = [16, 16, 384], strides = [1, 1, 1]} : vector<18x16x384xbf16> to vector<16x16x384xbf16>
    %37 = vector.shape_cast %36 : vector<16x16x384xbf16> to vector<256x384xbf16>
    %c1_30 = arith.constant 1 : index
    %c0_31 = arith.constant 0 : index
    %c0_32 = arith.constant 0 : index
    %38 = vector.load %arg4[%c1_30, %c0_31, %c0_32] : memref<3x384x128xbf16, #tpu.memory_space<vmem>>, vector<1x384x128xbf16>
    %39 = vector.shape_cast %38 : vector<1x384x128xbf16> to vector<384x128xbf16>
    %cst_33 = arith.constant dense<0.000000e+00> : vector<256x128xf32>
    %40 = tpu.matmul %37, %39, %cst_33 {dimension_numbers = #tpu.dot_dimension_numbers<[1], [0], [0], [1], [0, 0, 1, 1], [], []>} : vector<256x384xbf16>, vector<384x128xbf16>, vector<256x128xf32> -> vector<256x128xf32>
    %41 = arith.addf %35, %40 : vector<256x128xf32>
    %42 = vector.extract_strided_slice %30 {offsets = [2, 0, 0], sizes = [16, 16, 384], strides = [1, 1, 1]} : vector<18x16x384xbf16> to vector<16x16x384xbf16>
    %43 = vector.shape_cast %42 : vector<16x16x384xbf16> to vector<256x384xbf16>
    %c2 = arith.constant 2 : index
    %c0_34 = arith.constant 0 : index
    %c0_35 = arith.constant 0 : index
    %44 = vector.load %arg4[%c2, %c0_34, %c0_35] : memref<3x384x128xbf16, #tpu.memory_space<vmem>>, vector<1x384x128xbf16>
    %45 = vector.shape_cast %44 : vector<1x384x128xbf16> to vector<384x128xbf16>
    %cst_36 = arith.constant dense<0.000000e+00> : vector<256x128xf32>
    %46 = tpu.matmul %43, %45, %cst_36 {dimension_numbers = #tpu.dot_dimension_numbers<[1], [0], [0], [1], [0, 0, 1, 1], [], []>} : vector<256x384xbf16>, vector<384x128xbf16>, vector<256x128xf32> -> vector<256x128xf32>
    %47 = arith.addf %41, %46 : vector<256x128xf32>
    %48 = arith.truncf %47 : vector<256x128xf32> to vector<256x128xbf16>
    %c0_37 = arith.constant 0 : index
    %c0_38 = arith.constant 0 : index
    %c0_39 = arith.constant 0 : index
    %49 = vector.load %arg5[%c0_37, %c0_38, %c0_39] : memref<1x256x128xbf16, #tpu.memory_space<vmem>>, vector<1x256x128xbf16>
    %50 = vector.shape_cast %49 : vector<1x256x128xbf16> to vector<256x128xbf16>
    %51 = vector.shape_cast %48 : vector<256x128xbf16> to vector<1x256x128xbf16>
    tpu.vector_store %arg5[%c0_37, %c0_38, %c0_39], %51 {strides = array<i32>} : memref<1x256x128xbf16, #tpu.memory_space<vmem>>, vector<1x256x128xbf16>,
    %cst_40 = arith.constant dense<0.000000e+00> : vector<128xf32>
    %52 = vector.multi_reduction <add>, %47, %cst_40 [0] : vector<256x128xf32> to vector<128xf32>
    %53 = vector.shape_cast %52 : vector<128xf32> to vector<1x128xf32>
    %54 = arith.mulf %47, %47 : vector<256x128xf32>
    %cst_41 = arith.constant dense<0.000000e+00> : vector<128xf32>
    %55 = vector.multi_reduction <add>, %54, %cst_41 [0] : vector<256x128xf32> to vector<128xf32>
    %56 = vector.shape_cast %55 : vector<128xf32> to vector<1x128xf32>
    %57 = tpu.concatenate %53, %56 in 0 : vector<1x128xf32>, vector<1x128xf32> -> vector<2x128xf32>
    %c0_42 = arith.constant 0 : index
    %c0_43 = arith.constant 0 : index
    %c0_44 = arith.constant 0 : index
    %58 = vector.load %arg6[%c0_42, %c0_43, %c0_44] : memref<1x2x128xf32, #tpu.memory_space<vmem>>, vector<1x2x128xf32>
    %59 = vector.shape_cast %58 : vector<1x2x128xf32> to vector<2x128xf32>
    %60 = vector.shape_cast %57 : vector<2x128xf32> to vector<1x2x128xf32>
    tpu.vector_store %arg6[%c0_42, %c0_43, %c0_44], %60 {strides = array<i32>} : memref<1x2x128xf32, #tpu.memory_space<vmem>>, vector<1x2x128xf32>,
    return
  }
  func.func @transform_0(%arg0: i32) -> (i32, i32, i32) {
    %c0_i32 = arith.constant 0 : i32
    %c0_i32_0 = arith.constant 0 : i32
    %c0_i32_1 = arith.constant 0 : i32
    return %arg0, %c0_i32, %c0_i32_0 : i32, i32, i32
  }
  func.func @transform_1(%arg0: i32) -> (i32, i32) {
    %c0_i32 = arith.constant 0 : i32
    %c0_i32_0 = arith.constant 0 : i32
    %c0_i32_1 = arith.constant 0 : i32
    return %c0_i32, %c0_i32_0 : i32, i32
  }
  func.func @transform_2(%arg0: i32) -> (i32, i32) {
    %c0_i32 = arith.constant 0 : i32
    %c0_i32_0 = arith.constant 0 : i32
    %c0_i32_1 = arith.constant 0 : i32
    return %c0_i32, %c0_i32_0 : i32, i32
  }
  func.func @transform_3(%arg0: i32) -> (i32, i32, i32) {
    %c0_i32 = arith.constant 0 : i32
    %c0_i32_0 = arith.constant 0 : i32
    %c0_i32_1 = arith.constant 0 : i32
    %c0_i32_2 = arith.constant 0 : i32
    return %c0_i32, %c0_i32_0, %c0_i32_1 : i32, i32, i32
  }
  func.func @transform_4(%arg0: i32) -> (i32, i32, i32) {
    %c0_i32 = arith.constant 0 : i32
    %c0_i32_0 = arith.constant 0 : i32
    %c0_i32_1 = arith.constant 0 : i32
    return %arg0, %c0_i32, %c0_i32_0 : i32, i32, i32
  }
  func.func @transform_5(%arg0: i32) -> (i32, i32, i32) {
    %c0_i32 = arith.constant 0 : i32
    %c0_i32_0 = arith.constant 0 : i32
    %c0_i32_1 = arith.constant 0 : i32
    return %arg0, %c0_i32, %c0_i32_0 : i32, i32, i32
  }
}

module attributes {stable_mosaic.version = 11 : i64} {
  func.func @_bn_down_add_relu_kernel(%arg0: i32, %arg1: memref<1x256x128xbf16, #tpu.memory_space<vmem>>, %arg2: memref<1x256x4xbf16, #tpu.memory_space<vmem>>, %arg3: memref<1x128xf32, #tpu.memory_space<vmem>>, %arg4: memref<1x128xf32, #tpu.memory_space<vmem>>, %arg5: memref<4x128xbf16, #tpu.memory_space<vmem>>, %arg6: memref<1x128xf32, #tpu.memory_space<vmem>>, %arg7: memref<1x256x128xf32, #tpu.memory_space<vmem>>) attributes {dimension_semantics = [#tpu.dimension_semantics<parallel>], iteration_bounds = array<i64: 2>, scalar_prefetch = 0 : i64, scratch_operands = 0 : i64, tpu.core_type = #tpu.core_type<tc>, window_params = [{transform_indices = @transform_0, window_bounds = array<i64: 1, 256, 128>}, {transform_indices = @transform_1, window_bounds = array<i64: 1, 256, 4>}, {pipeline_mode = #tpu.pipeline_mode<synchronous>, transform_indices = @transform_2, window_bounds = array<i64: 1, 128>}, {pipeline_mode = #tpu.pipeline_mode<synchronous>, transform_indices = @transform_3, window_bounds = array<i64: 1, 128>}, {pipeline_mode = #tpu.pipeline_mode<synchronous>, transform_indices = @transform_4, window_bounds = array<i64: 4, 128>}, {pipeline_mode = #tpu.pipeline_mode<synchronous>, transform_indices = @transform_5, window_bounds = array<i64: 1, 128>}, {transform_indices = @transform_6, window_bounds = array<i64: 1, 256, 128>}]} {
    %c0 = arith.constant 0 : index
    %c0_0 = arith.constant 0 : index
    %c0_1 = arith.constant 0 : index
    %0 = vector.load %arg1[%c0, %c0_0, %c0_1] : memref<1x256x128xbf16, #tpu.memory_space<vmem>>, vector<1x256x128xbf16>
    %1 = vector.shape_cast %0 : vector<1x256x128xbf16> to vector<256x128xbf16>
    %2 = arith.extf %1 : vector<256x128xbf16> to vector<256x128xf32>
    %c0_2 = arith.constant 0 : index
    %c0_3 = arith.constant 0 : index
    %3 = vector.load %arg3[%c0_2, %c0_3] : memref<1x128xf32, #tpu.memory_space<vmem>>, vector<1x128xf32>
    %4 = vector.broadcast %3 : vector<1x128xf32> to vector<256x128xf32>
    %5 = arith.mulf %2, %4 : vector<256x128xf32>
    %c0_4 = arith.constant 0 : index
    %c0_5 = arith.constant 0 : index
    %6 = vector.load %arg4[%c0_4, %c0_5] : memref<1x128xf32, #tpu.memory_space<vmem>>, vector<1x128xf32>
    %7 = vector.broadcast %6 : vector<1x128xf32> to vector<256x128xf32>
    %8 = arith.addf %5, %7 : vector<256x128xf32>
    %c0_6 = arith.constant 0 : index
    %c0_7 = arith.constant 0 : index
    %c0_8 = arith.constant 0 : index
    %9 = vector.load %arg2[%c0_6, %c0_7, %c0_8] : memref<1x256x4xbf16, #tpu.memory_space<vmem>>, vector<1x256x4xbf16>
    %10 = vector.shape_cast %9 : vector<1x256x4xbf16> to vector<256x4xbf16>
    %c0_9 = arith.constant 0 : index
    %c0_10 = arith.constant 0 : index
    %11 = vector.load %arg5[%c0_9, %c0_10] : memref<4x128xbf16, #tpu.memory_space<vmem>>, vector<4x128xbf16>
    %cst = arith.constant dense<0.000000e+00> : vector<256x128xf32>
    %12 = tpu.matmul %10, %11, %cst {dimension_numbers = #tpu.dot_dimension_numbers<[1], [0], [0], [1], [0, 0, 1, 1], [], []>} : vector<256x4xbf16>, vector<4x128xbf16>, vector<256x128xf32> -> vector<256x128xf32>
    %c0_11 = arith.constant 0 : index
    %c0_12 = arith.constant 0 : index
    %13 = vector.load %arg6[%c0_11, %c0_12] : memref<1x128xf32, #tpu.memory_space<vmem>>, vector<1x128xf32>
    %14 = vector.broadcast %13 : vector<1x128xf32> to vector<256x128xf32>
    %15 = arith.addf %12, %14 : vector<256x128xf32>
    %16 = arith.addf %8, %15 : vector<256x128xf32>
    %cst_13 = arith.constant 0.000000e+00 : f32
    %17 = vector.broadcast %cst_13 : f32 to vector<256x128xf32>
    %18 = arith.maximumf %16, %17 : vector<256x128xf32>
    %c0_14 = arith.constant 0 : index
    %c0_15 = arith.constant 0 : index
    %c0_16 = arith.constant 0 : index
    %19 = vector.load %arg7[%c0_14, %c0_15, %c0_16] : memref<1x256x128xf32, #tpu.memory_space<vmem>>, vector<1x256x128xf32>
    %20 = vector.shape_cast %19 : vector<1x256x128xf32> to vector<256x128xf32>
    %21 = vector.shape_cast %18 : vector<256x128xf32> to vector<1x256x128xf32>
    tpu.vector_store %arg7[%c0_14, %c0_15, %c0_16], %21 {strides = array<i32>} : memref<1x256x128xf32, #tpu.memory_space<vmem>>, vector<1x256x128xf32>,
    return
  }
  func.func @transform_0(%arg0: i32) -> (i32, i32, i32) {
    %c0_i32 = arith.constant 0 : i32
    %c0_i32_0 = arith.constant 0 : i32
    %c0_i32_1 = arith.constant 0 : i32
    return %arg0, %c0_i32, %c0_i32_0 : i32, i32, i32
  }
  func.func @transform_1(%arg0: i32) -> (i32, i32, i32) {
    %c0_i32 = arith.constant 0 : i32
    %c0_i32_0 = arith.constant 0 : i32
    %c0_i32_1 = arith.constant 0 : i32
    return %arg0, %c0_i32, %c0_i32_0 : i32, i32, i32
  }
  func.func @transform_2(%arg0: i32) -> (i32, i32) {
    %c0_i32 = arith.constant 0 : i32
    %c0_i32_0 = arith.constant 0 : i32
    %c0_i32_1 = arith.constant 0 : i32
    return %c0_i32, %c0_i32_0 : i32, i32
  }
  func.func @transform_3(%arg0: i32) -> (i32, i32) {
    %c0_i32 = arith.constant 0 : i32
    %c0_i32_0 = arith.constant 0 : i32
    %c0_i32_1 = arith.constant 0 : i32
    return %c0_i32, %c0_i32_0 : i32, i32
  }
  func.func @transform_4(%arg0: i32) -> (i32, i32) {
    %c0_i32 = arith.constant 0 : i32
    %c0_i32_0 = arith.constant 0 : i32
    %c0_i32_1 = arith.constant 0 : i32
    return %c0_i32, %c0_i32_0 : i32, i32
  }
  func.func @transform_5(%arg0: i32) -> (i32, i32) {
    %c0_i32 = arith.constant 0 : i32
    %c0_i32_0 = arith.constant 0 : i32
    %c0_i32_1 = arith.constant 0 : i32
    return %c0_i32, %c0_i32_0 : i32, i32
  }
  func.func @transform_6(%arg0: i32) -> (i32, i32, i32) {
    %c0_i32 = arith.constant 0 : i32
    %c0_i32_0 = arith.constant 0 : i32
    %c0_i32_1 = arith.constant 0 : i32
    return %arg0, %c0_i32, %c0_i32_0 : i32, i32, i32
  }
}

</mosaic_0001>

<bundles_post_ra>
// kernel: basic_block_forward.5
= control target key start
LH: loop header
LB: loop body
LE: loop exit
PB: predicated region body
PF: predicated region fallthrough
CT: control target
= control target key end

     0   :  { %s1079_s21 = smov 0   ;;  %s1343_s0 = inlined_call_operand.vmem [shape: bf16[2,256,128], index: 0, kind: input, shape index: {}]   ;;  %s1344_s1 = inlined_call_operand.vmem [shape: bf16[2,256,4], index: 1, kind: input, shape index: {}]   ;;  %s1345_s2 = inlined_call_operand.vmem [shape: f32[1,128], index: 2, kind: input, shape index: {}]   ;;  %s1346_s3 = inlined_call_operand.vmem [shape: f32[1,128], index: 3, kind: input, shape index: {}]   ;;  %s1347_s4 = inlined_call_operand.vmem [shape: bf16[4,128], index: 4, kind: input, shape index: {}]   ;;  %s1348_s5 = inlined_call_operand.vmem [shape: f32[1,128], index: 5, kind: input, shape index: {}]   ;;  %s1349_s6 = inlined_call_operand.vmem [shape: f32[2,256,128], index: 6, kind: output, shape index: {}]  }
   0x1 LB: > { %s831_s22 = sadd.s32 4294967295, %s1042_s21   ;;  %p835_p0 = scmp.ge.s32.totalorder %s1042_s21, 1  ;;  %s1042_s21 = sphi %s1079_s21, %s16_s21  }
   0x2   : > { %p222_p1 = scmp.lt.s32.totalorder %s1042_s21, 3 }
   0x4   : > { %p223_p2 = pnand %p835_p0, %p222_p1 }
   0x5   : > { %p257_p3 = scmp.lt.s32.totalorder (!%p223_p2), %s831_s22, 1 }
   0x6   : > { %226 = sbr.rel (%p223_p2) target bundleno = 213 (0xd5), region = 44 }
   0xb   : > { %v441_v0 = vld [vmem:[%s1347_s4] sm:$0x3]  ;;  %vm575_vm0 = vcmask 1041408   ;;  %s1351_s22 = smov (!%p257_p3, %s831_s22), 1  ;;  %vm526_vm1 = vcmask 31744  }
   0xc   : > { %v577_v1 = vsel %vm575_vm0, %v441_v0, 0  ;;  %s924_s25 = sshll.u32 %s1351_s22, 7  ;;  %v1126_v21 = vld [vmem:[%s1345_s2] ss:$0 sm:$0xff]  ;;  %s926_s14 = sshll.u32 %s1351_s22, 8 }
   0xd   : > { %586 = vmatpush.bf16.msra.mxu0 %v577_v1  ;;  %1022 = vmatpush.bf16.msra.mxu1 %v577_v1  ;;  %s266_s28 = scalar_lea.vmem %s1344_s1, %s924_s25  ;;  %s1119_s7 = scalar_lea.vmem %s1343_s0, %s924_s25  ;;  %v1132_v24 = vld [vmem:[%s1346_s3] ss:$0 sm:$0xff] }
   0xe   : > { %1023 = vmatpush.bf16.msra.mxu2 %v577_v1  ;;  %1024 = vmatpush.bf16.msra.mxu3 %v577_v1  ;;  %v927_v2 = vld [vmem:[%s266_s28] sm:$0xff]  ;;  %v928_v6 = vld [vmem:[%s266_s28 + $0x8] sm:$0xff]  ;;  %v929_v10 = vld [vmem:[%s266_s28 + $0x10] sm:$0xff]  ;;  %s1154_s17 = scalar_lea.vmem %s1349_s6, %s926_s14 }
   0xf   : > { %v931_v3 = vld [vmem:[%s266_s28 + $0x20] sm:$0xff]  ;;  %v932_v7 = vld [vmem:[%s266_s28 + $0x28] sm:$0xff]  ;;  %v933_v11 = vld [vmem:[%s266_s28 + $0x30] sm:$0xff] }
  0x10   : > { %v935_v4 = vld [vmem:[%s266_s28 + $0x40] sm:$0xff]  ;;  %906 = vmatmul.msk.bf16.vlgmr.msra.gmra.mxu0 %vm526_vm1, %v927_v2  ;;  %910 = vmatmul.msk.bf16.vlgmr.msra.gmra.mxu1 %vm526_vm1, %v931_v3  ;;  %v936_v8 = vld [vmem:[%s266_s28 + $0x48] sm:$0xff]  ;;  %v937_v12 = vld [vmem:[%s266_s28 + $0x50] sm:$0xff] }
  0x11   : > { %v939_v5 = vld [vmem:[%s266_s28 + $0x60] sm:$0xff]  ;;  %914 = vmatmul.msk.bf16.vlgmr.msra.gmra.mxu2 %vm526_vm1, %v935_v4  ;;  %v940_v9 = vld [vmem:[%s266_s28 + $0x68] sm:$0xff]  ;;  %v941_v13 = vld [vmem:[%s266_s28 + $0x70] sm:$0xff] }
  0x12   : > { %918 = vmatmul.msk.bf16.vlgmr.msra.gmra.mxu3 %vm526_vm1, %v939_v5  ;;  %v930_v14 = vld [vmem:[%s266_s28 + $0x18] sm:$0xff]  ;;  %v944_v18 = vld [vmem:[%s1119_s7] sm:$0xff]   ;;  %v1157_v45 = vld [vmem:[%s1119_s7 + $0x8] sm:$0xff]  }
  0x13   : > { %v934_v15 = vld [vmem:[%s266_s28 + $0x38] sm:$0xff]  ;;  %v1010_v19 = vld [vmem:[%s1119_s7 + $0x20] sm:$0xff]   ;;  %v945_v20 = vunpack.c.l.bf16 %v944_v18  ;;  %v946_v33 = vunpack.c.h.bf16 %v944_v18  ;;  %v1160_v46 = vld [vmem:[%s1119_s7 + $0x28] sm:$0xff]   ;;  %v949_v57 = vunpack.c.l.bf16 %v1157_v45 }
  0x14   : > { %v938_v16 = vld [vmem:[%s266_s28 + $0x58] sm:$0xff]  ;;  %v961_v22 = vunpack.c.l.bf16 %v1010_v19  ;;  %v1014_v26 = vld [vmem:[%s1119_s7 + $0x40] sm:$0xff]   ;;  %v962_v34 = vunpack.c.h.bf16 %v1010_v19  ;;  %v965_v58 = vunpack.c.l.bf16 %v1160_v46 }
  0x15   : > { %v942_v17 = vld [vmem:[%s266_s28 + $0x78] sm:$0xff]  ;;  %v341_v23 = vmul.f32 %v1126_v21, %v945_v20  ;;  %v1018_v27 = vld [vmem:[%s1119_s7 + $0x60] sm:$0xff]   ;;  %v977_v29 = vunpack.c.l.bf16 %v1014_v26  ;;  %v342_v43 = vmul.f32 %v1126_v21, %v946_v33  ;;  %v978_v51 = vunpack.c.h.bf16 %v1014_v26 }
  0x16   : > { %v349_v25 = vmul.f32 %v1126_v21, %v961_v22  ;;  %v1140_v28 = vld [vmem:[%s1348_s5] ss:$0 sm:$0xff]  ;;  %v993_v30 = vunpack.c.l.bf16 %v1018_v27  ;;  %v350_v44 = vmul.f32 %v1126_v21, %v962_v34  ;;  %v994_v52 = vunpack.c.h.bf16 %v1018_v27 }
  0x17   : > { %v377_v31 = vadd.f32 %v1132_v24, %v341_v23  ;;  %v357_v39 = vmul.f32 %v1126_v21, %v977_v29  ;;  %v378_v55 = vadd.f32 %v1132_v24, %v342_v43  ;;  %v358_v3 = vmul.f32 %v1126_v21, %v978_v51 }
  0x18   : > { %v385_v32 = vadd.f32 %v1132_v24, %v349_v25  ;;  %v365_v40 = vmul.f32 %v1126_v21, %v993_v30  ;;  %v386_v56 = vadd.f32 %v1132_v24, %v350_v44  ;;  %v366_v4 = vmul.f32 %v1126_v21, %v994_v52  ;;  %v1205_v44 = vld [vmem:[%s1119_s7 + $0x10] sm:$0xff]  }
  0x19   : > { %v393_v49 = vadd.f32 %v1132_v24, %v357_v39  ;;  %v950_v25 = vunpack.c.h.bf16 %v1157_v45  ;;  %v966_v26 = vunpack.c.h.bf16 %v1160_v46  ;;  %v1208_v45 = vld [vmem:[%s1119_s7 + $0x30] sm:$0xff]  }
  0x1a   : > { %v401_v50 = vadd.f32 %v1132_v24, %v365_v40 }
  0x1b   : > { %v344_v40 = vmul.f32 %v1126_v21, %v950_v25 }
  0x20   : > { %907 = vmatmul.msk.bf16.gmra.mxu0 %vm526_vm1, %v928_v6  ;;  %911 = vmatmul.msk.bf16.gmra.mxu1 %vm526_vm1, %v932_v7  ;;  %v343_v7 = vmul.f32 %v1126_v21, %v949_v57  ;;  %v969_v57 = vunpack.c.l.bf16 %v1208_v45 }
  0x21   : > { %915 = vmatmul.msk.bf16.gmra.mxu2 %vm526_vm1, %v936_v8  ;;  %v351_v8 = vmul.f32 %v1126_v21, %v965_v58 }
  0x22   : > { %919 = vmatmul.msk.bf16.gmra.mxu3 %vm526_vm1, %v940_v9  ;;  %v1179_v9 = vld [vmem:[%s1119_s7 + $0x48] sm:$0xff]   ;;  %v379_v22 = vadd.f32 %v1132_v24, %v343_v7 }
  0x23   : > { %v387_v23 = vadd.f32 %v1132_v24, %v351_v8 }
  0x30   : > { %908 = vmatmul.msk.bf16.gmra.mxu0 %vm526_vm1, %v929_v10  ;;  %912 = vmatmul.msk.bf16.gmra.mxu1 %vm526_vm1, %v933_v11  ;;  %v1182_v10 = vld [vmem:[%s1119_s7 + $0x68] sm:$0xff]  }
  0x31   : > { %916 = vmatmul.msk.bf16.gmra.mxu2 %vm526_vm1, %v937_v12  ;;  %v997_v18 = vunpack.c.l.bf16 %v1182_v10  ;;  %v998_v51 = vunpack.c.h.bf16 %v1182_v10 }
  0x32   : > { %920 = vmatmul.msk.bf16.gmra.mxu3 %vm526_vm1, %v941_v13 }
  0x40   : > { %909 = vmatmul.msk.bf16.gmra.mxu0 %vm526_vm1, %v930_v14  ;;  %913 = vmatmul.msk.bf16.gmra.mxu1 %vm526_vm1, %v934_v15  ;;  %v394_v15 = vadd.f32 %v1132_v24, %v358_v3  ;;  %v368_v3 = vmul.f32 %v1126_v21, %v998_v51  ;;  %v1273_v51 = vld [vmem:[%s1119_s7 + $0x18] sm:$0xff]  }
  0x41   : > { %917 = vmatmul.msk.bf16.gmra.mxu2 %vm526_vm1, %v938_v16  ;;  %v402_v16 = vadd.f32 %v1132_v24, %v366_v4  ;;  %v1229_v4 = vld [vmem:[%s1119_s7 + $0x50] sm:$0xff]  }
  0x42   : > { %921 = vmatmul.msk.bf16.gmra.mxu3 %vm526_vm1, %v942_v17  ;;  %v981_v17 = vunpack.c.l.bf16 %v1179_v9 }
  0x8d   : > { %v588_v35 = vpop.f32.mrf.mxu0  ;;  %v608_v36 = vpop.f32.mrf.mxu1 }
  0x8e   : > { %v589_v37 = vadd.f32 %v1140_v28, %v588_v35  ;;  %v609_v38 = vadd.f32 %v1140_v28, %v608_v36  ;;  %v359_v36 = vmul.f32 %v1126_v21, %v981_v17  ;;  %v1242_v17 = vld [vmem:[%s1119_s7 + $0x78] sm:$0xff]  }
  0x90   : > { %v668_v41 = vadd.f32 %v589_v37, %v377_v31  ;;  %v676_v42 = vadd.f32 %v609_v38, %v385_v32  ;;  %v367_v37 = vmul.f32 %v1126_v21, %v997_v18 }
  0x92   : > { %v700_v47 = vmax.f32 %v668_v41, 0.0  ;;  %v708_v48 = vmax.f32 %v676_v42, 0.0  ;;  %v352_v41 = vmul.f32 %v1126_v21, %v966_v26 }
  0x94   : > { %732 = vst [vmem:[%s1154_s17] sm:$0xff] %v700_v47  ;;  %v628_v53 = vpop.f32.mrf.mxu2 }
  0x95   : > { %v648_v54 = vpop.f32.mrf.mxu3  ;;  %740 = vst [vmem:[%s1154_s17 + $0x40] sm:$0xff] %v708_v48  ;;  %v629_v59 = vadd.f32 %v1140_v28, %v628_v53  ;;  %v590_v61 = vpop.f32.mrf.mxu0  ;;  %v395_v48 = vadd.f32 %v1132_v24, %v359_v36 }
  0x96   : > { %v649_v60 = vadd.f32 %v1140_v28, %v648_v54  ;;  %v610_v62 = vpop.f32.mrf.mxu1  ;;  %v591_v63 = vadd.f32 %v1140_v28, %v590_v61  ;;  %v380_v54 = vadd.f32 %v1132_v24, %v344_v40 }
  0x97   : > { %v611_v0 = vadd.f32 %v1140_v28, %v610_v62  ;;  %v684_v1 = vadd.f32 %v629_v59, %v393_v49  ;;  %v403_v49 = vadd.f32 %v1132_v24, %v367_v37 }
  0x98   : > { %v692_v2 = vadd.f32 %v649_v60, %v401_v50  ;;  %v669_v5 = vadd.f32 %v591_v63, %v378_v55  ;;  %v982_v50 = vunpack.c.h.bf16 %v1179_v9  ;;  %v388_v55 = vadd.f32 %v1132_v24, %v352_v41 }
  0x99   : > { %v677_v6 = vadd.f32 %v611_v0, %v386_v56  ;;  %v716_v11 = vmax.f32 %v684_v1, 0.0  ;;  %v953_v56 = vunpack.c.l.bf16 %v1205_v44  ;;  %v353_v9 = vmul.f32 %v1126_v21, %v969_v57 }
  0x9a   : > { %v724_v12 = vmax.f32 %v692_v2, 0.0  ;;  %v701_v13 = vmax.f32 %v669_v5, 0.0  ;;  %v360_v2 = vmul.f32 %v1126_v21, %v982_v50  ;;  %v1232_v5 = vld [vmem:[%s1119_s7 + $0x70] sm:$0xff]   ;;  %v986_v57 = vunpack.c.h.bf16 %v1229_v4 }
  0x9b   : > { %v709_v14 = vmax.f32 %v677_v6, 0.0  ;;  %748 = vst [vmem:[%s1154_s17 + $0x80] sm:$0xff] %v716_v11  ;;  %v345_v8 = vmul.f32 %v1126_v21, %v953_v56 }
  0x9c   : > { %756 = vst [vmem:[%s1154_s17 + $0xc0] sm:$0xff] %v724_v12  ;;  %v630_v19 = vpop.f32.mrf.mxu2  ;;  %v396_v18 = vadd.f32 %v1132_v24, %v360_v2 }
  0x9d   : > { %v650_v20 = vpop.f32.mrf.mxu3  ;;  %733 = vst [vmem:[%s1154_s17 + $0x8] sm:$0xff] %v701_v13  ;;  %v631_v27 = vadd.f32 %v1140_v28, %v630_v19  ;;  %v593_v30 = vpop.f32.mrf.mxu0  ;;  %v404_v19 = vadd.f32 %v1132_v24, %v368_v3  ;;  %v381_v26 = vadd.f32 %v1132_v24, %v345_v8 }
  0x9e   : > { %v651_v29 = vadd.f32 %v1140_v28, %v650_v20  ;;  %v613_v31 = vpop.f32.mrf.mxu1  ;;  %741 = vst [vmem:[%s1154_s17 + $0x48] sm:$0xff] %v709_v14  ;;  %v594_v32 = vadd.f32 %v1140_v28, %v593_v30  ;;  %v985_v14 = vunpack.c.l.bf16 %v1229_v4  ;;  %v970_v30 = vunpack.c.h.bf16 %v1208_v45 }
  0x9f   : > { %v614_v33 = vadd.f32 %v1140_v28, %v613_v31  ;;  %v685_v34 = vadd.f32 %v631_v27, %v394_v15  ;;  %v1001_v15 = vunpack.c.l.bf16 %v1232_v5  ;;  %v389_v27 = vadd.f32 %v1132_v24, %v353_v9 }
  0xa0   : > { %v693_v35 = vadd.f32 %v651_v29, %v402_v16  ;;  %v670_v38 = vadd.f32 %v594_v32, %v379_v22  ;;  %v1239_v16 = vld [vmem:[%s1119_s7 + $0x58] sm:$0xff]   ;;  %v1006_v22 = vunpack.c.h.bf16 %v1242_v17  ;;  %v954_v29 = vunpack.c.h.bf16 %v1205_v44 }
  0xa1   : > { %v678_v39 = vadd.f32 %v614_v33, %v387_v23  ;;  %v717_v42 = vmax.f32 %v685_v34, 0.0  ;;  %v990_v20 = vunpack.c.h.bf16 %v1239_v16  ;;  %v369_v40 = vmul.f32 %v1126_v21, %v1001_v15 }
  0xa2   : > { %v725_v43 = vmax.f32 %v693_v35, 0.0  ;;  %v702_v46 = vmax.f32 %v670_v38, 0.0  ;;  %v372_v36 = vmul.f32 %v1126_v21, %v1006_v22  ;;  %v362_v9 = vmul.f32 %v1126_v21, %v986_v57 }
  0xa3   : > { %v710_v47 = vmax.f32 %v678_v39, 0.0  ;;  %749 = vst [vmem:[%s1154_s17 + $0x88] sm:$0xff] %v717_v42  ;;  %v364_v35 = vmul.f32 %v1126_v21, %v990_v20  ;;  %v361_v39 = vmul.f32 %v1126_v21, %v985_v14  ;;  %v405_v56 = vadd.f32 %v1132_v24, %v369_v40 }
  0xa4   : > { %757 = vst [vmem:[%s1154_s17 + $0xc8] sm:$0xff] %v725_v43  ;;  %v633_v52 = vpop.f32.mrf.mxu2  ;;  %v1268_v44 = vadd.f32 %v1132_v24, %v372_v36  ;;  %v398_v22 = vadd.f32 %v1132_v24, %v362_v9 }
  0xa5   : > { %v653_v53 = vpop.f32.mrf.mxu3  ;;  %734 = vst [vmem:[%s1154_s17 + $0x10] sm:$0xff] %v702_v46  ;;  %v634_v58 = vadd.f32 %v1140_v28, %v633_v52  ;;  %v595_v60 = vpop.f32.mrf.mxu0  ;;  %v1265_v43 = vadd.f32 %v1132_v24, %v364_v35  ;;  %v1276_v52 = vld [vmem:[%s1119_s7 + $0x38] sm:$0xff]  }
  0xa6   : > { %v654_v59 = vadd.f32 %v1140_v28, %v653_v53  ;;  %v615_v61 = vpop.f32.mrf.mxu1  ;;  %742 = vst [vmem:[%s1154_s17 + $0x50] sm:$0xff] %v710_v47  ;;  %v596_v62 = vadd.f32 %v1140_v28, %v595_v60  ;;  %v346_v47 = vmul.f32 %v1126_v21, %v954_v29 }
  0xa7   : > { %v616_v63 = vadd.f32 %v1140_v28, %v615_v61  ;;  %v686_v0 = vadd.f32 %v634_v58, %v395_v48  ;;  %v354_v48 = vmul.f32 %v1126_v21, %v970_v30  ;;  %v1002_v58 = vunpack.c.h.bf16 %v1232_v5 }
  0xa8   : > { %v694_v1 = vadd.f32 %v654_v59, %v403_v49  ;;  %v671_v6 = vadd.f32 %v596_v62, %v380_v54  ;;  %v382_v61 = vadd.f32 %v1132_v24, %v346_v47 }
  0xa9   : > { %v679_v7 = vadd.f32 %v616_v63, %v388_v55  ;;  %v718_v10 = vmax.f32 %v686_v0, 0.0  ;;  %v397_v55 = vadd.f32 %v1132_v24, %v361_v39  ;;  %v390_v62 = vadd.f32 %v1132_v24, %v354_v48 }
  0xaa   : > { %v726_v11 = vmax.f32 %v694_v1, 0.0  ;;  %v703_v12 = vmax.f32 %v671_v6, 0.0  ;;  %v957_v63 = vunpack.c.l.bf16 %v1273_v51  ;;  %v973_v0 = vunpack.c.l.bf16 %v1276_v52 }
  0xab   : > { %v711_v13 = vmax.f32 %v679_v7, 0.0  ;;  %750 = vst [vmem:[%s1154_s17 + $0x90] sm:$0xff] %v718_v10  ;;  %v370_v10 = vmul.f32 %v1126_v21, %v1002_v58 }
  0xac   : > { %758 = vst [vmem:[%s1154_s17 + $0xd0] sm:$0xff] %v726_v11  ;;  %v635_v23 = vpop.f32.mrf.mxu2  ;;  %v355_v14 = vmul.f32 %v1126_v21, %v973_v0 }
  0xad   : > { %v655_v25 = vpop.f32.mrf.mxu3  ;;  %735 = vst [vmem:[%s1154_s17 + $0x18] sm:$0xff] %v703_v12  ;;  %v636_v31 = vadd.f32 %v1140_v28, %v635_v23  ;;  %v598_v33 = vpop.f32.mrf.mxu0  ;;  %v406_v23 = vadd.f32 %v1132_v24, %v370_v10 }
  0xae   : > { %v656_v32 = vadd.f32 %v1140_v28, %v655_v25  ;;  %v618_v34 = vpop.f32.mrf.mxu1  ;;  %743 = vst [vmem:[%s1154_s17 + $0x58] sm:$0xff] %v711_v13  ;;  %v599_v37 = vadd.f32 %v1140_v28, %v598_v33  ;;  %v347_v13 = vmul.f32 %v1126_v21, %v957_v63  ;;  %v989_v25 = vunpack.c.l.bf16 %v1239_v16 }
  0xaf   : > { %v619_v38 = vadd.f32 %v1140_v28, %v618_v34  ;;  %v687_v41 = vadd.f32 %v636_v31, %v396_v18  ;;  %v391_v31 = vadd.f32 %v1132_v24, %v355_v14  ;;  %v974_v33 = vunpack.c.h.bf16 %v1276_v52 }
  0xb0   : > { %v695_v42 = vadd.f32 %v656_v32, %v404_v19  ;;  %v672_v45 = vadd.f32 %v599_v37, %v381_v26  ;;  %v1005_v26 = vunpack.c.l.bf16 %v1242_v17  ;;  %v383_v30 = vadd.f32 %v1132_v24, %v347_v13 }
  0xb1   : > { %v680_v46 = vadd.f32 %v619_v38, %v389_v27  ;;  %v719_v49 = vmax.f32 %v687_v41, 0.0  ;;  %v958_v32 = vunpack.c.h.bf16 %v1273_v51  ;;  %v363_v40 = vmul.f32 %v1126_v21, %v989_v25 }
  0xb2   : > { %v727_v50 = vmax.f32 %v695_v42, 0.0  ;;  %v704_v53 = vmax.f32 %v672_v45, 0.0  ;;  %v371_v41 = vmul.f32 %v1126_v21, %v1005_v26  ;;  %v356_v47 = vmul.f32 %v1126_v21, %v974_v33 }
  0xb3   : > { %v712_v54 = vmax.f32 %v680_v46, 0.0  ;;  %751 = vst [vmem:[%s1154_s17 + $0x98] sm:$0xff] %v719_v49  ;;  %v348_v46 = vmul.f32 %v1126_v21, %v958_v32  ;;  %v399_v52 = vadd.f32 %v1132_v24, %v363_v40 }
  0xb4   : > { %759 = vst [vmem:[%s1154_s17 + $0xd8] sm:$0xff] %v727_v50  ;;  %v638_v59 = vpop.f32.mrf.mxu2  ;;  %v392_v57 = vadd.f32 %v1132_v24, %v356_v47 }
  0xb5   : > { %v658_v60 = vpop.f32.mrf.mxu3  ;;  %736 = vst [vmem:[%s1154_s17 + $0x20] sm:$0xff] %v704_v53  ;;  %v639_v1 = vadd.f32 %v1140_v28, %v638_v59  ;;  %v600_v3 = vpop.f32.mrf.mxu0  ;;  %v407_v53 = vadd.f32 %v1132_v24, %v371_v41 }
  0xb6   : > { %v659_v2 = vadd.f32 %v1140_v28, %v658_v60  ;;  %v620_v4 = vpop.f32.mrf.mxu1  ;;  %744 = vst [vmem:[%s1154_s17 + $0x60] sm:$0xff] %v712_v54  ;;  %v601_v5 = vadd.f32 %v1140_v28, %v600_v3 }
  0xb7   : > { %v621_v6 = vadd.f32 %v1140_v28, %v620_v4  ;;  %v688_v7 = vadd.f32 %v639_v1, %v397_v55 }
  0xb8   : > { %v696_v8 = vadd.f32 %v659_v2, %v405_v56  ;;  %v673_v11 = vadd.f32 %v601_v5, %v382_v61  ;;  %v384_v56 = vadd.f32 %v1132_v24, %v348_v46 }
  0xb9   : > { %v681_v12 = vadd.f32 %v621_v6, %v390_v62  ;;  %v720_v15 = vmax.f32 %v688_v7, 0.0 }
  0xba   : > { %v728_v18 = vmax.f32 %v696_v8, 0.0  ;;  %v705_v19 = vmax.f32 %v673_v11, 0.0 }
  0xbb   : > { %v713_v20 = vmax.f32 %v681_v12, 0.0  ;;  %752 = vst [vmem:[%s1154_s17 + $0xa0] sm:$0xff] %v720_v15 }
  0xbc   : > { %760 = vst [vmem:[%s1154_s17 + $0xe0] sm:$0xff] %v728_v18  ;;  %v640_v27 = vpop.f32.mrf.mxu2 }
  0xbd   : > { %v660_v29 = vpop.f32.mrf.mxu3  ;;  %737 = vst [vmem:[%s1154_s17 + $0x28] sm:$0xff] %v705_v19  ;;  %v641_v34 = vadd.f32 %v1140_v28, %v640_v27  ;;  %v603_v36 = vpop.f32.mrf.mxu0 }
  0xbe   : > { %v661_v35 = vadd.f32 %v1140_v28, %v660_v29  ;;  %v623_v16 = vpop.f32.mrf.mxu1  ;;  %745 = vst [vmem:[%s1154_s17 + $0x68] sm:$0xff] %v713_v20  ;;  %v604_v17 = vadd.f32 %v1140_v28, %v603_v36 }
  0xbf   : > { %v624_v37 = vadd.f32 %v1140_v28, %v623_v16  ;;  %v689_v38 = vadd.f32 %v641_v34, %v398_v22 }
  0xc0   : > { %v697_v39 = vadd.f32 %v661_v35, %v406_v23  ;;  %v674_v42 = vadd.f32 %v604_v17, %v383_v30 }
  0xc1   : > { %v682_v45 = vadd.f32 %v624_v37, %v391_v31  ;;  %v721_v48 = vmax.f32 %v689_v38, 0.0 }
  0xc2   : > { %v729_v49 = vmax.f32 %v697_v39, 0.0  ;;  %v706_v50 = vmax.f32 %v674_v42, 0.0 }
  0xc3   : > { %v714_v51 = vmax.f32 %v682_v45, 0.0  ;;  %753 = vst [vmem:[%s1154_s17 + $0xa8] sm:$0xff] %v721_v48 }
  0xc4   : > { %761 = vst [vmem:[%s1154_s17 + $0xe8] sm:$0xff] %v729_v49  ;;  %v643_v54 = vpop.f32.mrf.mxu2 }
  0xc5   : > { %v663_v55 = vpop.f32.mrf.mxu3  ;;  %738 = vst [vmem:[%s1154_s17 + $0x30] sm:$0xff] %v706_v50  ;;  %v644_v21 = vadd.f32 %v1140_v28, %v643_v54  ;;  %v605_v59 = vpop.f32.mrf.mxu0 }
  0xc6   : > { %v664_v58 = vadd.f32 %v1140_v28, %v663_v55  ;;  %v625_v60 = vpop.f32.mrf.mxu1  ;;  %746 = vst [vmem:[%s1154_s17 + $0x70] sm:$0xff] %v714_v51  ;;  %v606_v61 = vadd.f32 %v1140_v28, %v605_v59 }
  0xc7   : > { %v626_v62 = vadd.f32 %v1140_v28, %v625_v60  ;;  %v690_v63 = vadd.f32 %v644_v21, %v399_v52 }
  0xc8   : > { %v698_v0 = vadd.f32 %v664_v58, %v407_v53  ;;  %v675_v1 = vadd.f32 %v606_v61, %v384_v56 }
  0xc9   : > { %v683_v24 = vadd.f32 %v626_v62, %v392_v57  ;;  %v722_v2 = vmax.f32 %v690_v63, 0.0 }
  0xca   : > { %v730_v3 = vmax.f32 %v698_v0, 0.0  ;;  %v707_v4 = vmax.f32 %v675_v1, 0.0 }
  0xcb   : > { %v715_v5 = vmax.f32 %v683_v24, 0.0  ;;  %754 = vst [vmem:[%s1154_s17 + $0xb0] sm:$0xff] %v722_v2 }
  0xcc   : > { %762 = vst [vmem:[%s1154_s17 + $0xf0] sm:$0xff] %v730_v3  ;;  %v645_v6 = vpop.f32.mrf.mxu2 }
  0xcd   : > { %v665_v7 = vpop.f32.mrf.mxu3  ;;  %739 = vst [vmem:[%s1154_s17 + $0x38] sm:$0xff] %v707_v4  ;;  %v646_v8 = vadd.f32 %v1140_v28, %v645_v6 }
  0xce   : > { %v666_v9 = vadd.f32 %v1140_v28, %v665_v7  ;;  %747 = vst [vmem:[%s1154_s17 + $0x78] sm:$0xff] %v715_v5 }
  0xcf   : > { %v691_v10 = vadd.f32 %v646_v8, %v1265_v43 }
  0xd0   : > { %v699_v11 = vadd.f32 %v666_v9, %v1268_v44 }
  0xd1   : > { %v723_v12 = vmax.f32 %v691_v10, 0.0 }
  0xd2   : > { %v731_v13 = vmax.f32 %v699_v11, 0.0 }
  0xd3   : > { %755 = vst [vmem:[%s1154_s17 + $0xb8] sm:$0xff] %v723_v12 }
  0xd4   : > { %763 = vst [vmem:[%s1154_s17 + $0xf8] sm:$0xff] %v731_v13 }
  0xd5 PF: > { %s16_s21 = sadd.s32 1, %s1042_s21  }
  0xd6   : > { %p13_p4 = scmp.ge.s32.totalorder %s16_s21, 4  }
  0xd8   :  { %15 = sbr.rel (!%p13_p4) target bundleno = 1 (0x1), region = 77 }

// kernel: basic_block_forward.3
= control target key start
LH: loop header
LB: loop body
LE: loop exit
PB: predicated region body
PF: predicated region fallthrough
CT: control target
= control target key end

     0   :  { %s1735_s12 = smov 0   ;;  %s2196_s0 = inlined_call_operand.vmem [shape: bf16[2,18,18,4], index: 0, kind: input, shape index: {}]   ;;  %s2197_s1 = inlined_call_operand.vmem [shape: bf16[3,12,128], index: 1, kind: input, shape index: {}]   ;;  %s2198_s2 = inlined_call_operand.vmem [shape: bf16[2,256,128], index: 2, kind: output, shape index: {0}]   ;;  %s2199_s3 = inlined_call_operand.vmem [shape: f32[2,2,128], index: 3, kind: output, shape index: {1}]  }
   0x1 LB: > { %s1427_s13 = sadd.s32 4294967295, %s1711_s12   ;;  %p1431_p0 = scmp.ge.s32.totalorder %s1711_s12, 1  ;;  %s1711_s12 = sphi %s1735_s12, %s14_s12  }
   0x2   : > { %p140_p1 = scmp.lt.s32.totalorder %s1711_s12, 3 }
   0x4   : > { %p141_p2 = pnand %p1431_p0, %p140_p1 }
   0x5   : > { %p168_p3 = scmp.lt.s32.totalorder (!%p141_p2), %s1427_s13, 1  ;;  %s1713_s18 = smov (!%p141_p2), 4  }
   0x6   : > { %144 = sbr.rel (%p141_p2) target bundleno = 501 (0x1f5), region = 28  ;;  %s1714_s19 = smov (!%p141_p2), 8  }
   0xb   : > { %s2201_s13 = smov (!%p168_p3, %s1427_s13), 1  ;;  %vm381_vm0 = vsmask.f32 7424  ;;  %vm634_vm1 = vcmask 1046528   ;;  %vm842_vm2 = vcmask 1045504   ;;  %vm725_vm3 = vcmask 31744  }
   0xc   : > { %s1694_s14 = smul.u32 216, %s2201_s13  ;;  %vm762_vm4 = vcmask 64512   ;;  %vm809_vm5 = vcmask 97280   ;;  %s1574_s5 = sshll.u32 %s2201_s13, 7  ;;  %vm1338_vm6 = vcmask 1040384  }
   0xd   : > { %s2086_s8 = scalar_lea.vmem %s2198_s2, %s1574_s5  ;;  %s1435_s9 = sshll.u32 %s2201_s13, 1 }
   0xe   : > { %s1749_s17 = scalar_lea.vmem %s2196_s0, %s1694_s14  ;;  %s181_s14 = scalar_lea.vmem %s2199_s3, %s1435_s9 }
   0xf   : > { %v1752_v0 = vld [vmem:[%s1749_s17 + $0x18] sm:$0xff]  ;;  %v191_v1 = vld [vmem:[%s1749_s17 + $0x20] sm:$0x1]  ;;  %v185_v4 = vld [vmem:[%s1749_s17 + $0x8] sm:$0x1] }
  0x10   : > { %v1756_v2 = vld [vmem:[%s1749_s17] sm:$0xff]  ;;  %v347_v3 = vunpack.c.l.b16 %v191_v1  ;;  %v1760_v5 = vld [vmem:[%s1749_s17 + $0xc] sm:$0xff]  ;;  %v188_v6 = vld [vmem:[%s1749_s17 + $0x14] sm:$0x1]  ;;  %v407_v7 = vshrl.u32 %v1752_v0, 16  ;;  %v409_v8 = vshll.u32 %v1752_v0, 16  ;;  %v345_v9 = vunpack.c.l.b16 %v185_v4 }
  0x11   : > { %v383_v11 = vshrl.u32 %v1756_v2, 16  ;;  %v385_v12 = vshll.u32 %v1756_v2, 16  ;;  %v346_v13 = vunpack.c.l.b16 %v188_v6  ;;  %v194_v14 = vld [vmem:[%s1749_s17 + $0x2c] sm:$0x1]  ;;  %v397_v17 = vshll.u32 %v1760_v5, 16  ;;  %v1772_v30 = vld [vmem:[%s1749_s17 + $0x24] sm:$0xff] }
  0x12   : > { %v365_v10 = vpack.c.b16 %v347_v3, %v347_v3  ;;  %v411_v15 = vrot.slane %v409_v8, 1  ;;  %v363_v16 = vpack.c.b16 %v345_v9, %v345_v9  ;;  %v395_v23 = vshrl.u32 %v1760_v5, 16  ;;  %v224_v25 = vld [vmem:[%s1749_s17 + $0xa4] sm:$0x1]  ;;  %v1775_v32 = vld [vmem:[%s1749_s17 + $0x9c] sm:$0xff]  ;;  %v1793_v54 = vld [vmem:[%s1749_s17 + $0x30] sm:$0xff] }
  0x13   : > { %v387_v19 = vrot.slane %v385_v12, 1  ;;  %v364_v20 = vpack.c.b16 %v346_v13, %v346_v13  ;;  %v348_v24 = vunpack.c.l.b16 %v194_v14  ;;  %v399_v28 = vrot.slane %v397_v17, 1  ;;  %v197_v46 = vld [vmem:[%s1749_s17 + $0x38] sm:$0x1]  ;;  %v227_v1 = vld [vmem:[%s1749_s17 + $0xb0] sm:$0x1] }
  0x14   : > { %v414_v18 = vshll.u32 %v365_v10, 16  ;;  %v412_v21 = vor.u32 %v411_v15, %v407_v7  ;;  %v390_v22 = vshll.u32 %v363_v16, 16  ;;  %v358_v34 = vunpack.c.l.b16 %v224_v25  ;;  %v1802_v7 = vld [vmem:[%s1749_s17 + $0xa8] sm:$0xff] }
  0x15   : > { %v388_v27 = vor.u32 %v387_v19, %v383_v11  ;;  %v402_v29 = vshll.u32 %v364_v20, 16  ;;  %v641_v36 = vrot.slane %v1752_v0, 1  ;;  %v642_v37 = vrot.slane %v365_v10, 1 }
  0x16   : > { %v416_v26 = vrot.slane %v414_v18, 1  ;;  %v392_v31 = vrot.slane %v390_v22, 1  ;;  %v366_v38 = vpack.c.b16 %v348_v24, %v348_v24  ;;  %v400_v39 = vor.u32 %v399_v28, %v395_v23  ;;  %v200_v22 = vld [vmem:[%s1749_s17 + $0x44] sm:$0x1]  ;;  %v230_v24 = vld [vmem:[%s1749_s17 + $0xbc] sm:$0x1] }
  0x17   : > { %v404_v40 = vrot.slane %v402_v29, 1  ;;  %v421_v41 = vshll.u32 %v1772_v30, 16  ;;  %v376_v42 = vpack.c.b16 %v358_v34, %v358_v34  ;;  %v541_v43 = vshll.u32 %v1775_v32, 16 }
  0x18   : > { %v417_v33 = vsel %vm381_vm0, %v412_v21, %v416_v26  ;;  %v393_v35 = vsel %vm381_vm0, %v388_v27, %v392_v31  ;;  %v635_v44 = vrot.slane %v1756_v2, 1  ;;  %v636_v45 = vrot.slane %v363_v16, 1  ;;  %v1820_v31 = vld [vmem:[%s1749_s17 + $0xb4] sm:$0xff] }
  0x19   : > { %602 = vrot.lane.b32.xlu0 %v417_v33, %s1713_s18  ;;  %598 = vrot.lane.b32.xlu1 %v393_v35, %s1713_s18  ;;  %v643_v47 = vsel %vm634_vm1, %v641_v36, %v642_v37  ;;  %v419_v48 = vshrl.u32 %v1772_v30, 16  ;;  %v426_v49 = vshll.u32 %v366_v38, 16  ;;  %v405_v51 = vsel %vm381_vm0, %v400_v39, %v404_v40  ;;  %v1824_v35 = vld [vmem:[%s1749_s17 + $0x3c] sm:$0xff] }
  0x1a   : > { %v637_v50 = vsel %vm634_vm1, %v635_v44, %v636_v45  ;;  %v423_v52 = vrot.slane %v421_v41, 1  ;;  %v539_v53 = vshrl.u32 %v1775_v32, 16  ;;  %v349_v55 = vunpack.c.l.b16 %v197_v46  ;;  %v203_v46 = vld [vmem:[%s1749_s17 + $0x50] sm:$0x1] }
  0x1b   : > { %689 = vrot.lane.b32.xlu2 %v637_v50, %s1714_s19  ;;  %v543_v56 = vrot.slane %v541_v43, 1  ;;  %v546_v57 = vshll.u32 %v376_v42, 16  ;;  %v638_v58 = vrot.slane %v1760_v5, 1  ;;  %v639_v59 = vrot.slane %v364_v20, 1 }
  0x1c   : > { %v424_v60 = vor.u32 %v423_v52, %v419_v48  ;;  %v428_v61 = vrot.slane %v426_v49, 1  ;;  %v367_v62 = vpack.c.b16 %v349_v55, %v349_v55  ;;  %v433_v63 = vshll.u32 %v1793_v54, 16 }
  0x1d   : > { %v544_v3 = vor.u32 %v543_v56, %v539_v53  ;;  %v548_v4 = vrot.slane %v546_v57, 1  ;;  %v640_v6 = vsel %vm634_vm1, %v638_v58, %v639_v59  ;;  %v359_v8 = vunpack.c.l.b16 %v227_v1  ;;  %v1840_v58 = vld [vmem:[%s1749_s17 + $0x48] sm:$0xff] }
  0x1e   : > { %v429_v9 = vsel %vm381_vm0, %v424_v60, %v428_v61  ;;  %v431_v10 = vshrl.u32 %v1793_v54, 16  ;;  %v435_v11 = vrot.slane %v433_v63, 1  ;;  %v438_v12 = vshll.u32 %v367_v62, 16  ;;  %v1844_v60 = vld [vmem:[%s1749_s17 + $0xc0] sm:$0xff] }
  0x1f   : > { %v549_v13 = vsel %vm381_vm0, %v544_v3, %v548_v4  ;;  %v644_v14 = vrot.slane %v1772_v30, 1  ;;  %v645_v15 = vrot.slane %v366_v38, 1  ;;  %v553_v16 = vshll.u32 %v1802_v7, 16 }
  0x20   : > { %v377_v17 = vpack.c.b16 %v359_v8, %v359_v8  ;;  %v674_v18 = vrot.slane %v1775_v32, 1  ;;  %v675_v19 = vrot.slane %v376_v42, 1  ;;  %v436_v20 = vor.u32 %v435_v11, %v431_v10 }
  0x21   : > { %693 = vrot.lane.b32.xlu0 %v643_v47, %s1714_s19  ;;  %600 = vrot.lane.b32.xlu1 %v405_v51, %s1713_s18  ;;  %v440_v21 = vrot.slane %v438_v12, 1  ;;  %v646_v23 = vsel %vm634_vm1, %v644_v14, %v645_v15  ;;  %v551_v25 = vshrl.u32 %v1802_v7, 16  ;;  %v555_v26 = vrot.slane %v553_v16, 1  ;;  %v233_v51 = vld [vmem:[%s1749_s17 + $0xc8] sm:$0x1] }
  0x22   : > { %v558_v27 = vshll.u32 %v377_v17, 16  ;;  %v350_v28 = vunpack.c.l.b16 %v200_v22  ;;  %v676_v29 = vsel %vm634_vm1, %v674_v18, %v675_v19  ;;  %v360_v33 = vunpack.c.l.b16 %v230_v24 }
  0x23   : > { %691 = vrot.lane.b32.xlu2 %v640_v6, %s1714_s19  ;;  %v441_v34 = vsel %vm381_vm0, %v436_v20, %v440_v21  ;;  %v556_v36 = vor.u32 %v555_v26, %v551_v25  ;;  %v647_v38 = vrot.slane %v1793_v54, 1  ;;  %v648_v39 = vrot.slane %v367_v62, 1  ;;  %v1859_v20 = vld [vmem:[%s1749_s17 + $0x54] sm:$0xff] }
  0x24   : > { %v560_v37 = vrot.slane %v558_v27, 1  ;;  %v368_v40 = vpack.c.b16 %v350_v28, %v350_v28  ;;  %v445_v41 = vshll.u32 %v1824_v35, 16  ;;  %v677_v42 = vrot.slane %v1802_v7, 1  ;;  %v1532_v27 = vld [vmem:[%s2197_s1] sm:$0xf] }
  0x25   : > { %v678_v43 = vrot.slane %v377_v17, 1  ;;  %v378_v44 = vpack.c.b16 %v360_v33, %v360_v33  ;;  %v565_v45 = vshll.u32 %v1820_v31, 16  ;;  %v443_v48 = vshrl.u32 %v1824_v35, 16 }
  0x26   : > { %v561_v47 = vsel %vm381_vm0, %v556_v36, %v560_v37  ;;  %v447_v49 = vrot.slane %v445_v41, 1  ;;  %v450_v50 = vshll.u32 %v368_v40, 16  ;;  %v351_v52 = vunpack.c.l.b16 %v203_v46  ;;  %v1593_v36 = vld [vmem:[%s2197_s1] sm:$0x30]  ;;  %v1874_v41 = vld [vmem:[%s1749_s17 + $0x90] sm:$0xff] }
  0x27   : > { %v649_v53 = vsel %vm634_vm1, %v647_v38, %v648_v39  ;;  %v563_v55 = vshrl.u32 %v1820_v31, 16  ;;  %v567_v56 = vrot.slane %v565_v45, 1  ;;  %v570_v57 = vshll.u32 %v378_v44, 16 }
  0x28   : > { %v679_v59 = vsel %vm634_vm1, %v677_v42, %v678_v43  ;;  %v361_v61 = vunpack.c.l.b16 %v233_v51  ;;  %v448_v62 = vor.u32 %v447_v49, %v443_v48  ;;  %v452_v63 = vrot.slane %v450_v50, 1 }
  0x29   : > { %604 = vrot.lane.b32.xlu0 %v429_v9, %s1713_s18  ;;  %624 = vrot.lane.b32.xlu1 %v549_v13, %s1713_s18  ;;  %v650_v1 = vrot.slane %v1824_v35, 1  ;;  %v651_v3 = vrot.slane %v368_v40, 1  ;;  %v369_v4 = vpack.c.b16 %v351_v52, %v351_v52  ;;  %v568_v6 = vor.u32 %v567_v56, %v563_v55  ;;  %v206_v13 = vld [vmem:[%s1749_s17 + $0x5c] sm:$0x1] }
  0x2a   : > { %v572_v8 = vrot.slane %v570_v57, 1  ;;  %v457_v9 = vshll.u32 %v1840_v58, 16  ;;  %v379_v10 = vpack.c.b16 %v361_v61, %v361_v61  ;;  %v577_v11 = vshll.u32 %v1844_v60, 16 }
  0x2b   : > { %695 = vrot.lane.b32.xlu2 %v646_v23, %s1714_s19  ;;  %v453_v12 = vsel %vm381_vm0, %v448_v62, %v452_v63  ;;  %v652_v14 = vsel %vm634_vm1, %v650_v1, %v651_v3  ;;  %v455_v15 = vshrl.u32 %v1840_v58, 16  ;;  %v462_v16 = vshll.u32 %v369_v4, 16 }
  0x2c   : > { %v573_v17 = vsel %vm381_vm0, %v568_v6, %v572_v8  ;;  %v459_v18 = vrot.slane %v457_v9, 1  ;;  %v575_v19 = vshrl.u32 %v1844_v60, 16  ;;  %v352_v21 = vunpack.c.l.b16 %v206_v13 }
  0x2d   : > { %v579_v22 = vrot.slane %v577_v11, 1  ;;  %v582_v23 = vshll.u32 %v379_v10, 16  ;;  %v680_v24 = vrot.slane %v1820_v31, 1  ;;  %v681_v25 = vrot.slane %v378_v44, 1 }
  0x2e   : > { %v464_v26 = vrot.slane %v462_v16, 1  ;;  %v460_v28 = vor.u32 %v459_v18, %v455_v15  ;;  %v469_v33 = vshll.u32 %v1859_v20, 16  ;;  %v1533_v40 = vor.u32 %v1593_v36, %v1532_v27  ;;  %v1902_v16 = vld [vmem:[%s1749_s17 + $0x60] sm:$0xff] }
  0x2f   : > { %v580_v37 = vor.u32 %v579_v22, %v575_v19  ;;  %v584_v38 = vrot.slane %v582_v23, 1  ;;  %v682_v39 = vsel %vm634_vm1, %v680_v24, %v681_v25  ;;  %v467_v45 = vshrl.u32 %v1859_v20, 16  ;;  %v212_v23 = vld [vmem:[%s1749_s17 + $0x74] sm:$0x1]  ;;  %v1913_v24 = vld [vmem:[%s1749_s17 + $0x6c] sm:$0xff] }
  0x30   : > { %v1877_v43 = vsel %vm842_vm2, %v1533_v40, 0  ;;  %v465_v44 = vsel %vm381_vm0, %v460_v28, %v464_v26  ;;  %v471_v46 = vrot.slane %v469_v33, 1  ;;  %v653_v49 = vrot.slane %v1840_v58, 1 }
  0x31   : > { %715 = vrot.lane.b32.xlu0 %v676_v29, %s1714_s19  ;;  %606 = vrot.lane.b32.xlu1 %v441_v34, %s1713_s18  ;;  %v370_v29 = vpack.c.b16 %v352_v21, %v352_v21  ;;  %v221_v34 = vld [vmem:[%s1749_s17 + $0x98] sm:$0x1]  ;;  %v585_v48 = vsel %vm381_vm0, %v580_v37, %v584_v38  ;;  %v654_v50 = vrot.slane %v369_v4, 1  ;;  %v529_v51 = vshll.u32 %v1874_v41, 16  ;;  %v209_v4 = vld [vmem:[%s1749_s17 + $0x68] sm:$0x1] }
  0x32   : > { %v357_v42 = vunpack.c.l.b16 %v221_v34  ;;  %952 = vmatpush.bf16.msra.mxu1 %v1877_v43  ;;  %v684_v55 = vrot.slane %v379_v10, 1  ;;  %v472_v56 = vor.u32 %v471_v46, %v467_v45  ;;  %v527_v61 = vshrl.u32 %v1874_v41, 16  ;;  %v1554_v37 = vld [vmem:[%s2197_s1 + $0x10] sm:$0xf]  ;;  %v1595_v38 = vld [vmem:[%s2197_s1 + $0x10] sm:$0x30] }
  0x33   : > { %626 = vrot.lane.b32.xlu2 %v561_v47, %s1713_s18  ;;  %v474_v47 = vshll.u32 %v370_v29, 16  ;;  %v531_v62 = vrot.slane %v529_v51, 1  ;;  %v656_v9 = vrot.slane %v1859_v20, 1  ;;  %v657_v10 = vrot.slane %v370_v29, 1 }
  0x34   : > { %v375_v52 = vpack.c.b16 %v357_v42, %v357_v42  ;;  %v353_v11 = vunpack.c.l.b16 %v209_v4  ;;  %v659_v19 = vrot.slane %v1902_v16, 1  ;;  %v354_v25 = vunpack.c.l.b16 %v212_v23 }
  0x35   : > { %v476_v57 = vrot.slane %v474_v47, 1  ;;  %v532_v6 = vor.u32 %v531_v62, %v527_v61  ;;  %v658_v15 = vsel %vm634_vm1, %v656_v9, %v657_v10  ;;  %v493_v27 = vshll.u32 %v1913_v24, 16 }
  0x36   : > { %v534_v63 = vshll.u32 %v375_v52, 16  ;;  %v672_v13 = vrot.slane %v375_v52, 1  ;;  %v372_v26 = vpack.c.b16 %v354_v25, %v354_v25  ;;  %v491_v28 = vshrl.u32 %v1913_v24, 16 }
  0x37   : > { %v477_v3 = vsel %vm381_vm0, %v472_v56, %v476_v57  ;;  %v495_v29 = vrot.slane %v493_v27, 1  ;;  %v1555_v42 = vor.u32 %v1595_v38, %v1554_v37  ;;  %v481_v47 = vshll.u32 %v1902_v16, 16  ;;  %v1942_v57 = vld [vmem:[%s1749_s17 + $0x78] sm:$0xff] }
  0x38   : > { %v536_v8 = vrot.slane %v534_v63, 1  ;;  %v498_v33 = vshll.u32 %v372_v26, 16  ;;  %v505_v62 = vshll.u32 %v1942_v57, 16  ;;  %v503_v63 = vshrl.u32 %v1942_v57, 16 }
  0x39   : > { %697 = vrot.lane.b32.xlu0 %v649_v53, %s1714_s19  ;;  %717 = vrot.lane.b32.xlu1 %v679_v59, %s1714_s19  ;;  %v683_v53 = vrot.slane %v1844_v60, 1  ;;  %v655_v59 = vsel %vm634_vm1, %v653_v49, %v654_v50  ;;  %v496_v34 = vor.u32 %v495_v29, %v491_v28  ;;  %v1932_v46 = vsel %vm842_vm2, %v1555_v42, 0 }
  0x3a   : > { %v500_v36 = vrot.slane %v498_v33, 1  ;;  %1054 = vmatpush.bf16.msra.mxu2 %v1932_v46  ;;  %v479_v49 = vshrl.u32 %v1902_v16, 16  ;;  %v483_v50 = vrot.slane %v481_v47, 1 }
  0x3b   : > { %608 = vrot.lane.b32.xlu2 %v453_v12, %s1713_s18  ;;  %v685_v1 = vsel %vm634_vm1, %v683_v53, %v684_v55  ;;  %v671_v12 = vrot.slane %v1874_v41, 1  ;;  %v215_v55 = vld [vmem:[%s1749_s17 + $0x80] sm:$0x1] }
  0x3c   : > { %v501_v40 = vsel %vm381_vm0, %v496_v34, %v500_v36  ;;  %v484_v52 = vor.u32 %v483_v50, %v479_v49 }
  0x3d   : > { %v673_v18 = vsel %vm634_vm1, %v671_v12, %v672_v13  ;;  %v663_v12 = vrot.slane %v372_v26, 1 }
  0x41   : > { %628 = vrot.lane.b32.xlu0 %v573_v17, %s1713_s18  ;;  %699 = vrot.lane.b32.xlu1 %v652_v14, %s1714_s19  ;;  %v537_v14 = vsel %vm381_vm0, %v532_v6, %v536_v8  ;;  %v371_v17 = vpack.c.b16 %v353_v11, %v353_v11  ;;  %v665_v6 = vrot.slane %v1942_v57, 1  ;;  %v662_v11 = vrot.slane %v1913_v24, 1 }
  0x43   : > { %719 = vrot.lane.b32.xlu2 %v682_v39, %s1714_s19  ;;  %v660_v21 = vrot.slane %v371_v17, 1  ;;  %v1512_v39 = vld [vmem:[%s2197_s1 + $0x8] sm:$0xf]  ;;  %v486_v51 = vshll.u32 %v371_v17, 16 }
  0x45   : > { %v661_v22 = vsel %vm634_vm1, %v659_v19, %v660_v21  ;;  %v488_v53 = vrot.slane %v486_v51, 1 }
  0x47   : > { %v489_v56 = vsel %vm381_vm0, %v484_v52, %v488_v53 }
  0x49   : > { %610 = vrot.lane.b32.xlu0 %v465_v44, %s1713_s18  ;;  %630 = vrot.lane.b32.xlu1 %v585_v48, %s1713_s18  ;;  %v1594_v44 = vld [vmem:[%s2197_s1 + $0x8] sm:$0x30] }
  0x4a   : > { %v1513_v45 = vor.u32 %v1594_v44, %v1512_v39 }
  0x4b   : > { %701 = vrot.lane.b32.xlu2 %v655_v59, %s1714_s19  ;;  %v355_v59 = vunpack.c.l.b16 %v215_v55 }
  0x4c   : > { %v844_v48 = vsel %vm842_vm2, %v1513_v45, 0 }
  0x4d   : > { %853 = vmatpush.bf16.msra.mxu0 %v844_v48  ;;  %1691 = vmatpush.bf16.msra.mxu3 %v844_v48  ;;  %v373_v61 = vpack.c.b16 %v355_v59, %v355_v59 }
  0x4f   : > { %v666_v8 = vrot.slane %v373_v61, 1 }
  0x51   : > { %721 = vrot.lane.b32.xlu0 %v685_v1, %s1714_s19  ;;  %612 = vrot.lane.b32.xlu1 %v477_v3, %s1713_s18  ;;  %v507_v1 = vrot.slane %v505_v62, 1  ;;  %v510_v3 = vshll.u32 %v373_v61, 16  ;;  %v667_v10 = vsel %vm634_vm1, %v665_v6, %v666_v8 }
  0x52   : > { %1692 = vmatpush.bf16.msrb.mxu3 %v1877_v43 }
  0x53   : > { %622 = vrot.lane.b32.xlu2 %v537_v14, %s1713_s18  ;;  %v508_v4 = vor.u32 %v507_v1, %v503_v63  ;;  %v512_v43 = vrot.slane %v510_v3, 1  ;;  %v664_v14 = vsel %vm634_vm1, %v662_v11, %v663_v12  ;;  %v236_v3 = vld [vmem:[%s1749_s17 + $0xd4] sm:$0x1] }
  0x55   : > { %v513_v9 = vsel %vm381_vm0, %v508_v4, %v512_v43  ;;  %v362_v4 = vunpack.c.l.b16 %v236_v3 }
  0x57   : > { %v380_v43 = vpack.c.b16 %v362_v4, %v362_v4 }
  0x59   : > { %703 = vrot.lane.b32.xlu0 %v658_v15, %s1714_s19  ;;  %713 = vrot.lane.b32.xlu1 %v673_v18, %s1714_s19  ;;  %v218_v15 = vld [vmem:[%s1749_s17 + $0x8c] sm:$0x1] }
  0x5a   : > { %v356_v18 = vunpack.c.l.b16 %v218_v15 }
  0x5b   : > { %614 = vrot.lane.b32.xlu2 %v489_v56, %s1713_s18 }
  0x5c   : > { %v374_v23 = vpack.c.b16 %v356_v18, %v356_v18 }
  0x5e   : > { %v669_v27 = vrot.slane %v374_v23, 1  ;;  %v522_v51 = vshll.u32 %v374_v23, 16 }
  0x61   : > { %705 = vrot.lane.b32.xlu0 %v661_v22, %s1714_s19  ;;  %616 = vrot.lane.b32.xlu1 %v501_v40, %s1713_s18  ;;  %v1959_v22 = vld [vmem:[%s1749_s17 + $0x84] sm:$0xff] }
  0x62   : > { %v668_v26 = vrot.slane %v1959_v22, 1  ;;  %v517_v45 = vshll.u32 %v1959_v22, 16  ;;  %v515_v49 = vshrl.u32 %v1959_v22, 16 }
  0x63   : > { %707 = vrot.lane.b32.xlu2 %v664_v14, %s1714_s19 }
  0x64   : > { %v670_v28 = vsel %vm634_vm1, %v668_v26, %v669_v27  ;;  %v519_v50 = vrot.slane %v517_v45, 1 }
  0x66   : > { %v520_v52 = vor.u32 %v519_v50, %v515_v49 }
  0x69   : > { %618 = vrot.lane.b32.xlu0 %v513_v9, %s1713_s18  ;;  %709 = vrot.lane.b32.xlu1 %v667_v10, %s1714_s19  ;;  %v594_v10 = vshll.u32 %v380_v43, 16 }
  0x6b   : > { %v596_v12 = vrot.slane %v594_v10, 1 }
  0x71   : > { %711 = vrot.lane.b32.xlu0 %v670_v28, %s1714_s19 }
  0x75   : > { %v690_v13 = vpop.permute.xlu2 %689 }
  0x7d   : > { %v692_v34 = vpop.permute.xlu2 %691 }
  0x85   : > { %v696_v42 = vpop.permute.xlu2 %695 }
  0x8b   : > { %v603_v17 = vpop.permute.xlu0 %602  ;;  %v599_v19 = vpop.permute.xlu1 %598 }
  0x8c   : > { %v727_v21 = vsel %vm725_vm3, %v1756_v2, %v599_v19  ;;  %v731_v29 = vsel %vm725_vm3, %v1752_v0, %v603_v17 }
  0x8d   : > { %v764_v25 = vsel %vm762_vm4, %v727_v21, %v690_v13  ;;  %v627_v55 = vpop.permute.xlu2 %626 }
  0x8e   : > { %1534 = vmatmul.msk.bf16.vlgmr.msra.gmra.mxu1 %vm809_vm5, %v764_v25  ;;  %v755_v56 = vsel %vm725_vm3, %v1802_v7, %v627_v55  ;;  %v2007_v7 = vld [vmem:[%s1749_s17 + $0xcc] sm:$0xff] }
  0x8f   : > { %v587_v8 = vshrl.u32 %v2007_v7, 16 }
  0x93   : > { %v694_v33 = vpop.permute.xlu0 %693  ;;  %v601_v2 = vpop.permute.xlu1 %600 }
  0x94   : > { %v768_v36 = vsel %vm762_vm4, %v731_v29, %v694_v33  ;;  %v729_v37 = vsel %vm725_vm3, %v1760_v5, %v601_v2 }
  0x95   : > { %1556 = vmatmul.msk.bf16.vlgmr.msra.gmra.mxu2 %vm809_vm5, %v768_v36  ;;  %v766_v38 = vsel %vm762_vm4, %v729_v37, %v692_v34  ;;  %v609_v1 = vpop.permute.xlu2 %608  ;;  %v687_v34 = vrot.slane %v380_v43, 1 }
  0x96   : > { %1514 = vmatmul.msk.bf16.vlgmr.msra.gmra.mxu0 %vm809_vm5, %v766_v38  ;;  %v737_v17 = vsel %vm725_vm3, %v1824_v35, %v609_v1 }
  0x9b   : > { %v605_v39 = vpop.permute.xlu0 %604  ;;  %v625_v40 = vpop.permute.xlu1 %624 }
  0x9c   : > { %v733_v0 = vsel %vm725_vm3, %v1772_v30, %v605_v39  ;;  %v753_v44 = vsel %vm725_vm3, %v1775_v32, %v625_v40  ;;  %v524_v32 = vrot.slane %v522_v51, 1 }
  0x9d   : > { %v770_v47 = vsel %vm762_vm4, %v733_v0, %v696_v42  ;;  %v720_v14 = vpop.permute.xlu2 %719 }
  0x9e   : > { %1535 = vmatmul.msk.bf16.gmra.mxu1 %vm809_vm5, %v766_v38  ;;  %v525_v53 = vsel %vm381_vm0, %v520_v52, %v524_v32 }
  0x9f   : > { %620 = vrot.lane.b32.xlu2 %v525_v53, %s1713_s18 }
  0xa3   : > { %v716_v5 = vpop.permute.xlu0 %715  ;;  %v607_v30 = vpop.permute.xlu1 %606 }
  0xa4   : > { %v1982_v48 = vsel %vm762_vm4, %v753_v44, %v716_v5  ;;  %v735_v61 = vsel %vm725_vm3, %v1793_v54, %v607_v30  ;;  %v589_v54 = vshll.u32 %v2007_v7, 16 }
  0xa5   : > { %1526 = vmatmul.msk.bf16.vlgmr.msra.gmra.mxu3 %vm809_vm5, %v1982_v48  ;;  %1557 = vmatmul.msk.bf16.gmra.mxu2 %vm809_vm5, %v770_v47  ;;  %v702_v27 = vpop.permute.xlu2 %701 }
  0xa6   : > { %1693 = vmatpush.bf16.msra.mxu3 %v1932_v46  ;;  %1515 = vmatmul.msk.bf16.gmra.mxu0 %vm809_vm5, %v768_v36  ;;  %v591_v9 = vrot.slane %v589_v54, 1 }
  0xa8   : > { %v592_v11 = vor.u32 %v591_v9, %v587_v8 }
  0xaa   : > { %v597_v15 = vsel %vm381_vm0, %v592_v11, %v596_v12 }
  0xab   : > { %v718_v59 = vpop.permute.xlu1 %717  ;;  %v698_v62 = vpop.permute.xlu0 %697  ;;  %632 = vrot.lane.b32.xlu1 %v597_v15, %s1713_s18 }
  0xac   : > { %v1998_v46 = vsel %vm762_vm4, %v755_v56, %v718_v59  ;;  %v772_v63 = vsel %vm762_vm4, %v735_v61, %v698_v62 }
  0xae   : > { %1536 = vmatmul.msk.bf16.gmra.mxu1 %vm809_vm5, %v768_v36 }
  0xb3   : > { %v629_v6 = vpop.permute.xlu0 %628  ;;  %v700_v18 = vpop.permute.xlu1 %699 }
  0xb4   : > { %v757_v13 = vsel %vm725_vm3, %v1820_v31, %v629_v6  ;;  %v774_v21 = vsel %vm762_vm4, %v737_v17, %v700_v18 }
  0xb5   : > { %1527 = vmatmul.msk.bf16.gmra.mxu3 %vm809_vm5, %v1998_v46  ;;  %1558 = vmatmul.msk.bf16.gmra.mxu2 %vm809_vm5, %v772_v63  ;;  %v2019_v19 = vsel %vm762_vm4, %v757_v13, %v720_v14 }
  0xb6   : > { %1516 = vmatmul.msk.bf16.gmra.mxu0 %vm809_vm5, %v770_v47 }
  0xbb   : > { %v611_v31 = vpop.permute.xlu0 %610  ;;  %v631_v23 = vpop.permute.xlu1 %630 }
  0xbc   : > { %v759_v35 = vsel %vm725_vm3, %v1844_v60, %v631_v23  ;;  %v739_v26 = vsel %vm725_vm3, %v1840_v58, %v611_v31  ;;  %v686_v60 = vrot.slane %v2007_v7, 1  ;;  %v623_v58 = vpop.permute.xlu2 %622 }
  0xbd   : > { %v776_v29 = vsel %vm762_vm4, %v739_v26, %v702_v27  ;;  %v751_v36 = vsel %vm725_vm3, %v1874_v41, %v623_v58 }
  0xbe   : > { %1537 = vmatmul.msk.bf16.gmra.mxu1 %vm809_vm5, %v770_v47  ;;  %v688_v2 = vsel %vm634_vm1, %v686_v60, %v687_v34 }
  0xbf   : > { %723 = vrot.lane.b32.xlu2 %v688_v2, %s1714_s19 }
  0xc3   : > { %v722_v25 = vpop.permute.xlu0 %721  ;;  %v613_v33 = vpop.permute.xlu1 %612 }
  0xc4   : > { %v2032_v28 = vsel %vm762_vm4, %v759_v35, %v722_v25  ;;  %v741_v38 = vsel %vm725_vm3, %v1859_v20, %v613_v33  ;;  %v615_v42 = vpop.permute.xlu2 %614 }
  0xc5   : > { %1528 = vmatmul.msk.bf16.gmra.mxu3 %vm809_vm5, %v2019_v19  ;;  %1559 = vmatmul.msk.bf16.gmra.mxu2 %vm809_vm5, %v774_v21  ;;  %v743_v41 = vsel %vm725_vm3, %v1902_v16, %v615_v42 }
  0xc6   : > { %1517 = vmatmul.msk.bf16.gmra.mxu0 %vm809_vm5, %v772_v63 }
  0xcb   : > { %v714_v37 = vpop.permute.xlu1 %713  ;;  %v704_v39 = vpop.permute.xlu0 %703 }
  0xcc   : > { %v2048_v40 = vsel %vm762_vm4, %v751_v36, %v714_v37  ;;  %v778_v0 = vsel %vm762_vm4, %v741_v38, %v704_v39  ;;  %v708_v47 = vpop.permute.xlu2 %707 }
  0xce   : > { %1538 = vmatmul.msk.bf16.gmra.mxu1 %vm809_vm5, %v772_v63 }
  0xd3   : > { %v706_v20 = vpop.permute.xlu0 %705  ;;  %v617_v45 = vpop.permute.xlu1 %616 }
  0xd4   : > { %v780_v44 = vsel %vm762_vm4, %v743_v41, %v706_v20  ;;  %v745_v5 = vsel %vm725_vm3, %v1913_v24, %v617_v45 }
  0xd5   : > { %1529 = vmatmul.msk.bf16.gmra.mxu3 %vm809_vm5, %v2032_v28  ;;  %1560 = vmatmul.msk.bf16.gmra.mxu2 %vm809_vm5, %v776_v29  ;;  %v782_v49 = vsel %vm762_vm4, %v745_v5, %v708_v47 }
  0xd6   : > { %1518 = vmatmul.msk.bf16.gmra.mxu0 %vm809_vm5, %v774_v21 }
  0xdb   : > { %v619_v50 = vpop.permute.xlu0 %618  ;;  %v710_v30 = vpop.permute.xlu1 %709 }
  0xdc   : > { %v747_v51 = vsel %vm725_vm3, %v1942_v57, %v619_v50 }
  0xdd   : > { %v784_v24 = vsel %vm762_vm4, %v747_v51, %v710_v30 }
  0xde   : > { %1539 = vmatmul.msk.bf16.gmra.mxu1 %vm809_vm5, %v774_v21 }
  0xe3   : > { %v712_v1 = vpop.permute.xlu0 %711 }
  0xe5   : > { %1546 = vmatmul.msk.bf16.vlgmr.msrb.gmra.mxu3 %vm809_vm5, %v2048_v40  ;;  %1561 = vmatmul.msk.bf16.gmra.mxu2 %vm809_vm5, %v778_v0 }
  0xe6   : > { %1519 = vmatmul.msk.bf16.gmra.mxu0 %vm809_vm5, %v776_v29 }
  0xee   : > { %1540 = vmatmul.msk.bf16.gmra.mxu1 %vm809_vm5, %v776_v29 }
  0xf5   : > { %1547 = vmatmul.msk.bf16.gmra.mxu3 %vm809_vm5, %v1982_v48  ;;  %1562 = vmatmul.msk.bf16.gmra.mxu2 %vm809_vm5, %v780_v44 }
  0xf6   : > { %1520 = vmatmul.msk.bf16.gmra.mxu0 %vm809_vm5, %v778_v0 }
  0xf9   : > { %v621_v55 = vpop.permute.xlu2 %620 }
  0xfa   : > { %v749_v63 = vsel %vm725_vm3, %v1959_v22, %v621_v55 }
  0xfb   : > { %v786_v43 = vsel %vm762_vm4, %v749_v63, %v712_v1 }
  0xfe   : > { %1541 = vmatmul.msk.bf16.gmra.mxu1 %vm809_vm5, %v778_v0 }
 0x105   : > { %1548 = vmatmul.msk.bf16.gmra.mxu3 %vm809_vm5, %v1998_v46  ;;  %1563 = vmatmul.msk.bf16.gmra.mxu2 %vm809_vm5, %v782_v49 }
 0x106   : > { %1521 = vmatmul.msk.bf16.gmra.mxu0 %vm809_vm5, %v780_v44 }
 0x10b   : > { %v954_v16 = vpop.f32.mrf.mxu1 }
 0x10e   : > { %1542 = vmatmul.msk.bf16.gmra.mxu1 %vm809_vm5, %v780_v44 }
 0x113   : > { %v855_v52 = vpop.f32.mrf.mxu0  ;;  %v956_v32 = vpop.f32.mrf.mxu1 }
 0x114   : > { %v955_v61 = vadd.f32 %v954_v16, %v855_v52 }
 0x115   : > { %1549 = vmatmul.msk.bf16.gmra.mxu3 %vm809_vm5, %v2019_v19  ;;  %1564 = vmatmul.msk.bf16.gmra.mxu2 %vm809_vm5, %v784_v24 }
 0x116   : > { %1522 = vmatmul.msk.bf16.gmra.mxu0 %vm809_vm5, %v782_v49 }
 0x118   : > { %v1056_v53 = vpop.f32.mrf.mxu2 }
 0x119   : > { %v1136_v62 = vadd.f32 %v1056_v53, %v955_v61 }
 0x11b   : > { %v857_v56 = vpop.f32.mrf.mxu0  ;;  %v959_v59 = vpop.f32.mrf.mxu1  ;;  %v1269_v54 = vmul.f32 %v1136_v62, %v1136_v62 }
 0x11c   : > { %v957_v57 = vadd.f32 %v956_v32, %v857_v56 }
 0x11e   : > { %1543 = vmatmul.msk.bf16.gmra.mxu1 %vm809_vm5, %v782_v49 }
 0x120   : > { %v1058_v3 = vpop.f32.mrf.mxu2 }
 0x121   : > { %v1137_v4 = vadd.f32 %v1058_v3, %v957_v57 }
 0x123   : > { %v1599_v6 = vpack.c.bf16 %v1137_v4, %v1136_v62  ;;  %v1232_v8 = vadd.f32 %v1137_v4, %v1136_v62  ;;  %v1270_v9 = vmul.f32 %v1137_v4, %v1137_v4  ;;  %v860_v10 = vpop.f32.mrf.mxu0  ;;  %v961_v11 = vpop.f32.mrf.mxu1 }
 0x124   : > { %v960_v22 = vadd.f32 %v959_v59, %v860_v10  ;;  %v633_v59 = vpop.permute.xlu1 %632 }
 0x125   : > { %1600 = vst [vmem:[%s2086_s8] sm:$0xff] %v1599_v6   ;;  %v1301_v12 = vadd.f32 %v1270_v9, %v1269_v54  ;;  %1565 = vmatmul.msk.bf16.gmra.mxu2 %vm809_vm5, %v786_v43  ;;  %1568 = vmatmul.msk.bf16.vlgmr.msra.gmra.mxu3 %vm809_vm5, %v1998_v46 }
 0x126   : > { %1523 = vmatmul.msk.bf16.gmra.mxu0 %vm809_vm5, %v784_v24 }
 0x128   : > { %v2094_v13 = vpop.f32.mrf.mxu3  ;;  %v1061_v14 = vpop.f32.mrf.mxu2 }
 0x129   : > { %v1138_v15 = vadd.f32 %v1061_v14, %v960_v22 }
 0x12b   : > { %v1233_v17 = vadd.f32 %v1232_v8, %v1138_v15  ;;  %v1271_v18 = vmul.f32 %v1138_v15, %v1138_v15  ;;  %v862_v21 = vpop.f32.mrf.mxu0  ;;  %v964_v31 = vpop.f32.mrf.mxu1 }
 0x12c   : > { %v962_v35 = vadd.f32 %v961_v11, %v862_v21 }
 0x12d   : > { %v1302_v23 = vadd.f32 %v1301_v12, %v1271_v18 }
 0x12e   : > { %1544 = vmatmul.msk.bf16.gmra.mxu1 %vm809_vm5, %v784_v24 }
 0x130   : > { %v2097_v25 = vpop.f32.mrf.mxu3  ;;  %v1063_v26 = vpop.f32.mrf.mxu2 }
 0x131   : > { %v1139_v46 = vadd.f32 %v1063_v26, %v962_v35 }
 0x133   : > { %v1604_v27 = vpack.c.bf16 %v1139_v46, %v1138_v15  ;;  %v1234_v29 = vadd.f32 %v1233_v17, %v1139_v46  ;;  %v1272_v33 = vmul.f32 %v1139_v46, %v1139_v46  ;;  %v865_v60 = vpop.f32.mrf.mxu0  ;;  %v966_v34 = vpop.f32.mrf.mxu1 }
 0x134   : > { %v965_v58 = vadd.f32 %v964_v31, %v865_v60 }
 0x135   : > { %1676 = vst [vmem:[%s2086_s8 + $0x8] sm:$0xff] %v1604_v27   ;;  %v1303_v2 = vadd.f32 %v1302_v23, %v1272_v33  ;;  %1566 = vmatmul.msk.bf16.gmra.mxu2 %vm809_vm5, %v2048_v40  ;;  %1569 = vmatmul.msk.bf16.gmra.mxu3 %vm809_vm5, %v2019_v19 }
 0x136   : > { %1524 = vmatmul.msk.bf16.gmra.mxu0 %vm809_vm5, %v786_v43 }
 0x138   : > { %v2105_v36 = vpop.f32.mrf.mxu3  ;;  %v1066_v37 = vpop.f32.mrf.mxu2 }
 0x139   : > { %v1140_v38 = vadd.f32 %v1066_v37, %v965_v58 }
 0x13b   : > { %v1235_v39 = vadd.f32 %v1234_v29, %v1140_v38  ;;  %v1273_v0 = vmul.f32 %v1140_v38, %v1140_v38  ;;  %v867_v42 = vpop.f32.mrf.mxu0  ;;  %v969_v41 = vpop.f32.mrf.mxu1 }
 0x13c   : > { %v967_v44 = vadd.f32 %v966_v34, %v867_v42 }
 0x13d   : > { %v1304_v20 = vadd.f32 %v1303_v2, %v1273_v0 }
 0x13e   : > { %1545 = vmatmul.msk.bf16.gmra.mxu1 %vm809_vm5, %v786_v43 }
 0x140   : > { %v2108_v45 = vpop.f32.mrf.mxu3  ;;  %v1068_v5 = vpop.f32.mrf.mxu2 }
 0x141   : > { %v1141_v19 = vadd.f32 %v1068_v5, %v967_v44 }
 0x143   : > { %v1609_v47 = vpack.c.bf16 %v1141_v19, %v1140_v38  ;;  %v1236_v49 = vadd.f32 %v1235_v39, %v1141_v19  ;;  %v1274_v16 = vmul.f32 %v1141_v19, %v1141_v19  ;;  %v870_v50 = vpop.f32.mrf.mxu0  ;;  %v971_v51 = vpop.f32.mrf.mxu1 }
 0x144   : > { %v970_v24 = vadd.f32 %v969_v41, %v870_v50 }
 0x145   : > { %1677 = vst [vmem:[%s2086_s8 + $0x10] sm:$0xff] %v1609_v47   ;;  %v1305_v30 = vadd.f32 %v1304_v20, %v1274_v16  ;;  %1567 = vmatmul.msk.bf16.gmra.mxu2 %vm809_vm5, %v1982_v48  ;;  %1570 = vmatmul.msk.bf16.gmra.mxu3 %vm809_vm5, %v2032_v28  ;;  %v761_v48 = vsel %vm725_vm3, %v2007_v7, %v633_v59  ;;  %v724_v28 = vpop.permute.xlu2 %723 }
 0x146   : > { %1525 = vmatmul.msk.bf16.gmra.mxu0 %vm809_vm5, %v2048_v40  ;;  %v798_v4 = vsel %vm762_vm4, %v761_v48, %v724_v28 }
 0x148   : > { %v2117_v52 = vpop.f32.mrf.mxu3  ;;  %v1071_v32 = vpop.f32.mrf.mxu2 }
 0x149   : > { %v1142_v53 = vadd.f32 %v1071_v32, %v970_v24 }
 0x14b   : > { %v1237_v55 = vadd.f32 %v1236_v49, %v1142_v53  ;;  %v1275_v56 = vmul.f32 %v1142_v53, %v1142_v53  ;;  %v872_v61 = vpop.f32.mrf.mxu0  ;;  %v974_v62 = vpop.f32.mrf.mxu1 }
 0x14c   : > { %v972_v63 = vadd.f32 %v971_v51, %v872_v61 }
 0x14d   : > { %v1306_v57 = vadd.f32 %v1305_v30, %v1275_v56 }
 0x150   : > { %v2121_v1 = vpop.f32.mrf.mxu3  ;;  %v1073_v3 = vpop.f32.mrf.mxu2 }
 0x151   : > { %v1143_v40 = vadd.f32 %v1073_v3, %v972_v63 }
 0x153   : > { %v1614_v43 = vpack.c.bf16 %v1143_v40, %v1142_v53  ;;  %v1238_v54 = vadd.f32 %v1237_v55, %v1143_v40  ;;  %v1276_v6 = vmul.f32 %v1143_v40, %v1143_v40  ;;  %v875_v8 = vpop.f32.mrf.mxu0  ;;  %v976_v9 = vpop.f32.mrf.mxu1 }
 0x154   : > { %v975_v11 = vadd.f32 %v974_v62, %v875_v8 }
 0x155   : > { %1678 = vst [vmem:[%s2086_s8 + $0x18] sm:$0xff] %v1614_v43   ;;  %v1307_v10 = vadd.f32 %v1306_v57, %v1276_v6  ;;  %1571 = vmatmul.msk.bf16.gmra.mxu3 %vm809_vm5, %v798_v4 }
 0x158   : > { %v2126_v12 = vpop.f32.mrf.mxu3  ;;  %v1076_v7 = vpop.f32.mrf.mxu2 }
 0x159   : > { %v1144_v22 = vadd.f32 %v1076_v7, %v975_v11 }
 0x15b   : > { %v1239_v14 = vadd.f32 %v1238_v54, %v1144_v22  ;;  %v1277_v15 = vmul.f32 %v1144_v22, %v1144_v22  ;;  %v877_v17 = vpop.f32.mrf.mxu0  ;;  %v979_v18 = vpop.f32.mrf.mxu1 }
 0x15c   : > { %v977_v31 = vadd.f32 %v976_v9, %v877_v17 }
 0x15d   : > { %v1308_v21 = vadd.f32 %v1307_v10, %v1277_v15 }
 0x160   : > { %v2128_v23 = vpop.f32.mrf.mxu3  ;;  %v1078_v35 = vpop.f32.mrf.mxu2 }
 0x161   : > { %v1145_v26 = vadd.f32 %v1078_v35, %v977_v31 }
 0x163   : > { %v1619_v46 = vpack.c.bf16 %v1145_v26, %v1144_v22  ;;  %v1240_v27 = vadd.f32 %v1239_v14, %v1145_v26  ;;  %v1278_v29 = vmul.f32 %v1145_v26, %v1145_v26  ;;  %v880_v33 = vpop.f32.mrf.mxu0  ;;  %v981_v60 = vpop.f32.mrf.mxu1 }
 0x164   : > { %v980_v2 = vadd.f32 %v979_v18, %v880_v33 }
 0x165   : > { %1679 = vst [vmem:[%s2086_s8 + $0x20] sm:$0xff] %v1619_v46   ;;  %v1309_v34 = vadd.f32 %v1308_v21, %v1278_v29 }
 0x168   : > { %v1014_v58 = vpop.f32.mrf.mxu3  ;;  %v1081_v37 = vpop.f32.mrf.mxu2 }
 0x169   : > { %v2132_v38 = vadd.f32 %v1014_v58, %v2094_v13  ;;  %v1146_v39 = vadd.f32 %v1081_v37, %v980_v2 }
 0x16b   : > { %v1241_v0 = vadd.f32 %v1240_v27, %v1146_v39  ;;  %v1279_v42 = vmul.f32 %v1146_v39, %v1146_v39  ;;  %v882_v41 = vpop.f32.mrf.mxu0  ;;  %v984_v20 = vpop.f32.mrf.mxu1 }
 0x16c   : > { %v982_v5 = vadd.f32 %v981_v60, %v882_v41 }
 0x16d   : > { %v1310_v44 = vadd.f32 %v1309_v34, %v1279_v42 }
 0x170   : > { %v1016_v19 = vpop.f32.mrf.mxu3  ;;  %v1083_v47 = vpop.f32.mrf.mxu2 }
 0x171   : > { %v1147_v49 = vadd.f32 %v1083_v47, %v982_v5 }
 0x173   : > { %v1624_v16 = vpack.c.bf16 %v1147_v49, %v1146_v39  ;;  %v2134_v50 = vadd.f32 %v1241_v0, %v1147_v49  ;;  %v1280_v51 = vmul.f32 %v1147_v49, %v1147_v49  ;;  %v885_v30 = vpop.f32.mrf.mxu0  ;;  %v986_v24 = vpop.f32.mrf.mxu1 }
 0x174   : > { %v985_v61 = vadd.f32 %v984_v20, %v885_v30 }
 0x175   : > { %1680 = vst [vmem:[%s2086_s8 + $0x28] sm:$0xff] %v1624_v16   ;;  %v2137_v13 = vadd.f32 %v1310_v44, %v1280_v51 }
 0x178   : > { %v1019_v32 = vpop.f32.mrf.mxu3  ;;  %v1086_v53 = vpop.f32.mrf.mxu2 }
 0x179   : > { %v2140_v55 = vadd.f32 %v1019_v32, %v2105_v36  ;;  %v1148_v48 = vadd.f32 %v1086_v53, %v985_v61 }
 0x17b   : > { %v887_v56 = vpop.f32.mrf.mxu0  ;;  %v989_v59 = vpop.f32.mrf.mxu1  ;;  %v1243_v61 = vadd.f32 %v2134_v50, %v1148_v48 }
 0x17c   : > { %v987_v62 = vadd.f32 %v986_v24, %v887_v56  ;;  %v1281_v56 = vmul.f32 %v1148_v48, %v1148_v48 }
 0x180   : > { %v2142_v57 = vpop.f32.mrf.mxu3  ;;  %v1088_v63 = vpop.f32.mrf.mxu2 }
 0x181   : > { %v1149_v28 = vadd.f32 %v1088_v63, %v987_v62 }
 0x183   : > { %v1629_v3 = vpack.c.bf16 %v1149_v28, %v1148_v48  ;;  %v890_v40 = vpop.f32.mrf.mxu0  ;;  %v991_v4 = vpop.f32.mrf.mxu1  ;;  %v1282_v62 = vmul.f32 %v1149_v28, %v1149_v28 }
 0x184   : > { %v990_v9 = vadd.f32 %v989_v59, %v890_v40 }
 0x185   : > { %1681 = vst [vmem:[%s2086_s8 + $0x30] sm:$0xff] %v1629_v3   ;;  %v1244_v3 = vadd.f32 %v1243_v61, %v1149_v28 }
 0x188   : > { %v1024_v43 = vpop.f32.mrf.mxu3  ;;  %v1091_v54 = vpop.f32.mrf.mxu2 }
 0x189   : > { %v2146_v6 = vadd.f32 %v1024_v43, %v2117_v52  ;;  %v1150_v22 = vadd.f32 %v1091_v54, %v990_v9 }
 0x18b   : > { %v892_v36 = vpop.f32.mrf.mxu0  ;;  %v994_v8 = vpop.f32.mrf.mxu1  ;;  %v1283_v40 = vmul.f32 %v1150_v22, %v1150_v22 }
 0x18c   : > { %v992_v10 = vadd.f32 %v991_v4, %v892_v36  ;;  %v1022_v4 = vadd.f32 %v2142_v57, %v2108_v45 }
 0x190   : > { %v2148_v11 = vpop.f32.mrf.mxu3  ;;  %v1093_v7 = vpop.f32.mrf.mxu2 }
 0x191   : > { %v1151_v14 = vadd.f32 %v1093_v7, %v992_v10 }
 0x193   : > { %v1634_v15 = vpack.c.bf16 %v1151_v14, %v1150_v22  ;;  %v895_v17 = vpop.f32.mrf.mxu0  ;;  %v996_v18 = vpop.f32.mrf.mxu1  ;;  %v1284_v9 = vmul.f32 %v1151_v14, %v1151_v14 }
 0x194   : > { %v995_v46 = vadd.f32 %v994_v8, %v895_v17  ;;  %v1245_v8 = vadd.f32 %v1244_v3, %v1150_v22 }
 0x195   : > { %1682 = vst [vmem:[%s2086_s8 + $0x38] sm:$0xff] %v1634_v15  }
 0x198   : > { %v1029_v21 = vpop.f32.mrf.mxu3  ;;  %v1096_v31 = vpop.f32.mrf.mxu2 }
 0x199   : > { %v2152_v35 = vadd.f32 %v1029_v21, %v2126_v12  ;;  %v1152_v60 = vadd.f32 %v1096_v31, %v995_v46  ;;  %v1017_v12 = vadd.f32 %v1016_v19, %v2097_v25 }
 0x19b   : > { %v897_v52 = vpop.f32.mrf.mxu0  ;;  %v999_v26 = vpop.f32.mrf.mxu1  ;;  %v1285_v28 = vmul.f32 %v1152_v60, %v1152_v60 }
 0x19c   : > { %v997_v27 = vadd.f32 %v996_v18, %v897_v52  ;;  %v1246_v18 = vadd.f32 %v1245_v8, %v1151_v14 }
 0x19e   : > { %v1247_v22 = vadd.f32 %v1246_v18, %v1152_v60 }
 0x1a0   : > { %v2154_v29 = vpop.f32.mrf.mxu3  ;;  %v1098_v33 = vpop.f32.mrf.mxu2 }
 0x1a1   : > { %v1153_v34 = vadd.f32 %v1098_v33, %v997_v27 }
 0x1a3   : > { %v1639_v2 = vpack.c.bf16 %v1153_v34, %v1152_v60  ;;  %v900_v58 = vpop.f32.mrf.mxu0  ;;  %v1001_v37 = vpop.f32.mrf.mxu1  ;;  %v1286_v57 = vmul.f32 %v1153_v34, %v1153_v34  ;;  %v1248_v33 = vadd.f32 %v1247_v22, %v1153_v34  ;;  %v1027_v34 = vadd.f32 %v2148_v11, %v2121_v1 }
 0x1a4   : > { %v1000_v41 = vadd.f32 %v999_v26, %v900_v58 }
 0x1a5   : > { %1683 = vst [vmem:[%s2086_s8 + $0x40] sm:$0xff] %v1639_v2  }
 0x1a8   : > { %v1101_v39 = vpop.f32.mrf.mxu2  ;;  %v1116_v0 = vpop.f32.mrf.mxu3 }
 0x1a9   : > { %v1154_v49 = vadd.f32 %v1101_v39, %v1000_v41  ;;  %v2159_v16 = vadd.f32 %v1116_v0, %v2132_v38  ;;  %v1312_v38 = vadd.f32 %v2137_v13, %v1281_v56 }
 0x1ab   : > { %v902_v42 = vpop.f32.mrf.mxu0  ;;  %v1004_v44 = vpop.f32.mrf.mxu1  ;;  %v1313_v36 = vadd.f32 %v1312_v38, %v1282_v62  ;;  %v1287_v27 = vmul.f32 %v1154_v49, %v1154_v49  ;;  %v1249_v0 = vadd.f32 %v1248_v33, %v1154_v49  ;;  %v1293_v1 = vmul.f32 %v2159_v16, %v2159_v16 }
 0x1ac   : > { %v1002_v20 = vadd.f32 %v1001_v37, %v902_v42 }
 0x1ad   : > { %v1314_v13 = vadd.f32 %v1313_v36, %v1283_v40 }
 0x1af   : > { %v1315_v45 = vadd.f32 %v1314_v13, %v1284_v9 }
 0x1b0   : > { %v1103_v5 = vpop.f32.mrf.mxu2  ;;  %v1118_v47 = vpop.f32.mrf.mxu3 }
 0x1b1   : > { %v1155_v51 = vadd.f32 %v1103_v5, %v1002_v20  ;;  %v2161_v30 = vadd.f32 %v1118_v47, %v1017_v12  ;;  %v1316_v46 = vadd.f32 %v1315_v45, %v1285_v28 }
 0x1b3   : > { %v1644_v24 = vpack.c.bf16 %v1155_v51, %v1154_v49  ;;  %v1659_v32 = vpack.c.bf16 %v2161_v30, %v2159_v16  ;;  %v905_v53 = vpop.f32.mrf.mxu0  ;;  %v1006_v59 = vpop.f32.mrf.mxu1  ;;  %v1317_v2 = vadd.f32 %v1316_v46, %v1286_v57  ;;  %v1250_v41 = vadd.f32 %v1249_v0, %v1155_v51 }
 0x1b4   : > { %v1005_v43 = vadd.f32 %v1004_v44, %v905_v53 }
 0x1b5   : > { %1684 = vst [vmem:[%s2086_s8 + $0x48] sm:$0xff] %v1644_v24   ;;  %v1318_v42 = vadd.f32 %v1317_v2, %v1287_v27 }
 0x1b6   : > { %1687 = vst [vmem:[%s2086_s8 + $0x60] sm:$0xff] %v1659_v32  }
 0x1b8   : > { %v1106_v25 = vpop.f32.mrf.mxu2  ;;  %v1121_v19 = vpop.f32.mrf.mxu3 }
 0x1b9   : > { %v1156_v15 = vadd.f32 %v1106_v25, %v1005_v43  ;;  %v1162_v50 = vadd.f32 %v1121_v19, %v2140_v55  ;;  %v1288_v55 = vmul.f32 %v1155_v51, %v1155_v51 }
 0x1bb   : > { %v907_v63 = vpop.f32.mrf.mxu0  ;;  %v1009_v52 = vpop.f32.mrf.mxu1  ;;  %v1289_v14 = vmul.f32 %v1156_v15, %v1156_v15  ;;  %v1319_v20 = vadd.f32 %v1318_v42, %v1288_v55  ;;  %v1251_v47 = vadd.f32 %v1250_v41, %v1156_v15  ;;  %v1295_v9 = vmul.f32 %v1162_v50, %v1162_v50 }
 0x1bc   : > { %v1007_v54 = vadd.f32 %v1006_v59, %v907_v63 }
 0x1bd   : > { %v1320_v60 = vadd.f32 %v1319_v20, %v1289_v14 }
 0x1c0   : > { %v1108_v10 = vpop.f32.mrf.mxu2  ;;  %v1123_v7 = vpop.f32.mrf.mxu3 }
 0x1c1   : > { %v1157_v48 = vadd.f32 %v1108_v10, %v1007_v54  ;;  %v1163_v17 = vadd.f32 %v1123_v7, %v1022_v4  ;;  %v1294_v54 = vmul.f32 %v2161_v30, %v2161_v30 }
 0x1c3   : > { %v1649_v21 = vpack.c.bf16 %v1157_v48, %v1156_v15  ;;  %v1664_v31 = vpack.c.bf16 %v1163_v17, %v1162_v50  ;;  %v910_v26 = vpop.f32.mrf.mxu0  ;;  %v1290_v44 = vmul.f32 %v1157_v48, %v1157_v48  ;;  %v1011_v24 = vpop.f32.mrf.mxu1  ;;  %v1252_v53 = vadd.f32 %v1251_v47, %v1157_v48 }
 0x1c4   : > { %v1010_v58 = vadd.f32 %v1009_v52, %v910_v26  ;;  %v1296_v15 = vmul.f32 %v1163_v17, %v1163_v17 }
 0x1c5   : > { %1685 = vst [vmem:[%s2086_s8 + $0x50] sm:$0xff] %v1649_v21   ;;  %v1321_v19 = vadd.f32 %v1320_v60, %v1290_v44 }
 0x1c6   : > { %1688 = vst [vmem:[%s2086_s8 + $0x68] sm:$0xff] %v1664_v31   ;;  %v1032_v31 = vadd.f32 %v2154_v29, %v2128_v23 }
 0x1c8   : > { %v1111_v37 = vpop.f32.mrf.mxu2  ;;  %v1126_v39 = vpop.f32.mrf.mxu3 }
 0x1c9   : > { %v1158_v12 = vadd.f32 %v1111_v37, %v1010_v58  ;;  %v1164_v51 = vadd.f32 %v1126_v39, %v2146_v6 }
 0x1cb   : > { %v912_v5 = vpop.f32.mrf.mxu0  ;;  %v1291_v32 = vmul.f32 %v1158_v12, %v1158_v12  ;;  %v1253_v59 = vadd.f32 %v1252_v53, %v1158_v12  ;;  %v1297_v28 = vmul.f32 %v1164_v51, %v1164_v51 }
 0x1cc   : > { %v1012_v25 = vadd.f32 %v1011_v24, %v912_v5 }
 0x1cd   : > { %v1322_v63 = vadd.f32 %v1321_v19, %v1291_v32 }
 0x1d0   : > { %v1113_v49 = vpop.f32.mrf.mxu2  ;;  %v1128_v56 = vpop.f32.mrf.mxu3 }
 0x1d1   : > { %v1159_v61 = vadd.f32 %v1113_v49, %v1012_v25  ;;  %v1165_v62 = vadd.f32 %v1128_v56, %v1027_v34 }
 0x1d3   : > { %v1654_v38 = vpack.c.bf16 %v1159_v61, %v1158_v12  ;;  %v1254_v3 = vadd.f32 %v1253_v59, %v1159_v61  ;;  %v1292_v40 = vmul.f32 %v1159_v61, %v1159_v61  ;;  %v1669_v4 = vpack.c.bf16 %v1165_v62, %v1164_v51 }
 0x1d4   : > { %v1298_v57 = vmul.f32 %v1165_v62, %v1165_v62 }
 0x1d5   : > { %1686 = vst [vmem:[%s2086_s8 + $0x58] sm:$0xff] %v1654_v38   ;;  %v1255_v11 = vadd.f32 %v1254_v3, %v2159_v16  ;;  %v1323_v43 = vadd.f32 %v1322_v63, %v1292_v40 }
 0x1d6   : > { %1689 = vst [vmem:[%s2086_s8 + $0x70] sm:$0xff] %v1669_v4  }
 0x1d7   : > { %v1256_v6 = vadd.f32 %v1255_v11, %v2161_v30  ;;  %v1324_v36 = vadd.f32 %v1323_v43, %v1293_v1 }
 0x1d8   : > { %v1131_v8 = vpop.f32.mrf.mxu3 }
 0x1d9   : > { %v1325_v10 = vadd.f32 %v1324_v36, %v1294_v54  ;;  %v1257_v7 = vadd.f32 %v1256_v6, %v1162_v50  ;;  %v1166_v16 = vadd.f32 %v1131_v8, %v2152_v35 }
 0x1db   : > { %v1258_v48 = vadd.f32 %v1257_v7, %v1163_v17  ;;  %v1326_v13 = vadd.f32 %v1325_v10, %v1295_v9  ;;  %v1299_v46 = vmul.f32 %v1166_v16, %v1166_v16 }
 0x1dd   : > { %v1259_v18 = vadd.f32 %v1258_v48, %v1164_v51  ;;  %v1327_v21 = vadd.f32 %v1326_v13, %v1296_v15 }
 0x1df   : > { %v1260_v45 = vadd.f32 %v1259_v18, %v1165_v62  ;;  %v1328_v30 = vadd.f32 %v1327_v21, %v1297_v28 }
 0x1e0   : > { %v1133_v52 = vpop.f32.mrf.mxu3 }
 0x1e1   : > { %v1329_v26 = vadd.f32 %v1328_v30, %v1298_v57  ;;  %v1261_v22 = vadd.f32 %v1260_v45, %v1166_v16  ;;  %v1167_v50 = vadd.f32 %v1133_v52, %v1032_v31 }
 0x1e3   : > { %v1330_v17 = vadd.f32 %v1329_v26, %v1299_v46  ;;  %v1674_v27 = vpack.c.bf16 %v1167_v50, %v1166_v16  ;;  %v1262_v33 = vadd.f32 %v1261_v22, %v1167_v50  ;;  %v1300_v2 = vmul.f32 %v1167_v50, %v1167_v50 }
 0x1e5   : > { %1690 = vst [vmem:[%s2086_s8 + $0x78] sm:$0xff] %v1674_v27   ;;  %v1263_v55 = vrot.slane %v1262_v33, 4  ;;  %v1331_v58 = vadd.f32 %v1330_v17, %v1300_v2 }
 0x1e7   : > { %v1264_v35 = vadd.f32 %v1263_v55, %v1262_v33  ;;  %v1332_v37 = vrot.slane %v1331_v58, 4 }
 0x1e9   : > { %v1265_v39 = vrot.slane %v1264_v35, 2  ;;  %v1333_v23 = vadd.f32 %v1332_v37, %v1331_v58 }
 0x1eb   : > { %v1266_v29 = vadd.f32 %v1265_v39, %v1264_v35  ;;  %v1334_v0 = vrot.slane %v1333_v23, 2 }
 0x1ed   : > { %v1267_v42 = vrot.slane %v1266_v29, 1  ;;  %v1335_v14 = vadd.f32 %v1334_v0, %v1333_v23 }
 0x1ef   : > { %v1336_v12 = vrot.slane %v1335_v14, 1  ;;  %v1268_v41 = vadd.f32 %v1267_v42, %v1266_v29 }
 0x1f1   : > { %v1337_v20 = vadd.f32 %v1336_v12, %v1335_v14 }
 0x1f3   : > { %v1339_v44 = vsel %vm1338_vm6, %v1268_v41, %v1337_v20 }
 0x1f4   : > { %1340 = vst [vmem:[%s181_s14] sm:$0x3] %v1339_v44 }
 0x1f5 PF: > { %s14_s12 = sadd.s32 1, %s1711_s12  }
 0x1f6   : > { %p11_p4 = scmp.ge.s32.totalorder %s14_s12, 4  }
 0x1f8   :  { %13 = sbr.rel (!%p11_p4) target bundleno = 1 (0x1), region = 72 }

// kernel: basic_block_forward.4
= control target key start
LH: loop header
LB: loop body
LE: loop exit
PB: predicated region body
PF: predicated region fallthrough
CT: control target
= control target key end

     0   :  { %s4004_s18 = smov 0   ;;  %s5144_s0 = inlined_call_operand.vmem [shape: bf16[2,256,128], index: 0, kind: input, shape index: {}]   ;;  %s5145_s1 = inlined_call_operand.vmem [shape: f32[1,128], index: 1, kind: input, shape index: {}]   ;;  %s5146_s2 = inlined_call_operand.vmem [shape: f32[1,128], index: 2, kind: input, shape index: {}]   ;;  %s5147_s3 = inlined_call_operand.vmem [shape: bf16[3,384,128], index: 3, kind: input, shape index: {}]   ;;  %s5148_s4 = inlined_call_operand.vmem [shape: bf16[2,256,128], index: 4, kind: output, shape index: {0}]   ;;  %s5149_s5 = inlined_call_operand.vmem [shape: f32[2,2,128], index: 5, kind: output, shape index: {1}]  }
   0x1 LB: > { %s3176_s19 = sadd.s32 4294967295, %s3971_s18   ;;  %p3180_p0 = scmp.ge.s32.totalorder %s3971_s18, 1  ;;  %s3971_s18 = sphi %s4004_s18, %s16_s18  }
   0x2   : > { %p190_p1 = scmp.lt.s32.totalorder %s3971_s18, 3 }
   0x4   : > { %p191_p2 = pnand %p3180_p0, %p190_p1 }
   0x6   : > { %194 = sbr.rel (%p191_p2) target bundleno = 798 (0x31e), region = 36 }
   0xb   : > { %v3695_v0 = vld [vmem:[%s5147_s3 + $0xf8] sm:$0xff]  ;;  %p222_p3 = scmp.lt.s32.totalorder %s3176_s19, 1  ;;  %vm413_vm0 = vcmask 1040384   ;;  %vm414_vm1 = vsmask.f32 256  ;;  %v3694_v1 = vld [vmem:[%s5147_s3 + $0xf0] sm:$0xff] }
   0xc   : > { %1747 = vmatpush.bf16.msra.mxu0 %v3695_v0  ;;  %3910 = vmatpush.bf16.msra.mxu1 %v3695_v0  ;;  %v4024_v2 = vld [vmem:[%s5145_s1] ss:$0 sm:$0xff]  ;;  %vm4028_vm2 = vmand %vm413_vm0, %vm414_vm1  ;;  %v416_v4 = vld [vmem:[#allocation2 + $0xc] sm:$0x1]  ;;  %vm464_vm3 = vsmask.f32 7938 }
   0xd   : > { %s5236_s19 = smov (!%p222_p3, %s3176_s19), 1  ;;  %3911 = vmatpush.bf16.msra.mxu2 %v3695_v0  ;;  %3912 = vmatpush.bf16.msra.mxu3 %v3695_v0  ;;  %v4042_v5 = vld [vmem:[%s5146_s2] ss:$0 sm:$0xff]  ;;  %v417_v6 = vsel %vm4028_vm2, 0, %v416_v4  ;;  %v428_v7 = vld [vmem:[#allocation2 + $0x3c] sm:$0x1]  ;;  %vm4395_vm8 = vmand %vm413_vm0, %vm464_vm3 }
   0xe   : > { %s3644_s24 = sshll.u32 %s5236_s19, 7  ;;  %v3693_v8 = vld [vmem:[%s5147_s3 + $0xe8] sm:$0xff]  ;;  %418 = vst [vmem:[#allocation2 + $0xc] sm:$0x1] %v417_v6  ;;  %v429_v11 = vsel %vm4028_vm2, 0, %v428_v7  ;;  %vm868_vm4 = vcmask 1043456  }
   0xf   : > { %s4037_s29 = scalar_lea.vmem %s5144_s0, %s3644_s24  ;;  %430 = vst [vmem:[#allocation2 + $0x3c] sm:$0x1] %v429_v11  ;;  %v440_v17 = vld [vmem:[#allocation2 + $0x6c] sm:$0x1]  ;;  %v452_v23 = vld [vmem:[#allocation2 + $0x9c] sm:$0x1]  ;;  %vm4094_vm6 = vmand %vm868_vm4, %vm464_vm3  ;;  %s5066_s26 = scalar_lea.vmem %s5148_s4, %s3644_s24 }
  0x10   : > { %1748 = vmatpush.bf16.msra.mxu0 %v3694_v1  ;;  %3913 = vmatpush.bf16.msra.mxu1 %v3694_v1  ;;  %v3737_v9 = vld [vmem:[%s4037_s29] sm:$0xff]   ;;  %v441_v21 = vsel %vm4028_vm2, 0, %v440_v17  ;;  %vm546_vm5 = vsmask.f32 4368  ;;  %v453_v36 = vsel %vm4028_vm2, 0, %v452_v23  ;;  %v3691_v45 = vld [vmem:[%s5147_s3 + $0xd8] sm:$0xff] }
  0x11   : > { %v3883_v10 = vld [vmem:[%s4037_s29 + $0x20] sm:$0xff]   ;;  %3914 = vmatpush.bf16.msra.mxu2 %v3694_v1  ;;  %3915 = vmatpush.bf16.msra.mxu3 %v3694_v1  ;;  %v3738_v12 = vunpack.c.l.bf16 %v3737_v9  ;;  %v3739_v13 = vunpack.c.h.bf16 %v3737_v9  ;;  %442 = vst [vmem:[#allocation2 + $0x6c] sm:$0x1] %v441_v21  ;;  %v3690_v62 = vld [vmem:[%s5147_s3 + $0xd0] sm:$0xff]  ;;  %vm4100_vm7 = vmor %vm414_vm1, %vm546_vm5  ;;  %vm1198_vm9 = vsmask.f32 7424 }
  0x12   : > { %v3754_v14 = vunpack.c.l.bf16 %v3883_v10  ;;  %v3755_v15 = vunpack.c.h.bf16 %v3883_v10  ;;  %v3887_v16 = vld [vmem:[%s4037_s29 + $0x40] sm:$0xff]   ;;  %454 = vst [vmem:[#allocation2 + $0x9c] sm:$0x1] %v453_v36  ;;  %vm1433_vm10 = vcmask 1046528   ;;  %s3185_s24 = sshll.u32 %s5236_s19, 1 }
  0x13   : > { %v3891_v18 = vld [vmem:[%s4037_s29 + $0x60] sm:$0xff]   ;;  %v3770_v19 = vunpack.c.l.bf16 %v3887_v16  ;;  %v3771_v20 = vunpack.c.h.bf16 %v3887_v16  ;;  %v305_v24 = vmul.f32 %v4024_v2, %v3738_v12  ;;  %v306_v25 = vmul.f32 %v4024_v2, %v3739_v13  ;;  %s235_s30 = scalar_lea.vmem %s5149_s5, %s3185_s24 }
  0x14   : > { %v3786_v22 = vunpack.c.l.bf16 %v3891_v18  ;;  %v313_v26 = vmul.f32 %v4024_v2, %v3754_v14  ;;  %v314_v27 = vmul.f32 %v4024_v2, %v3755_v15  ;;  %1749 = vmatpush.bf16.msra.mxu0 %v3693_v8  ;;  %3916 = vmatpush.bf16.msra.mxu1 %v3693_v8  ;;  %v3692_v28 = vld [vmem:[%s5147_s3 + $0xe0] sm:$0xff]  ;;  %v3787_v31 = vunpack.c.h.bf16 %v3891_v18 }
  0x15   : > { %v321_v29 = vmul.f32 %v4024_v2, %v3770_v19  ;;  %v322_v30 = vmul.f32 %v4024_v2, %v3771_v20  ;;  %3917 = vmatpush.bf16.msra.mxu2 %v3693_v8  ;;  %3918 = vmatpush.bf16.msra.mxu3 %v3693_v8  ;;  %v341_v33 = vadd.f32 %v4042_v5, %v305_v24  ;;  %v870_v12 = vld [vmem:[#allocation2 + $0xc] sm:$0xf] }
  0x16   : > { %v329_v32 = vmul.f32 %v4024_v2, %v3786_v22  ;;  %v342_v34 = vadd.f32 %v4042_v5, %v306_v25  ;;  %v349_v35 = vadd.f32 %v4042_v5, %v313_v26  ;;  %v350_v37 = vadd.f32 %v4042_v5, %v314_v27  ;;  %v898_v20 = vld [vmem:[#allocation2 + $0x3c] sm:$0xf]  ;;  %v3689_v22 = vld [vmem:[%s5147_s3 + $0xc8] sm:$0xff] }
  0x17   : > { %v357_v38 = vadd.f32 %v4042_v5, %v321_v29  ;;  %v358_v39 = vadd.f32 %v4042_v5, %v322_v30  ;;  %v330_v40 = vmul.f32 %v4024_v2, %v3787_v31  ;;  %v373_v41 = vmax.f32 %v341_v33, 0.0  ;;  %v419_v33 = vld [vmem:[#allocation2 + $0x18] sm:$0x1] }
  0x18   : > { %v374_v42 = vmax.f32 %v342_v34, 0.0  ;;  %v381_v43 = vmax.f32 %v349_v35, 0.0  ;;  %v4077_v44 = vadd.f32 %v4042_v5, %v329_v32  ;;  %1750 = vmatpush.bf16.msra.mxu0 %v3692_v28  ;;  %3919 = vmatpush.bf16.msra.mxu1 %v3692_v28  ;;  %v382_v46 = vmax.f32 %v350_v37, 0.0  ;;  %v926_v27 = vld [vmem:[#allocation2 + $0x6c] sm:$0xf] }
  0x19   : > { %v389_v47 = vmax.f32 %v357_v38, 0.0  ;;  %v390_v48 = vmax.f32 %v358_v39, 0.0  ;;  %v4083_v49 = vadd.f32 %v4042_v5, %v330_v40  ;;  %3920 = vmatpush.bf16.msra.mxu2 %v3692_v28  ;;  %3921 = vmatpush.bf16.msra.mxu3 %v3692_v28  ;;  %v514_v50 = vpack.c.bf16 %v373_v41, %v373_v41  ;;  %v3880_v28 = vld [vmem:[%s4037_s29 + $0x8] sm:$0xff]   ;;  %v3688_v38 = vld [vmem:[%s5147_s3 + $0xc0] sm:$0xff] }
  0x1a   : > { %v515_v51 = vpack.c.bf16 %v374_v42, %v374_v42  ;;  %v522_v52 = vpack.c.bf16 %v381_v43, %v381_v43  ;;  %v397_v53 = vmax.f32 %v4077_v44, 0.0  ;;  %v523_v54 = vpack.c.bf16 %v382_v46, %v382_v46  ;;  %v3884_v43 = vld [vmem:[%s4037_s29 + $0x28] sm:$0xff]  }
  0x1b   : > { %v530_v55 = vpack.c.bf16 %v389_v47, %v389_v47  ;;  %v531_v56 = vpack.c.bf16 %v390_v48, %v390_v48  ;;  %v398_v57 = vmax.f32 %v4083_v49, 0.0  ;;  %v549_v58 = vshrl.u32 %v514_v50, 16  ;;  %v431_v44 = vld [vmem:[#allocation2 + $0x48] sm:$0x1] }
  0x1c   : > { %v552_v59 = vshll.u32 %v514_v50, 16  ;;  %v557_v60 = vshrl.u32 %v515_v51, 16  ;;  %v560_v61 = vshll.u32 %v515_v51, 16  ;;  %1751 = vmatpush.bf16.msra.mxu0 %v3691_v45  ;;  %3922 = vmatpush.bf16.msra.mxu1 %v3691_v45  ;;  %v617_v63 = vshrl.u32 %v522_v52, 16  ;;  %v3888_v49 = vld [vmem:[%s4037_s29 + $0x48] sm:$0xff]  }
  0x1d   : > { %v620_v0 = vshll.u32 %v522_v52, 16  ;;  %v625_v1 = vshrl.u32 %v523_v54, 16  ;;  %v628_v4 = vshll.u32 %v523_v54, 16  ;;  %3923 = vmatpush.bf16.msra.mxu2 %v3691_v45  ;;  %3924 = vmatpush.bf16.msra.mxu3 %v3691_v45  ;;  %v551_v6 = vrot.slane %v549_v58, 7  ;;  %v3711_v52 = vld [vmem:[%s5147_s3 + $0x178] sm:$0xff] }
  0x1e   : > { %v4090_v7 = vrot.slane %v557_v60, 7  ;;  %v685_v9 = vshrl.u32 %v530_v55, 16  ;;  %v688_v10 = vshll.u32 %v530_v55, 16  ;;  %v619_v13 = vrot.slane %v617_v63, 7  ;;  %v443_v55 = vld [vmem:[#allocation2 + $0x78] sm:$0x1] }
  0x1f   : > { %v4104_v14 = vrot.slane %v625_v1, 7  ;;  %v693_v15 = vshrl.u32 %v531_v56, 16  ;;  %v696_v16 = vshll.u32 %v531_v56, 16  ;;  %v554_v17 = vor.u32 %v552_v59, %v551_v6  ;;  %v3703_v58 = vld [vmem:[%s5147_s3 + $0x138] sm:$0xff] }
  0x20   : > { %v555_v18 = vrot.slane %v551_v6, 4  ;;  %v562_v19 = vor.u32 %v560_v61, %v4090_v7  ;;  %v687_v21 = vrot.slane %v685_v9, 7  ;;  %1752 = vmatpush.bf16.msra.mxu0 %v3690_v62  ;;  %3925 = vmatpush.bf16.msra.mxu1 %v3690_v62  ;;  %v622_v23 = vor.u32 %v620_v0, %v619_v13  ;;  %v954_v63 = vld [vmem:[#allocation2 + $0x9c] sm:$0xf] }
  0x21   : > { %v623_v24 = vrot.slane %v619_v13, 4  ;;  %v630_v25 = vor.u32 %v628_v4, %v4104_v14  ;;  %v4111_v26 = vrot.slane %v693_v15, 7  ;;  %3926 = vmatpush.bf16.msra.mxu2 %v3690_v62  ;;  %3927 = vmatpush.bf16.msra.mxu3 %v3690_v62  ;;  %v871_v30 = vsel %vm4094_vm6, %v554_v17, %v870_v12  ;;  %v3679_v0 = vld [vmem:[%s5147_s3 + $0x78] sm:$0xff] }
  0x22   : > { %v563_v29 = vsel %vm4100_vm7, %v555_v18, %v562_v19  ;;  %v690_v31 = vor.u32 %v688_v10, %v687_v21  ;;  %v691_v32 = vrot.slane %v687_v21, 4  ;;  %872 = vst [vmem:[#allocation2 + $0xc] sm:$0xf] %v871_v30  ;;  %v899_v35 = vsel %vm4094_vm6, %v622_v23, %v898_v20  ;;  %v3710_v21 = vld [vmem:[%s5147_s3 + $0x170] sm:$0xff] }
  0x23   : > { %v631_v34 = vsel %vm4100_vm7, %v623_v24, %v630_v25  ;;  %v698_v36 = vor.u32 %v696_v16, %v4111_v26  ;;  %v538_v37 = vpack.c.bf16 %v397_v53, %v397_v53  ;;  %873 = vst [vmem:[#allocation2 + $0x10] sm:$0xf] %v563_v29  ;;  %v539_v40 = vpack.c.bf16 %v398_v57, %v398_v57  ;;  %v3671_v57 = vld [vmem:[%s5147_s3 + $0x38] sm:$0xff] }
  0x24   : > { %v927_v39 = vsel %vm4094_vm6, %v690_v31, %v926_v27  ;;  %v3742_v41 = vunpack.c.l.bf16 %v3880_v28  ;;  %v3743_v42 = vunpack.c.h.bf16 %v3880_v28  ;;  %1753 = vmatpush.bf16.msra.mxu0 %v3689_v22  ;;  %3928 = vmatpush.bf16.msra.mxu1 %v3689_v22  ;;  %900 = vst [vmem:[#allocation2 + $0x3c] sm:$0xf] %v899_v35  ;;  %v420_v48 = vsel %vm4028_vm2, 0, %v419_v33  ;;  %v3670_v27 = vld [vmem:[%s5147_s3 + $0x30] sm:$0xff]  ;;  %v4178_v35 = vld [vmem:[%s4037_s29 + $0x68] sm:$0xff]  }
  0x25   : > { %v699_v45 = vsel %vm4100_vm7, %v691_v32, %v698_v36  ;;  %v753_v46 = vshrl.u32 %v538_v37, 16  ;;  %v756_v47 = vshll.u32 %v538_v37, 16  ;;  %3929 = vmatpush.bf16.msra.mxu2 %v3689_v22  ;;  %3930 = vmatpush.bf16.msra.mxu3 %v3689_v22  ;;  %901 = vst [vmem:[#allocation2 + $0x40] sm:$0xf] %v631_v34  ;;  %v761_v50 = vshrl.u32 %v539_v40, 16 }
  0x26   : > { %v764_v51 = vshll.u32 %v539_v40, 16  ;;  %v307_v53 = vmul.f32 %v4024_v2, %v3742_v41  ;;  %v308_v54 = vmul.f32 %v4024_v2, %v3743_v42  ;;  %928 = vst [vmem:[#allocation2 + $0x6c] sm:$0xf] %v927_v39  ;;  %v3758_v59 = vunpack.c.l.bf16 %v3884_v43 }
  0x27   : > { %v755_v56 = vrot.slane %v753_v46, 7  ;;  %v3759_v60 = vunpack.c.h.bf16 %v3884_v43  ;;  %v432_v61 = vsel %vm4028_vm2, 0, %v431_v44  ;;  %929 = vst [vmem:[#allocation2 + $0x70] sm:$0xf] %v699_v45  ;;  %v4147_v62 = vrot.slane %v761_v50, 7  ;;  %v3702_v45 = vld [vmem:[%s5147_s3 + $0x130] sm:$0xff] }
  0x28   : > { %v343_v1 = vadd.f32 %v4042_v5, %v307_v53  ;;  %v344_v4 = vadd.f32 %v4042_v5, %v308_v54  ;;  %v3774_v6 = vunpack.c.l.bf16 %v3888_v49  ;;  %1754 = vmatpush.bf16.msra.mxu0 %v3688_v38  ;;  %3931 = vmatpush.bf16.msra.mxu1 %v3688_v38  ;;  %421 = vst [vmem:[#allocation2 + $0x18] sm:$0x1] %v420_v48  ;;  %v3775_v13 = vunpack.c.h.bf16 %v3888_v49  ;;  %v3709_v46 = vld [vmem:[%s5147_s3 + $0x168] sm:$0xff] }
  0x29   : > { %v758_v9 = vor.u32 %v756_v47, %v755_v56  ;;  %v759_v10 = vrot.slane %v755_v56, 4  ;;  %v315_v12 = vmul.f32 %v4024_v2, %v3758_v59  ;;  %3932 = vmatpush.bf16.msra.mxu2 %v3688_v38  ;;  %3933 = vmatpush.bf16.msra.mxu3 %v3688_v38  ;;  %v766_v15 = vor.u32 %v764_v51, %v4147_v62  ;;  %v3669_v51 = vld [vmem:[%s5147_s3 + $0x28] sm:$0xff] }
  0x2a   : > { %v375_v16 = vmax.f32 %v343_v1, 0.0  ;;  %v376_v17 = vmax.f32 %v344_v4, 0.0  ;;  %v316_v18 = vmul.f32 %v4024_v2, %v3759_v60  ;;  %433 = vst [vmem:[#allocation2 + $0x48] sm:$0x1] %v432_v61  ;;  %v4157_v19 = vld [vmem:[#allocation2 + $0xc] sm:$0xff]  ;;  %v323_v23 = vmul.f32 %v4024_v2, %v3774_v6 }
  0x2b   : > { %v955_v20 = vsel %vm4094_vm6, %v758_v9, %v954_v63  ;;  %v351_v22 = vadd.f32 %v4042_v5, %v315_v12  ;;  %v444_v24 = vsel %vm4028_vm2, 0, %v443_v55  ;;  %v767_v25 = vsel %vm4100_vm7, %v759_v10, %v766_v15  ;;  %1755 = vmatmul.bf16.vlgmr.msra.gmra.mxu0 %v4157_v19  ;;  %v455_v10 = vld [vmem:[#allocation2 + $0xa8] sm:$0x1]  ;;  %v3708_v12 = vld [vmem:[%s5147_s3 + $0x160] sm:$0xff] }
  0x2c   : > { %956 = vst [vmem:[#allocation2 + $0x9c] sm:$0xf] %v955_v20  ;;  %1836 = vmatpush.bf16.msrb.mxu1 %v3703_v58  ;;  %2247 = vmatpush.bf16.msrb.mxu0 %v3679_v0  ;;  %v516_v28 = vpack.c.bf16 %v375_v16, %v375_v16  ;;  %v517_v29 = vpack.c.bf16 %v376_v17, %v376_v17  ;;  %v3651_v30 = vld [vmem:[#allocation2 + $0x3c] sm:$0xff]  ;;  %v3790_v49 = vunpack.c.l.bf16 %v4178_v35  ;;  %v3791_v50 = vunpack.c.h.bf16 %v4178_v35  ;;  %v3701_v58 = vld [vmem:[%s5147_s3 + $0x128] sm:$0xff] }
  0x2d   : > { %1925 = vmatpush.bf16.msrb.mxu2 %v3711_v52  ;;  %2158 = vmatpush.bf16.msrb.mxu3 %v3671_v57  ;;  %957 = vst [vmem:[#allocation2 + $0xa0] sm:$0xf] %v767_v25  ;;  %v352_v31 = vadd.f32 %v4042_v5, %v316_v18  ;;  %v383_v32 = vmax.f32 %v351_v22, 0.0  ;;  %v324_v33 = vmul.f32 %v4024_v2, %v3775_v13  ;;  %v3678_v52 = vld [vmem:[%s5147_s3 + $0x70] sm:$0xff]  ;;  %v3677_v0 = vld [vmem:[%s5147_s3 + $0x68] sm:$0xff]  ;;  %v1214_v11 = vshll.u32 %v4157_v19, 16 }
  0x2e   : > { %v359_v34 = vadd.f32 %v4042_v5, %v323_v23  ;;  %v566_v36 = vshrl.u32 %v516_v28, 16  ;;  %v569_v37 = vshll.u32 %v516_v28, 16  ;;  %v574_v38 = vshrl.u32 %v517_v29, 16  ;;  %445 = vst [vmem:[#allocation2 + $0x78] sm:$0x1] %v444_v24  ;;  %1775 = vmatmul.bf16.vlgmr.msra.gmra.mxu1 %v3651_v30  ;;  %v3655_v40 = vld [vmem:[#allocation2 + $0x6c] sm:$0xff] }
  0x2f   : > { %v577_v39 = vshll.u32 %v517_v29, 16  ;;  %v384_v41 = vmax.f32 %v352_v31, 0.0  ;;  %v524_v42 = vpack.c.bf16 %v383_v32, %v383_v32  ;;  %v360_v43 = vadd.f32 %v4042_v5, %v324_v33  ;;  %1795 = vmatmul.bf16.vlgmr.msra.gmra.mxu2 %v3655_v40  ;;  %v877_v53 = vld [vmem:[#allocation2 + $0x18] sm:$0xf]  ;;  %v3881_v31 = vld [vmem:[%s4037_s29 + $0x10] sm:$0xff]  }
  0x30   : > { %v391_v44 = vmax.f32 %v359_v34, 0.0  ;;  %v568_v47 = vrot.slane %v566_v36, 7  ;;  %v4187_v48 = vrot.slane %v574_v38, 7  ;;  %1837 = vmatpush.bf16.msrb.mxu1 %v3702_v45  ;;  %2248 = vmatpush.bf16.msrb.mxu0 %v3678_v52  ;;  %v331_v29 = vmul.f32 %v4024_v2, %v3790_v49 }
  0x31   : > { %1926 = vmatpush.bf16.msrb.mxu2 %v3710_v21  ;;  %2159 = vmatpush.bf16.msrb.mxu3 %v3670_v27  ;;  %v525_v54 = vpack.c.bf16 %v384_v41, %v384_v41  ;;  %v634_v55 = vshrl.u32 %v524_v42, 16  ;;  %v637_v56 = vshll.u32 %v524_v42, 16  ;;  %v392_v57 = vmax.f32 %v360_v43, 0.0  ;;  %v905_v17 = vld [vmem:[#allocation2 + $0x48] sm:$0xf]  ;;  %v3668_v21 = vld [vmem:[%s5147_s3 + $0x20] sm:$0xff] }
  0x32   : > { %v571_v59 = vor.u32 %v569_v37, %v568_v47  ;;  %v572_v60 = vrot.slane %v568_v47, 4  ;;  %v579_v61 = vor.u32 %v577_v39, %v4187_v48  ;;  %v532_v63 = vpack.c.bf16 %v391_v44, %v391_v44  ;;  %v422_v37 = vld [vmem:[#allocation2 + $0x24] sm:$0x1]  ;;  %v3885_v42 = vld [vmem:[%s4037_s29 + $0x30] sm:$0xff]  }
  0x33   : > { %v636_v1 = vrot.slane %v634_v55, 7  ;;  %v642_v4 = vshrl.u32 %v525_v54, 16  ;;  %v645_v6 = vshll.u32 %v525_v54, 16  ;;  %v533_v9 = vpack.c.bf16 %v392_v57, %v392_v57  ;;  %v434_v47 = vld [vmem:[#allocation2 + $0x54] sm:$0x1] }
  0x34   : > { %v3659_v13 = vld [vmem:[#allocation2 + $0x9c] sm:$0xff]  ;;  %v580_v15 = vsel %vm4100_vm7, %v572_v60, %v579_v61  ;;  %v878_v16 = vsel %vm4094_vm6, %v571_v59, %v877_v53  ;;  %v702_v18 = vshrl.u32 %v532_v63, 16  ;;  %v705_v20 = vshll.u32 %v532_v63, 16  ;;  %1838 = vmatpush.bf16.msrb.mxu1 %v3701_v58  ;;  %2249 = vmatpush.bf16.msrb.mxu0 %v3677_v0  ;;  %v3889_v53 = vld [vmem:[%s4037_s29 + $0x50] sm:$0xff]  }
  0x35   : > { %1927 = vmatpush.bf16.msrb.mxu2 %v3709_v46  ;;  %2160 = vmatpush.bf16.msrb.mxu3 %v3669_v51  ;;  %879 = vst [vmem:[#allocation2 + $0x18] sm:$0xf] %v878_v16  ;;  %v639_v22 = vor.u32 %v637_v56, %v636_v1  ;;  %v640_v23 = vrot.slane %v636_v1, 4  ;;  %v4214_v24 = vrot.slane %v642_v4, 7  ;;  %v710_v25 = vshrl.u32 %v533_v9, 16 }
  0x36   : > { %1815 = vmatmul.bf16.vlgmr.msra.gmra.mxu3 %v3659_v13  ;;  %880 = vst [vmem:[#allocation2 + $0x1c] sm:$0xf] %v580_v15  ;;  %v704_v27 = vrot.slane %v702_v18, 7  ;;  %v713_v28 = vshll.u32 %v533_v9, 16  ;;  %v332_v30 = vmul.f32 %v4024_v2, %v3791_v50  ;;  %v933_v35 = vld [vmem:[#allocation2 + $0x78] sm:$0xf]  ;;  %v367_v40 = vadd.f32 %v4042_v5, %v331_v29 }
  0x37   : > { %v647_v32 = vor.u32 %v645_v6, %v4214_v24  ;;  %v906_v33 = vsel %vm4094_vm6, %v639_v22, %v905_v17  ;;  %v4222_v34 = vrot.slane %v710_v25, 7  ;;  %v456_v36 = vsel %vm4028_vm2, 0, %v455_v10 }
  0x38   : > { %907 = vst [vmem:[#allocation2 + $0x48] sm:$0xf] %v906_v33  ;;  %v707_v38 = vor.u32 %v705_v20, %v704_v27  ;;  %v708_v39 = vrot.slane %v704_v27, 4  ;;  %v368_v41 = vadd.f32 %v4042_v5, %v332_v30  ;;  %v3746_v45 = vunpack.c.l.bf16 %v3881_v31 }
  0x39   : > { %1928 = vmatpush.bf16.msrb.mxu2 %v3708_v12  ;;  %2161 = vmatpush.bf16.msrb.mxu3 %v3668_v21  ;;  %v648_v43 = vsel %vm4100_vm7, %v640_v23, %v647_v32  ;;  %v715_v44 = vor.u32 %v713_v28, %v4222_v34  ;;  %457 = vst [vmem:[#allocation2 + $0xa8] sm:$0x1] %v456_v36  ;;  %v3747_v46 = vunpack.c.h.bf16 %v3881_v31  ;;  %v399_v50 = vmax.f32 %v367_v40, 0.0 }
  0x3a   : > { %908 = vst [vmem:[#allocation2 + $0x4c] sm:$0xf] %v648_v43  ;;  %v934_v49 = vsel %vm4094_vm6, %v707_v38, %v933_v35  ;;  %v400_v51 = vmax.f32 %v368_v41, 0.0  ;;  %v423_v52 = vsel %vm4028_vm2, 0, %v422_v37  ;;  %v309_v55 = vmul.f32 %v4024_v2, %v3746_v45  ;;  %v446_v37 = vld [vmem:[#allocation2 + $0x84] sm:$0x1] }
  0x3b   : > { %v716_v54 = vsel %vm4100_vm7, %v708_v39, %v715_v44  ;;  %935 = vst [vmem:[#allocation2 + $0x78] sm:$0xf] %v934_v49  ;;  %v310_v56 = vmul.f32 %v4024_v2, %v3747_v46  ;;  %v3762_v57 = vunpack.c.l.bf16 %v3885_v42  ;;  %v540_v58 = vpack.c.bf16 %v399_v50, %v399_v50 }
  0x3c   : > { %936 = vst [vmem:[#allocation2 + $0x7c] sm:$0xf] %v716_v54  ;;  %v541_v59 = vpack.c.bf16 %v400_v51, %v400_v51  ;;  %v3763_v60 = vunpack.c.h.bf16 %v3885_v42  ;;  %v435_v61 = vsel %vm4028_vm2, 0, %v434_v47  ;;  %v345_v0 = vadd.f32 %v4042_v5, %v309_v55  ;;  %v3893_v47 = vld [vmem:[%s4037_s29 + $0x70] sm:$0xff]  }
  0x3d   : > { %v4243_v63 = vld [vmem:[#allocation2 + $0x18] sm:$0xff]  ;;  %v346_v1 = vadd.f32 %v4042_v5, %v310_v56  ;;  %424 = vst [vmem:[#allocation2 + $0x24] sm:$0x1] %v423_v52  ;;  %v317_v4 = vmul.f32 %v4024_v2, %v3762_v57  ;;  %v3778_v6 = vunpack.c.l.bf16 %v3889_v53  ;;  %v770_v9 = vshrl.u32 %v540_v58, 16 }
  0x3e   : > { %v773_v10 = vshll.u32 %v540_v58, 16  ;;  %v778_v12 = vshrl.u32 %v541_v59, 16  ;;  %v781_v13 = vshll.u32 %v541_v59, 16  ;;  %436 = vst [vmem:[#allocation2 + $0x54] sm:$0x1] %v435_v61  ;;  %1760 = vmatmul.bf16.gmra.mxu0 %v4243_v63  ;;  %v377_v15 = vmax.f32 %v345_v0, 0.0 }
  0x3f   : > { %v378_v16 = vmax.f32 %v346_v1, 0.0  ;;  %v318_v17 = vmul.f32 %v4024_v2, %v3763_v60  ;;  %v353_v18 = vadd.f32 %v4042_v5, %v317_v4  ;;  %v772_v20 = vrot.slane %v770_v9, 7  ;;  %v3700_v58 = vld [vmem:[%s5147_s3 + $0x120] sm:$0xff]  ;;  %v3707_v1 = vld [vmem:[%s5147_s3 + $0x158] sm:$0xff] }
  0x40   : > { %v4251_v21 = vrot.slane %v778_v12, 7  ;;  %v3779_v22 = vunpack.c.h.bf16 %v3889_v53  ;;  %v325_v23 = vmul.f32 %v4024_v2, %v3778_v6  ;;  %v961_v27 = vld [vmem:[#allocation2 + $0xa8] sm:$0xf]  ;;  %v518_v28 = vpack.c.bf16 %v377_v15, %v377_v15  ;;  %v3667_v4 = vld [vmem:[%s5147_s3 + $0x18] sm:$0xff]  ;;  %1839 = vmatpush.bf16.msrb.mxu1 %v3700_v58  ;;  %v3676_v15 = vld [vmem:[%s5147_s3 + $0x60] sm:$0xff]  ;;  %1929 = vmatpush.bf16.msrb.mxu2 %v3707_v1 }
  0x41   : > { %v4254_v25 = vld [vmem:[#allocation2 + $0x48] sm:$0xff]  ;;  %v519_v29 = vpack.c.bf16 %v378_v16, %v378_v16  ;;  %v354_v30 = vadd.f32 %v4042_v5, %v318_v17  ;;  %v385_v31 = vmax.f32 %v353_v18, 0.0  ;;  %v775_v32 = vor.u32 %v773_v10, %v772_v20  ;;  %v3699_v16 = vld [vmem:[%s5147_s3 + $0x118] sm:$0xff]  ;;  %2162 = vmatpush.bf16.msrb.mxu3 %v3667_v4  ;;  %2250 = vmatpush.bf16.msrb.mxu0 %v3676_v15  ;;  %v437_v15 = vld [vmem:[#allocation2 + $0x60] sm:$0x1] }
  0x42   : > { %v776_v33 = vrot.slane %v772_v20, 4  ;;  %v783_v35 = vor.u32 %v781_v13, %v4251_v21  ;;  %v326_v36 = vmul.f32 %v4024_v2, %v3779_v22  ;;  %1780 = vmatmul.bf16.gmra.mxu1 %v4254_v25  ;;  %v583_v39 = vshrl.u32 %v518_v28, 16  ;;  %v458_v13 = vld [vmem:[#allocation2 + $0xb4] sm:$0x1] }
  0x43   : > { %v3656_v38 = vld [vmem:[#allocation2 + $0x78] sm:$0xff]  ;;  %v586_v40 = vshll.u32 %v518_v28, 16  ;;  %v591_v41 = vshrl.u32 %v519_v29, 16  ;;  %v594_v42 = vshll.u32 %v519_v29, 16  ;;  %v962_v44 = vsel %vm4094_vm6, %v775_v32, %v961_v27  ;;  %v3706_v27 = vld [vmem:[%s5147_s3 + $0x150] sm:$0xff] }
  0x44   : > { %v784_v43 = vsel %vm4100_vm7, %v776_v33, %v783_v35  ;;  %v386_v45 = vmax.f32 %v354_v30, 0.0  ;;  %v526_v46 = vpack.c.bf16 %v385_v31, %v385_v31  ;;  %1800 = vmatmul.bf16.gmra.mxu2 %v3656_v38  ;;  %963 = vst [vmem:[#allocation2 + $0xa8] sm:$0xf] %v962_v44  ;;  %v585_v49 = vrot.slane %v583_v39, 7  ;;  %v884_v51 = vld [vmem:[#allocation2 + $0x24] sm:$0xf]  ;;  %1840 = vmatpush.bf16.msrb.mxu1 %v3699_v16 }
  0x45   : > { %v4265_v50 = vrot.slane %v591_v41, 7  ;;  %v361_v52 = vadd.f32 %v4042_v5, %v325_v23  ;;  %v362_v53 = vadd.f32 %v4042_v5, %v326_v36  ;;  %964 = vst [vmem:[#allocation2 + $0xac] sm:$0xf] %v784_v43  ;;  %v447_v57 = vsel %vm4028_vm2, 0, %v446_v37  ;;  %v912_v20 = vld [vmem:[#allocation2 + $0x54] sm:$0xf]  ;;  %1930 = vmatpush.bf16.msrb.mxu2 %v3706_v27 }
  0x46   : > { %v527_v54 = vpack.c.bf16 %v386_v45, %v386_v45  ;;  %v651_v55 = vshrl.u32 %v526_v46, 16  ;;  %v654_v56 = vshll.u32 %v526_v46, 16  ;;  %v588_v59 = vor.u32 %v586_v40, %v585_v49  ;;  %448 = vst [vmem:[#allocation2 + $0x84] sm:$0x1] %v447_v57  ;;  %v3666_v28 = vld [vmem:[%s5147_s3 + $0x10] sm:$0xff]  ;;  %v3675_v33 = vld [vmem:[%s5147_s3 + $0x58] sm:$0xff] }
  0x47   : > { %v589_v60 = vrot.slane %v585_v49, 4  ;;  %v596_v61 = vor.u32 %v594_v42, %v4265_v50  ;;  %v393_v0 = vmax.f32 %v361_v52, 0.0  ;;  %v394_v12 = vmax.f32 %v362_v53, 0.0  ;;  %v3882_v39 = vld [vmem:[%s4037_s29 + $0x18] sm:$0xff]   ;;  %v425_v44 = vld [vmem:[#allocation2 + $0x30] sm:$0x1]  ;;  %2163 = vmatpush.bf16.msrb.mxu3 %v3666_v28  ;;  %2251 = vmatpush.bf16.msrb.mxu0 %v3675_v33 }
  0x48   : > { %v653_v6 = vrot.slane %v651_v55, 7  ;;  %v659_v9 = vshrl.u32 %v527_v54, 16  ;;  %v662_v10 = vshll.u32 %v527_v54, 16  ;;  %v885_v18 = vsel %vm4094_vm6, %v588_v59, %v884_v51  ;;  %v3886_v57 = vld [vmem:[%s4037_s29 + $0x38] sm:$0xff]  }
  0x49   : > { %v597_v17 = vsel %vm4100_vm7, %v589_v60, %v596_v61  ;;  %v534_v22 = vpack.c.bf16 %v393_v0, %v393_v0  ;;  %v3794_v23 = vunpack.c.l.bf16 %v3893_v47  ;;  %886 = vst [vmem:[#allocation2 + $0x24] sm:$0xf] %v885_v18  ;;  %v535_v32 = vpack.c.bf16 %v394_v12, %v394_v12 }
  0x4a   : > { %v656_v29 = vor.u32 %v654_v56, %v653_v6  ;;  %v657_v30 = vrot.slane %v653_v6, 4  ;;  %v4297_v31 = vrot.slane %v659_v9, 7  ;;  %887 = vst [vmem:[#allocation2 + $0x28] sm:$0xf] %v597_v17  ;;  %v3795_v37 = vunpack.c.h.bf16 %v3893_v47 }
  0x4b   : > { %v719_v35 = vshrl.u32 %v534_v22, 16  ;;  %v722_v36 = vshll.u32 %v534_v22, 16  ;;  %v333_v38 = vmul.f32 %v4024_v2, %v3794_v23  ;;  %v727_v42 = vshrl.u32 %v535_v32, 16 }
  0x4c   : > { %v664_v40 = vor.u32 %v662_v10, %v4297_v31  ;;  %v913_v41 = vsel %vm4094_vm6, %v656_v29, %v912_v20  ;;  %v730_v43 = vshll.u32 %v535_v32, 16  ;;  %v3660_v45 = vld [vmem:[#allocation2 + $0xa8] sm:$0xff]  ;;  %v334_v49 = vmul.f32 %v4024_v2, %v3795_v37 }
  0x4d   : > { %914 = vst [vmem:[#allocation2 + $0x54] sm:$0xf] %v913_v41  ;;  %v721_v46 = vrot.slane %v719_v35, 7  ;;  %v369_v47 = vadd.f32 %v4042_v5, %v333_v38  ;;  %v459_v51 = vsel %vm4028_vm2, 0, %v458_v13  ;;  %v4313_v53 = vrot.slane %v727_v42, 7  ;;  %1820 = vmatmul.bf16.gmra.mxu3 %v3660_v45 }
  0x4e   : > { %v665_v52 = vsel %vm4100_vm7, %v657_v30, %v664_v40  ;;  %v940_v54 = vld [vmem:[#allocation2 + $0x84] sm:$0xf]  ;;  %460 = vst [vmem:[#allocation2 + $0xb4] sm:$0x1] %v459_v51  ;;  %v3750_v55 = vunpack.c.l.bf16 %v3882_v39  ;;  %v3751_v56 = vunpack.c.h.bf16 %v3882_v39  ;;  %v370_v60 = vadd.f32 %v4042_v5, %v334_v49  ;;  %v3890_v30 = vld [vmem:[%s4037_s29 + $0x58] sm:$0xff]  }
  0x4f   : > { %915 = vst [vmem:[#allocation2 + $0x58] sm:$0xf] %v665_v52  ;;  %v724_v58 = vor.u32 %v722_v36, %v721_v46  ;;  %v725_v59 = vrot.slane %v721_v46, 4  ;;  %v401_v61 = vmax.f32 %v369_v47, 0.0  ;;  %v732_v0 = vor.u32 %v730_v43, %v4313_v53 }
  0x50   : > { %v311_v1 = vmul.f32 %v4024_v2, %v3750_v55  ;;  %v312_v4 = vmul.f32 %v4024_v2, %v3751_v56  ;;  %v426_v6 = vsel %vm4028_vm2, 0, %v425_v44  ;;  %v402_v10 = vmax.f32 %v370_v60, 0.0 }
  0x51   : > { %v941_v9 = vsel %vm4094_vm6, %v724_v58, %v940_v54  ;;  %v542_v12 = vpack.c.bf16 %v401_v61, %v401_v61  ;;  %427 = vst [vmem:[#allocation2 + $0x30] sm:$0x1] %v426_v6  ;;  %v3766_v13 = vunpack.c.l.bf16 %v3886_v57  ;;  %v4324_v16 = vld [vmem:[#allocation2 + $0x24] sm:$0xff]  ;;  %v733_v17 = vsel %vm4100_vm7, %v725_v59, %v732_v0 }
  0x52   : > { %942 = vst [vmem:[#allocation2 + $0x84] sm:$0xf] %v941_v9  ;;  %v347_v18 = vadd.f32 %v4042_v5, %v311_v1  ;;  %v348_v20 = vadd.f32 %v4042_v5, %v312_v4  ;;  %v3767_v22 = vunpack.c.h.bf16 %v3886_v57  ;;  %v543_v23 = vpack.c.bf16 %v402_v10, %v402_v10  ;;  %1765 = vmatmul.bf16.gmra.mxu0 %v4324_v16  ;;  %v449_v1 = vld [vmem:[#allocation2 + $0x90] sm:$0x1] }
  0x53   : > { %943 = vst [vmem:[#allocation2 + $0x88] sm:$0xf] %v733_v17  ;;  %v787_v27 = vshrl.u32 %v542_v12, 16  ;;  %v790_v28 = vshll.u32 %v542_v12, 16  ;;  %v319_v29 = vmul.f32 %v4024_v2, %v3766_v13  ;;  %v438_v36 = vsel %vm4028_vm2, 0, %v437_v15 }
  0x54   : > { %v379_v32 = vmax.f32 %v347_v18, 0.0  ;;  %v380_v33 = vmax.f32 %v348_v20, 0.0  ;;  %v320_v35 = vmul.f32 %v4024_v2, %v3767_v22  ;;  %v795_v38 = vshrl.u32 %v543_v23, 16  ;;  %439 = vst [vmem:[#allocation2 + $0x60] sm:$0x1] %v438_v36  ;;  %v3698_v20 = vld [vmem:[%s5147_s3 + $0x110] sm:$0xff] }
  0x55   : > { %v789_v37 = vrot.slane %v787_v27, 7  ;;  %v798_v39 = vshll.u32 %v543_v23, 16  ;;  %v355_v40 = vadd.f32 %v4042_v5, %v319_v29  ;;  %v968_v42 = vld [vmem:[#allocation2 + $0xb4] sm:$0xf]  ;;  %v3782_v46 = vunpack.c.l.bf16 %v3890_v30  ;;  %v3705_v22 = vld [vmem:[%s5147_s3 + $0x148] sm:$0xff]  ;;  %1841 = vmatpush.bf16.msrb.mxu1 %v3698_v20 }
  0x56   : > { %v4337_v41 = vld [vmem:[#allocation2 + $0x54] sm:$0xff]  ;;  %v520_v43 = vpack.c.bf16 %v379_v32, %v379_v32  ;;  %v521_v44 = vpack.c.bf16 %v380_v33, %v380_v33  ;;  %v356_v45 = vadd.f32 %v4042_v5, %v320_v35  ;;  %v4340_v51 = vrot.slane %v795_v38, 7  ;;  %v3665_v23 = vld [vmem:[%s5147_s3 + $0x8] sm:$0xff]  ;;  %v461_v32 = vld [vmem:[#allocation2 + $0xc0] sm:$0x1]  ;;  %1931 = vmatpush.bf16.msrb.mxu2 %v3705_v22 }
  0x57   : > { %v792_v49 = vor.u32 %v790_v28, %v789_v37  ;;  %v793_v47 = vrot.slane %v789_v37, 4  ;;  %v387_v52 = vmax.f32 %v355_v40, 0.0  ;;  %1785 = vmatmul.bf16.gmra.mxu1 %v4337_v41  ;;  %v3783_v10 = vunpack.c.h.bf16 %v3890_v30  ;;  %v3674_v33 = vld [vmem:[%s5147_s3 + $0x50] sm:$0xff]  ;;  %v3697_v40 = vld [vmem:[%s5147_s3 + $0x108] sm:$0xff]  ;;  %2164 = vmatpush.bf16.msrb.mxu3 %v3665_v23 }
  0x58   : > { %v600_v54 = vshrl.u32 %v520_v43, 16  ;;  %v603_v55 = vshll.u32 %v520_v43, 16  ;;  %v608_v56 = vshrl.u32 %v521_v44, 16  ;;  %v611_v57 = vshll.u32 %v521_v44, 16  ;;  %v891_v60 = vld [vmem:[#allocation2 + $0x30] sm:$0xf]  ;;  %2252 = vmatpush.bf16.msrb.mxu0 %v3674_v33 }
  0x59   : > { %v800_v58 = vor.u32 %v798_v39, %v4340_v51  ;;  %v969_v59 = vsel %vm4094_vm6, %v792_v49, %v968_v42  ;;  %v388_v61 = vmax.f32 %v356_v45, 0.0  ;;  %v528_v0 = vpack.c.bf16 %v387_v52, %v387_v52  ;;  %v3894_v39 = vld [vmem:[%s4037_s29 + $0x78] sm:$0xff]   ;;  %v3664_v49 = vld [vmem:[%s5147_s3] sm:$0xff]  ;;  %1842 = vmatpush.bf16.msrb.mxu1 %v3697_v40 }
  0x5a   : > { %v4346_v4 = vld [vmem:[#allocation2 + $0x84] sm:$0xff]  ;;  %970 = vst [vmem:[#allocation2 + $0xb4] sm:$0xf] %v969_v59  ;;  %v602_v6 = vrot.slane %v600_v54, 7  ;;  %v4348_v9 = vrot.slane %v608_v56, 7  ;;  %v327_v12 = vmul.f32 %v4024_v2, %v3782_v46  ;;  %v328_v30 = vmul.f32 %v4024_v2, %v3783_v10 }
  0x5b   : > { %v801_v13 = vsel %vm4100_vm7, %v793_v47, %v800_v58  ;;  %v529_v15 = vpack.c.bf16 %v388_v61, %v388_v61  ;;  %v668_v17 = vshrl.u32 %v528_v0, 16  ;;  %v671_v18 = vshll.u32 %v528_v0, 16  ;;  %1805 = vmatmul.bf16.gmra.mxu2 %v4346_v4  ;;  %v3704_v2 = vld [vmem:[%s5147_s3 + $0x140] sm:$0xff]  ;;  %v3673_v47 = vld [vmem:[%s5147_s3 + $0x48] sm:$0xff]  ;;  %v466_v61 = vld [vmem:[#allocation2 + $0x14] sm:$0x1]  ;;  %2165 = vmatpush.bf16.msrb.mxu3 %v3664_v49 }
  0x5c   : > { %971 = vst [vmem:[#allocation2 + $0xb8] sm:$0xf] %v801_v13  ;;  %v605_v27 = vor.u32 %v603_v55, %v602_v6  ;;  %v606_v28 = vrot.slane %v602_v6, 4  ;;  %v613_v29 = vor.u32 %v611_v57, %v4348_v9  ;;  %v363_v38 = vadd.f32 %v4042_v5, %v327_v12  ;;  %v919_v44 = vld [vmem:[#allocation2 + $0x60] sm:$0xf]  ;;  %1932 = vmatpush.bf16.msrb.mxu2 %v3704_v2 }
  0x5d   : > { %v670_v35 = vrot.slane %v668_v17, 7  ;;  %v676_v36 = vshrl.u32 %v529_v15, 16  ;;  %v679_v37 = vshll.u32 %v529_v15, 16  ;;  %v364_v45 = vadd.f32 %v4042_v5, %v328_v30  ;;  %v3696_v10 = vld [vmem:[%s5147_s3 + $0x100] sm:$0xff]  ;;  %2253 = vmatpush.bf16.msrb.mxu0 %v3673_v47 }
  0x5e   : > { %v614_v42 = vsel %vm4100_vm7, %v606_v28, %v613_v29  ;;  %v892_v43 = vsel %vm4094_vm6, %v605_v27, %v891_v60  ;;  %v450_v46 = vsel %vm4028_vm2, 0, %v449_v1  ;;  %v395_v56 = vmax.f32 %v363_v38, 0.0  ;;  %v3945_v13 = vld [vmem:[%s5145_s1] ss:$0 sm:$0xff]  ;;  %1843 = vmatpush.bf16.msrb.mxu1 %v3696_v10 }
  0x5f   : > { %893 = vst [vmem:[#allocation2 + $0x30] sm:$0xf] %v892_v43  ;;  %v673_v52 = vor.u32 %v671_v18, %v670_v35  ;;  %v674_v54 = vrot.slane %v670_v35, 4  ;;  %v4389_v55 = vrot.slane %v676_v36, 7  ;;  %v396_v5 = vmax.f32 %v364_v45, 0.0  ;;  %v3672_v18 = vld [vmem:[%s5147_s3 + $0x40] sm:$0xff] }
  0x60   : > { %894 = vst [vmem:[#allocation2 + $0x34] sm:$0xf] %v614_v42  ;;  %v3798_v57 = vunpack.c.l.bf16 %v3894_v39  ;;  %v3799_v58 = vunpack.c.h.bf16 %v3894_v39  ;;  %v462_v59 = vsel %vm4028_vm2, 0, %v461_v32  ;;  %v536_v6 = vpack.c.bf16 %v395_v56, %v395_v56  ;;  %v3946_v32 = vld [vmem:[%s5146_s2] ss:$0 sm:$0xff] }
  0x61   : > { %v681_v0 = vor.u32 %v679_v37, %v4389_v55  ;;  %v920_v1 = vsel %vm4094_vm6, %v673_v52, %v919_v44  ;;  %451 = vst [vmem:[#allocation2 + $0x90] sm:$0x1] %v450_v46  ;;  %v537_v12 = vpack.c.bf16 %v396_v5, %v396_v5  ;;  %v467_v28 = vsel %vm4395_vm8, 0, %v466_v61  ;;  %2254 = vmatpush.bf16.msrb.mxu0 %v3672_v18 }
  0x62   : > { %921 = vst [vmem:[#allocation2 + $0x60] sm:$0xf] %v920_v1  ;;  %v335_v15 = vmul.f32 %v3945_v13, %v3798_v57  ;;  %v336_v17 = vmul.f32 %v3945_v13, %v3799_v58  ;;  %v736_v23 = vshrl.u32 %v536_v6, 16  ;;  %v739_v27 = vshll.u32 %v536_v6, 16  ;;  %v3727_v13 = vld [vmem:[%s5147_s3 + $0x1f8] sm:$0xff] }
  0x63   : > { %v3661_v20 = vld [vmem:[#allocation2 + $0xb4] sm:$0xff]  ;;  %v682_v22 = vsel %vm4100_vm7, %v674_v54, %v681_v0  ;;  %463 = vst [vmem:[#allocation2 + $0xc0] sm:$0x1] %v462_v59  ;;  %v744_v29 = vshrl.u32 %v537_v12, 16  ;;  %v747_v30 = vshll.u32 %v537_v12, 16  ;;  %v3973_v49 = vmov 0   ;;  %2707 = vmatpush.bf16.msra.mxu3 %v3727_v13 }
  0x64   : > { %922 = vst [vmem:[#allocation2 + $0x64] sm:$0xf] %v682_v22  ;;  %v371_v33 = vadd.f32 %v3946_v32, %v335_v15  ;;  %v372_v35 = vadd.f32 %v3946_v32, %v336_v17  ;;  %1825 = vmatmul.bf16.gmra.mxu3 %v3661_v20  ;;  %v738_v36 = vrot.slane %v736_v23, 7  ;;  %v564_v52 = vrot.slane %v4090_v7, 4  ;;  %v469_v0 = vld [vmem:[#allocation2 + $0x20] sm:$0x1] }
  0x65   : > { %468 = vst [vmem:[#allocation2 + $0x14] sm:$0x1] %v467_v28  ;;  %v4418_v37 = vrot.slane %v744_v29, 7  ;;  %v3719_v12 = vld [vmem:[%s5147_s3 + $0x1b8] sm:$0xff]  ;;  %v472_v23 = vld [vmem:[#allocation2 + $0x2c] sm:$0x1] }
  0x66   : > { %v403_v38 = vmax.f32 %v371_v33, 0.0  ;;  %v404_v39 = vmax.f32 %v372_v35, 0.0  ;;  %v741_v2 = vor.u32 %v739_v27, %v738_v36  ;;  %v742_v42 = vrot.slane %v738_v36, 4  ;;  %405 = vst [vmem:[#allocation2] sm:$0xf] %v3973_v49  ;;  %v3687_v15 = vld [vmem:[%s5147_s3 + $0xb8] sm:$0xff]  ;;  %2618 = vmatpush.bf16.msra.mxu2 %v3719_v12 }
  0x67   : > { %v4420_v40 = vld [vmem:[#allocation2 + $0x30] sm:$0xff]  ;;  %v749_v43 = vor.u32 %v747_v30, %v4418_v37  ;;  %406 = vst [vmem:[#allocation2 + $0x4] sm:$0xf] %v3973_v49  ;;  %v3735_v22 = vld [vmem:[%s5147_s3 + $0x238] sm:$0xff]  ;;  %2336 = vmatpush.bf16.msra.mxu1 %v3687_v15  ;;  %v470_v30 = vsel %vm4395_vm8, 0, %v469_v0  ;;  %v473_v32 = vsel %vm4395_vm8, 0, %v472_v23 }
  0x68   : > { %v947_v44 = vld [vmem:[#allocation2 + $0x90] sm:$0xf]  ;;  %v544_v45 = vpack.c.bf16 %v403_v38, %v403_v38  ;;  %v545_v46 = vpack.c.bf16 %v404_v39, %v404_v39  ;;  %1770 = vmatmul.bf16.gmra.mxu0 %v4420_v40  ;;  %407 = vst [vmem:[#allocation2 + $0x8] sm:$0x1] %v3973_v49  ;;  %v475_v15 = vld [vmem:[#allocation2 + $0x38] sm:$0x1] }
  0x69   : > { %v948_v47 = vsel %vm4094_vm6, %v741_v2, %v947_v44  ;;  %v750_v54 = vsel %vm4100_vm7, %v742_v42, %v749_v43  ;;  %409 = vst [vmem:[#allocation2 + $0xcc] sm:$0xf] %v3973_v49  ;;  %2796 = vmatpush.bf16.msra.mxu0 %v3735_v22  ;;  %v1212_v43 = vshrl.u32 %v4157_v19, 16  ;;  %v1216_v44 = vrot.slane %v1214_v11, 1 }
  0x6a   : > { %949 = vst [vmem:[#allocation2 + $0x90] sm:$0xf] %v948_v47  ;;  %v804_v56 = vshrl.u32 %v544_v45, 16  ;;  %v807_v5 = vshll.u32 %v544_v45, 16  ;;  %v812_v57 = vshrl.u32 %v545_v46, 16  ;;  %v815_v59 = vshll.u32 %v545_v46, 16 }
  0x6b   : > { %v4429_v58 = vld [vmem:[#allocation2 + $0x60] sm:$0xff]  ;;  %950 = vst [vmem:[#allocation2 + $0x94] sm:$0xf] %v750_v54  ;;  %v581_v46 = vrot.slane %v4187_v48, 4  ;;  %v598_v54 = vrot.slane %v4265_v50, 4  ;;  %v1437_v50 = vrot.slane %v4157_v19, 1 }
  0x6c   : > { %v975_v61 = vld [vmem:[#allocation2 + $0xc0] sm:$0xf]  ;;  %v806_v1 = vrot.slane %v804_v56, 7  ;;  %v4431_v6 = vrot.slane %v812_v57, 7  ;;  %v874_v10 = vld [vmem:[#allocation2 + $0x14] sm:$0x1]  ;;  %1790 = vmatmul.bf16.gmra.mxu1 %v4429_v58 }
  0x6d   : > { %v875_v7 = vsel %vm4028_vm2, %v564_v52, %v874_v10  ;;  %410 = vst [vmem:[#allocation2 + $0xd0] sm:$0xf] %v3973_v49  ;;  %v1224_v23 = vshrl.u32 %v4243_v63, 16 }
  0x6e   : > { %v809_v17 = vor.u32 %v807_v5, %v806_v1  ;;  %v810_v18 = vrot.slane %v806_v1, 4  ;;  %v817_v20 = vor.u32 %v815_v59, %v4431_v6  ;;  %876 = vst [vmem:[#allocation2 + $0x14] sm:$0x1] %v875_v7  ;;  %v4453_v29 = vld [vmem:[#allocation2] sm:$0xff]  ;;  %v1217_v5 = vor.u32 %v1216_v44, %v1212_v43 }
  0x6f   : > { %411 = vst [vmem:[#allocation2 + $0xd4] sm:$0x1] %v3973_v49  ;;  %v1202_v8 = vshll.u32 %v4453_v29, 16  ;;  %v984_v35 = vld [vmem:[#allocation2 + $0x8] sm:$0x1]  ;;  %v1200_v38 = vshrl.u32 %v4453_v29, 16 }
  0x70   : > { %v818_v27 = vsel %vm4100_vm7, %v810_v18, %v817_v20  ;;  %v976_v28 = vsel %vm4094_vm6, %v809_v17, %v975_v61  ;;  %471 = vst [vmem:[#allocation2 + $0x20] sm:$0x1] %v470_v30  ;;  %v1162_v36 = vunpack.c.l.b16 %v984_v35  ;;  %v1226_v17 = vshll.u32 %v4243_v63, 16 }
  0x71   : > { %977 = vst [vmem:[#allocation2 + $0xc0] sm:$0xf] %v976_v28  ;;  %v1204_v39 = vrot.slane %v1202_v8, 1  ;;  %v476_v18 = vsel %vm4395_vm8, 0, %v475_v15  ;;  %v615_v30 = vrot.slane %v4348_v9, 4  ;;  %v3686_v9 = vld [vmem:[%s5147_s3 + $0xb0] sm:$0xff] }
  0x72   : > { %v4459_v33 = vld [vmem:[#allocation2 + $0x90] sm:$0xff]  ;;  %978 = vst [vmem:[#allocation2 + $0xc4] sm:$0xf] %v818_v27  ;;  %v4466_v45 = vpack.c.b16 %v1162_v36, %v1162_v36  ;;  %v1228_v27 = vrot.slane %v1226_v17, 1  ;;  %v1440_v44 = vrot.slane %v4243_v63, 1  ;;  %2337 = vmatpush.bf16.msra.mxu1 %v3686_v9  ;;  %v1443_v15 = vrot.slane %v4324_v16, 1 }
  0x73   : > { %1810 = vmatmul.bf16.gmra.mxu2 %v4459_v33  ;;  %474 = vst [vmem:[#allocation2 + $0x2c] sm:$0x1] %v473_v32  ;;  %v1205_v47 = vor.u32 %v1204_v39, %v1200_v38  ;;  %v3718_v39 = vld [vmem:[%s5147_s3 + $0x1b0] sm:$0xff]  ;;  %v3685_v9 = vld [vmem:[%s5147_s3 + $0xa8] sm:$0xff] }
  0x74   : > { %v1207_v52 = vshll.u32 %v4466_v45, 16  ;;  %477 = vst [vmem:[#allocation2 + $0x38] sm:$0x1] %v476_v18  ;;  %v1229_v32 = vor.u32 %v1228_v27, %v1224_v23  ;;  %2619 = vmatpush.bf16.msra.mxu2 %v3718_v39  ;;  %v1248_v27 = vshrl.u32 %v4420_v40, 16 }
  0x75   : > { %v987_v2 = vld [vmem:[#allocation2 + $0x14] sm:$0x1] }
  0x76   : > { %v1163_v42 = vunpack.c.l.b16 %v987_v2  ;;  %v1209_v59 = vrot.slane %v1207_v52, 1  ;;  %v3726_v2 = vld [vmem:[%s5147_s3 + $0x1f0] sm:$0xff]  ;;  %v1238_v52 = vshll.u32 %v4324_v16, 16  ;;  %2338 = vmatpush.bf16.msra.mxu1 %v3685_v9 }
  0x77   : > { %v881_v61 = vld [vmem:[#allocation2 + $0x20] sm:$0x1]  ;;  %2708 = vmatpush.bf16.msra.mxu3 %v3726_v2  ;;  %v3717_v2 = vld [vmem:[%s5147_s3 + $0x1a8] sm:$0xff] }
  0x78   : > { %v1181_v49 = vpack.c.b16 %v1163_v42, %v1163_v42  ;;  %v882_v0 = vsel %vm4028_vm2, %v581_v46, %v881_v61  ;;  %v1210_v48 = vsel %vm1198_vm9, %v1205_v47, %v1209_v59  ;;  %v632_v61 = vrot.slane %v4104_v14, 4  ;;  %v481_v14 = vld [vmem:[#allocation2 + $0x50] sm:$0x1]  ;;  %2620 = vmatpush.bf16.msra.mxu2 %v3717_v2 }
  0x79   : > { %v3662_v56 = vld [vmem:[#allocation2 + $0xc0] sm:$0xff]  ;;  %883 = vst [vmem:[#allocation2 + $0x20] sm:$0x1] %v882_v0  ;;  %2255 = vmatmul.bf16.vlgmr.msrb.gmra.mxu0 %v1210_v48 }
  0x7a   : > { %v1219_v57 = vshll.u32 %v1181_v49, 16  ;;  %1830 = vmatmul.bf16.gmra.mxu3 %v3662_v56  ;;  %v888_v1 = vld [vmem:[#allocation2 + $0x2c] sm:$0x1]  ;;  %v1438_v12 = vrot.slane %v1181_v49, 1  ;;  %v478_v49 = vld [vmem:[#allocation2 + $0x44] sm:$0x1] }
  0x7b   : > { %v889_v7 = vsel %vm4028_vm2, %v598_v54, %v888_v1  ;;  %v895_v8 = vld [vmem:[#allocation2 + $0x38] sm:$0x1]  ;;  %v479_v54 = vsel %vm4395_vm8, 0, %v478_v49 }
  0x7c   : > { %v1221_v10 = vrot.slane %v1219_v57, 1  ;;  %890 = vst [vmem:[#allocation2 + $0x2c] sm:$0x1] %v889_v7  ;;  %v4482_v20 = vsel %vm1433_vm10, %v1437_v50, %v1438_v12  ;;  %v896_v36 = vsel %vm4028_vm2, %v615_v30, %v895_v8  ;;  %v1240_v57 = vrot.slane %v1238_v52, 1  ;;  %v3947_v50 = vld [vmem:[#allocation2 + $0xc] sm:$0xff] }
  0x7d   : > { %897 = vst [vmem:[#allocation2 + $0x38] sm:$0x1] %v896_v36 }
  0x7e   : > { %v1222_v13 = vsel %vm1198_vm9, %v1217_v5, %v1221_v10  ;;  %480 = vst [vmem:[#allocation2 + $0x44] sm:$0x1] %v479_v54  ;;  %v1236_v5 = vshrl.u32 %v4324_v16, 16  ;;  %v4558_v54 = vld [vmem:[#allocation2 + $0x3c] sm:$0xff] }
  0x7f   : > { %1844 = vmatmul.bf16.vlgmr.msrb.gmra.mxu1 %v1222_v13 }
  0x80   : > { %v990_v22 = vld [vmem:[#allocation2 + $0x20] sm:$0x1]  ;;  %v1241_v0 = vor.u32 %v1240_v57, %v1236_v5  ;;  %v1262_v5 = vshll.u32 %v4558_v54, 16 }
  0x81   : > { %v1164_v19 = vunpack.c.l.b16 %v990_v22  ;;  %v1250_v22 = vshll.u32 %v4420_v40, 16 }
  0x83   : > { %1933 = vmatmul.bf16.vlgmr.msrb.gmra.mxu2 %v4482_v20  ;;  %v1182_v28 = vpack.c.b16 %v1164_v19, %v1164_v19  ;;  %v993_v35 = vld [vmem:[#allocation2 + $0x2c] sm:$0x1]  ;;  %v482_v19 = vsel %vm4395_vm8, 0, %v481_v14 }
  0x84   : > { %v1165_v43 = vunpack.c.l.b16 %v993_v35  ;;  %v996_v48 = vld [vmem:[#allocation2 + $0x38] sm:$0x1]  ;;  %483 = vst [vmem:[#allocation2 + $0x50] sm:$0x1] %v482_v19 }
  0x85   : > { %v1231_v11 = vshll.u32 %v1182_v28, 16  ;;  %v1441_v46 = vrot.slane %v1182_v28, 1  ;;  %v902_v10 = vld [vmem:[#allocation2 + $0x44] sm:$0x1]  ;;  %v1252_v28 = vrot.slane %v1250_v22, 1 }
  0x86   : > { %v1183_v47 = vpack.c.b16 %v1165_v43, %v1165_v43  ;;  %v903_v7 = vsel %vm4028_vm2, %v632_v61, %v902_v10  ;;  %v1260_v61 = vshrl.u32 %v4558_v54, 16 }
  0x87   : > { %v1233_v38 = vrot.slane %v1231_v11, 1  ;;  %v4511_v56 = vsel %vm1433_vm10, %v1440_v44, %v1441_v46  ;;  %904 = vst [vmem:[#allocation2 + $0x44] sm:$0x1] %v903_v7  ;;  %v1253_v11 = vor.u32 %v1252_v28, %v1248_v27  ;;  %v1446_v44 = vrot.slane %v4420_v40, 1 }
  0x88   : > { %v1243_v59 = vshll.u32 %v1183_v47, 16  ;;  %v1444_v17 = vrot.slane %v1183_v47, 1  ;;  %v484_v47 = vld [vmem:[#allocation2 + $0x5c] sm:$0x1] }
  0x89   : > { %v4500_v42 = vsel %vm1198_vm9, %v1229_v32, %v1233_v38  ;;  %2260 = vmatmul.bf16.gmra.mxu0 %v1222_v13  ;;  %v1166_v13 = vunpack.c.l.b16 %v996_v48  ;;  %v649_v32 = vrot.slane %v4214_v24, 4  ;;  %v3725_v24 = vld [vmem:[%s5147_s3 + $0x1e8] sm:$0xff]  ;;  %v485_v57 = vsel %vm4395_vm8, 0, %v484_v47 }
  0x8a   : > { %2166 = vmatmul.bf16.vlgmr.msrb.gmra.mxu3 %v4453_v29  ;;  %v3734_v29 = vld [vmem:[%s5147_s3 + $0x230] sm:$0xff]  ;;  %v1245_v1 = vrot.slane %v1243_v59, 1  ;;  %v4528_v23 = vsel %vm1433_vm10, %v1443_v15, %v1444_v17  ;;  %486 = vst [vmem:[#allocation2 + $0x5c] sm:$0x1] %v485_v57  ;;  %v666_v48 = vrot.slane %v4297_v31, 4  ;;  %v1449_v31 = vrot.slane %v4558_v54, 1 }
  0x8b   : > { %2797 = vmatpush.bf16.msra.mxu0 %v3734_v29  ;;  %v1184_v18 = vpack.c.b16 %v1166_v13, %v1166_v13  ;;  %v909_v35 = vld [vmem:[#allocation2 + $0x50] sm:$0x1]  ;;  %2709 = vmatpush.bf16.msra.mxu3 %v3725_v24  ;;  %v3716_v57 = vld [vmem:[%s5147_s3 + $0x1a0] sm:$0xff] }
  0x8c   : > { %v4519_v12 = vsel %vm1198_vm9, %v1241_v0, %v1245_v1  ;;  %v910_v38 = vsel %vm4028_vm2, %v649_v32, %v909_v35  ;;  %v1264_v0 = vrot.slane %v1262_v5, 1  ;;  %2621 = vmatpush.bf16.msra.mxu2 %v3716_v57 }
  0x8d   : > { %v1255_v30 = vshll.u32 %v1184_v18, 16  ;;  %911 = vst [vmem:[#allocation2 + $0x50] sm:$0x1] %v910_v38  ;;  %v1447_v46 = vrot.slane %v1184_v18, 1  ;;  %v1272_v38 = vshrl.u32 %v4254_v25, 16 }
  0x8e   : > { %v999_v36 = vld [vmem:[#allocation2 + $0x44] sm:$0x1]  ;;  %v1265_v7 = vor.u32 %v1264_v0, %v1260_v61 }
  0x8f   : > { %1849 = vmatmul.bf16.gmra.mxu1 %v4500_v42  ;;  %v1257_v8 = vrot.slane %v1255_v30, 1  ;;  %v1167_v29 = vunpack.c.l.b16 %v999_v36  ;;  %v4564_v59 = vsel %vm1433_vm10, %v1446_v44, %v1447_v46  ;;  %v487_v30 = vld [vmem:[#allocation2 + $0x68] sm:$0x1]  ;;  %v3684_v61 = vld [vmem:[%s5147_s3 + $0xa0] sm:$0xff] }
  0x90   : > { %2339 = vmatpush.bf16.msra.mxu1 %v3684_v61 }
  0x91   : > { %v4548_v43 = vsel %vm1198_vm9, %v1253_v11, %v1257_v8  ;;  %v1185_v52 = vpack.c.b16 %v1167_v29, %v1167_v29  ;;  %v916_v15 = vld [vmem:[#allocation2 + $0x5c] sm:$0x1]  ;;  %v1274_v11 = vshll.u32 %v4254_v25, 16  ;;  %v683_v29 = vrot.slane %v4389_v55, 4  ;;  %v3724_v55 = vld [vmem:[%s5147_s3 + $0x1e0] sm:$0xff] }
  0x92   : > { %v917_v14 = vsel %vm4028_vm2, %v666_v48, %v916_v15  ;;  %2710 = vmatpush.bf16.msra.mxu3 %v3724_v55 }
  0x93   : > { %1938 = vmatmul.bf16.gmra.mxu2 %v4511_v56  ;;  %v1267_v1 = vshll.u32 %v1185_v52, 16  ;;  %918 = vst [vmem:[#allocation2 + $0x5c] sm:$0x1] %v917_v14  ;;  %v1450_v27 = vrot.slane %v1185_v52, 1  ;;  %v1276_v2 = vrot.slane %v1274_v11, 1 }
  0x94   : > { %v1002_v17 = vld [vmem:[#allocation2 + $0x50] sm:$0x1]  ;;  %v490_v14 = vld [vmem:[#allocation2 + $0x74] sm:$0x1] }
  0x95   : > { %v1168_v19 = vunpack.c.l.b16 %v1002_v17  ;;  %v4590_v8 = vsel %vm1433_vm10, %v1449_v31, %v1450_v27  ;;  %v1286_v31 = vshll.u32 %v4337_v41, 16  ;;  %v491_v27 = vsel %vm4395_vm8, 0, %v490_v14 }
  0x96   : > { %492 = vst [vmem:[#allocation2 + $0x74] sm:$0x1] %v491_v27 }
  0x97   : > { %v1186_v32 = vpack.c.b16 %v1168_v19, %v1168_v19  ;;  %v1288_v11 = vrot.slane %v1286_v31, 1 }
  0x99   : > { %2265 = vmatmul.bf16.gmra.mxu0 %v4500_v42  ;;  %v1279_v24 = vshll.u32 %v1186_v32, 16  ;;  %v1453_v15 = vrot.slane %v1186_v32, 1  ;;  %v1284_v32 = vshrl.u32 %v4337_v41, 16 }
  0x9a   : > { %2171 = vmatmul.bf16.gmra.mxu3 %v3947_v50  ;;  %v1269_v50 = vrot.slane %v1267_v1, 1  ;;  %v1005_v52 = vld [vmem:[#allocation2 + $0x5c] sm:$0x1] }
  0x9b   : > { %v1281_v44 = vrot.slane %v1279_v24, 1  ;;  %v700_v24 = vrot.slane %v4111_v26, 4  ;;  %v1455_v26 = vrot.slane %v4337_v41, 1 }
  0x9c   : > { %v4579_v22 = vsel %vm1198_vm9, %v1265_v7, %v1269_v50  ;;  %v3732_v7 = vld [vmem:[%s5147_s3 + $0x220] sm:$0xff]  ;;  %v1452_v50 = vrot.slane %v4254_v25, 1 }
  0x9d   : > { %5175 = vst [vmem:[#allocation3_spill] sm:$0xff] %v4579_v22 }
  0x9e   : > { %v4634_v25 = vsel %vm1433_vm10, %v1452_v50, %v1453_v15 }
  0x9f   : > { %1854 = vmatmul.bf16.gmra.mxu1 %v4519_v12  ;;  %5179 = vst [vmem:[#allocation7_spill] sm:$0xff] %v4634_v25 }
  0xa3   : > { %1943 = vmatmul.bf16.gmra.mxu2 %v4528_v23 }
  0xa8   : > { %v4535_v39 = vpop.f32.mrf.mxu0 }
  0xa9   : > { %2270 = vmatmul.bf16.gmra.mxu0 %v4519_v12 }
  0xaa   : > { %2176 = vmatmul.bf16.gmra.mxu3 %v4243_v63  ;;  %v3733_v63 = vld [vmem:[%s5147_s3 + $0x228] sm:$0xff] }
  0xab   : > { %v4555_v49 = vpop.f32.mrf.mxu1  ;;  %2798 = vmatpush.bf16.msra.mxu0 %v3733_v63  ;;  %v1277_v63 = vor.u32 %v1276_v2, %v1272_v38 }
  0xad   : > { %v4618_v1 = vsel %vm1198_vm9, %v1277_v63, %v1281_v44  ;;  %v930_v44 = vld [vmem:[#allocation2 + $0x74] sm:$0x1] }
  0xae   : > { %5178 = vst [vmem:[#allocation6_spill] sm:$0xff] %v4618_v1 }
  0xaf   : > { %1859 = vmatmul.bf16.gmra.mxu1 %v4548_v43  ;;  %2799 = vmatpush.bf16.msra.mxu0 %v3732_v7  ;;  %v493_v7 = vld [vmem:[#allocation2 + $0x80] sm:$0x1] }
  0xb0   : > { %v4568_v10 = vpop.f32.mrf.mxu0  ;;  %v494_v31 = vsel %vm4395_vm8, 0, %v493_v7  ;;  %v4681_v7 = vld [vmem:[#allocation2 + $0x48] sm:$0xff] }
  0xb1   : > { %495 = vst [vmem:[#allocation2 + $0x80] sm:$0x1] %v494_v31 }
  0xb2   : > { %v4576_v18 = vpop.f32.mrf.mxu2  ;;  %5185 = vst [vmem:[#allocation13_spill] sm:$0xff] %v4681_v7 }
  0xb3   : > { %1948 = vmatmul.bf16.gmra.mxu2 %v4564_v59  ;;  %v4571_v13 = vpop.f32.mrf.mxu1 }
  0xb9   : > { %2275 = vmatmul.bf16.gmra.mxu0 %v4548_v43  ;;  %v4592_v35 = vpop.f32.mrf.mxu3 }
  0xba   : > { %2181 = vmatmul.bf16.gmra.mxu3 %v4324_v16  ;;  %v488_v16 = vsel %vm4395_vm8, 0, %v487_v30  ;;  %5176 = vst [vmem:[#allocation4_spill] sm:$0xff] %v4592_v35  ;;  %v4598_v9 = vpop.f32.mrf.mxu2 }
  0xbb   : > { %v4583_v28 = vpop.f32.mrf.mxu0  ;;  %489 = vst [vmem:[#allocation2 + $0x68] sm:$0x1] %v488_v16 }
  0xbf   : > { %1864 = vmatmul.bf16.gmra.mxu1 %v4579_v22  ;;  %v4594_v36 = vpop.f32.mrf.mxu1 }
  0xc1   : > { %v4615_v0 = vpop.f32.mrf.mxu3 }
  0xc2   : > { %v923_v47 = vld [vmem:[#allocation2 + $0x68] sm:$0x1]  ;;  %5177 = vst [vmem:[#allocation5_spill] sm:$0xff] %v4615_v0 }
  0xc3   : > { %1953 = vmatmul.bf16.gmra.mxu2 %v4590_v8  ;;  %v4601_v46 = vpop.f32.mrf.mxu0  ;;  %v924_v5 = vsel %vm4028_vm2, %v683_v29, %v923_v47  ;;  %v1289_v29 = vor.u32 %v1288_v11, %v1284_v32  ;;  %v1296_v32 = vshrl.u32 %v4429_v58, 16 }
  0xc4   : > { %925 = vst [vmem:[#allocation2 + $0x68] sm:$0x1] %v924_v5  ;;  %v931_v5 = vsel %vm4028_vm2, %v700_v24, %v930_v44 }
  0xc5   : > { %932 = vst [vmem:[#allocation2 + $0x74] sm:$0x1] %v931_v5 }
  0xc7   : > { %v4620_v48 = vpop.f32.mrf.mxu1  ;;  %v4628_v17 = vpop.f32.mrf.mxu2 }
  0xc9   : > { %2280 = vmatmul.bf16.gmra.mxu0 %v4579_v22 }
  0xca   : > { %2186 = vmatmul.bf16.gmra.mxu3 %v4420_v40  ;;  %v1169_v40 = vunpack.c.l.b16 %v1005_v52 }
  0xcb   : > { %v1008_v52 = vld [vmem:[#allocation2 + $0x68] sm:$0x1] }
  0xcc   : > { %v1187_v19 = vpack.c.b16 %v1169_v40, %v1169_v40  ;;  %v1170_v61 = vunpack.c.l.b16 %v1008_v52  ;;  %v937_v52 = vld [vmem:[#allocation2 + $0x80] sm:$0x1]  ;;  %v1011_v5 = vld [vmem:[#allocation2 + $0x74] sm:$0x1] }
  0xce   : > { %v1291_v16 = vshll.u32 %v1187_v19, 16  ;;  %v1456_v40 = vrot.slane %v1187_v19, 1  ;;  %v1188_v14 = vpack.c.b16 %v1170_v61, %v1170_v61 }
  0xcf   : > { %1869 = vmatmul.bf16.gmra.mxu1 %v4618_v1  ;;  %v4636_v30 = vpop.f32.mrf.mxu0  ;;  %v4645_v47 = vpop.f32.mrf.mxu2 }
  0xd0   : > { %v4640_v38 = vpop.f32.mrf.mxu3  ;;  %v1293_v63 = vrot.slane %v1291_v16, 1  ;;  %v4666_v27 = vsel %vm1433_vm10, %v1455_v26, %v1456_v40  ;;  %v1303_v16 = vshll.u32 %v1188_v14, 16 }
  0xd1   : > { %5180 = vst [vmem:[#allocation8_spill] sm:$0xff] %v4640_v38 }
  0xd2   : > { %v4651_v57 = vsel %vm1198_vm9, %v1289_v29, %v1293_v63  ;;  %5183 = vst [vmem:[#allocation11_spill] sm:$0xff] %v4666_v27  ;;  %v717_v29 = vrot.slane %v4222_v34, 4  ;;  %v1305_v44 = vrot.slane %v1303_v16, 1  ;;  %v3715_v34 = vld [vmem:[%s5147_s3 + $0x198] sm:$0xff]  ;;  %v1458_v16 = vrot.slane %v4429_v58, 1 }
  0xd3   : > { %1958 = vmatmul.bf16.gmra.mxu2 %v4634_v25  ;;  %5181 = vst [vmem:[#allocation9_spill] sm:$0xff] %v4651_v57 }
  0xd4   : > { %v4642_v2 = vpop.f32.mrf.mxu1  ;;  %v938_v61 = vsel %vm4028_vm2, %v717_v29, %v937_v52  ;;  %v1459_v29 = vrot.slane %v1188_v14, 1  ;;  %2622 = vmatpush.bf16.msra.mxu2 %v3715_v34  ;;  %v3683_v52 = vld [vmem:[%s5147_s3 + $0x98] sm:$0xff] }
  0xd5   : > { %939 = vst [vmem:[#allocation2 + $0x80] sm:$0x1] %v938_v61  ;;  %2340 = vmatpush.bf16.msra.mxu1 %v3683_v52 }
  0xd7   : > { %v4653_v55 = vpop.f32.mrf.mxu0 }
  0xd8   : > { %v4658_v50 = vpop.f32.mrf.mxu3 }
  0xd9   : > { %2285 = vmatmul.bf16.gmra.mxu0 %v4618_v1  ;;  %5182 = vst [vmem:[#allocation10_spill] sm:$0xff] %v4658_v50 }
  0xda   : > { %2191 = vmatmul.bf16.gmra.mxu3 %v4558_v54  ;;  %v1298_v54 = vshll.u32 %v4429_v58, 16 }
  0xdc   : > { %v4660_v15 = vpop.f32.mrf.mxu1  ;;  %v1300_v11 = vrot.slane %v1298_v54, 1  ;;  %v3723_v54 = vld [vmem:[%s5147_s3 + $0x1d8] sm:$0xff]  ;;  %v1014_v52 = vld [vmem:[#allocation2 + $0x80] sm:$0x1] }
  0xdd   : > { %2711 = vmatpush.bf16.msra.mxu3 %v3723_v54  ;;  %v4712_v54 = vsel %vm1433_vm10, %v1458_v16, %v1459_v29 }
  0xde   : > { %v4668_v19 = vpop.f32.mrf.mxu2  ;;  %v1301_v63 = vor.u32 %v1300_v11, %v1296_v32  ;;  %v1171_v32 = vunpack.c.l.b16 %v1011_v5  ;;  %5187 = vst [vmem:[#allocation15_spill] sm:$0xff] %v4712_v54 }
  0xdf   : > { %1874 = vmatmul.bf16.gmra.mxu1 %v4651_v57 }
  0xe0   : > { %v4691_v31 = vsel %vm1198_vm9, %v1301_v63, %v1305_v44  ;;  %v3731_v63 = vld [vmem:[%s5147_s3 + $0x218] sm:$0xff]  ;;  %v496_v44 = vld [vmem:[#allocation2 + $0x8c] sm:$0x1]  ;;  %v1189_v61 = vpack.c.b16 %v1171_v32, %v1171_v32 }
  0xe1   : > { %5186 = vst [vmem:[#allocation14_spill] sm:$0xff] %v4691_v31  ;;  %v497_v34 = vsel %vm4395_vm8, 0, %v496_v44  ;;  %2800 = vmatpush.bf16.msra.mxu0 %v3731_v63  ;;  %v734_v44 = vrot.slane %v4313_v53, 4 }
  0xe2   : > { %498 = vst [vmem:[#allocation2 + $0x8c] sm:$0x1] %v497_v34  ;;  %v1315_v0 = vshll.u32 %v1189_v61, 16  ;;  %v1462_v53 = vrot.slane %v1189_v61, 1 }
  0xe3   : > { %1963 = vmatmul.bf16.gmra.mxu2 %v4666_v27 }
  0xe4   : > { %v1317_v16 = vrot.slane %v1315_v0, 1 }
  0xe5   : > { %v4672_v24 = vpop.f32.mrf.mxu0 }
  0xe6   : > { %v4693_v11 = vpop.f32.mrf.mxu2 }
  0xe7   : > { %v4677_v26 = vpop.f32.mrf.mxu3 }
  0xe8   : > { %5184 = vst [vmem:[#allocation12_spill] sm:$0xff] %v4677_v26  ;;  %v4706_v26 = vld [vmem:[#allocation2 + $0x6c] sm:$0xff] }
  0xe9   : > { %v4679_v40 = vpop.f32.mrf.mxu1  ;;  %2290 = vmatmul.bf16.gmra.mxu0 %v4651_v57  ;;  %v1310_v14 = vshll.u32 %v4706_v26, 16  ;;  %v1308_v32 = vshrl.u32 %v4706_v26, 16  ;;  %v944_v29 = vld [vmem:[#allocation2 + $0x8c] sm:$0x1]  ;;  %v1461_v35 = vrot.slane %v4706_v26, 1 }
  0xea   : > { %2196 = vmatmul.bf16.gmra.mxu3 %v4681_v7  ;;  %v945_v63 = vsel %vm4028_vm2, %v734_v44, %v944_v29  ;;  %v4738_v29 = vld [vmem:[#allocation2 + $0x78] sm:$0xff] }
  0xeb   : > { %v1312_v38 = vrot.slane %v1310_v14, 1  ;;  %946 = vst [vmem:[#allocation2 + $0x8c] sm:$0x1] %v945_v63  ;;  %v1320_v63 = vshrl.u32 %v4738_v29, 16 }
  0xed   : > { %v4704_v5 = vpop.f32.mrf.mxu0  ;;  %v1313_v1 = vor.u32 %v1312_v38, %v1308_v32  ;;  %v499_v32 = vld [vmem:[#allocation2 + $0x98] sm:$0x1] }
  0xef   : > { %1879 = vmatmul.bf16.gmra.mxu1 %v4691_v31  ;;  %v4716_v57 = vpop.f32.mrf.mxu3  ;;  %v4729_v14 = vsel %vm1198_vm9, %v1313_v1, %v1317_v16  ;;  %v500_v1 = vsel %vm4395_vm8, 0, %v499_v32  ;;  %v4744_v16 = vsel %vm1433_vm10, %v1461_v35, %v1462_v53  ;;  %v751_v32 = vrot.slane %v4418_v37, 4  ;;  %v3722_v37 = vld [vmem:[%s5147_s3 + $0x1d0] sm:$0xff] }
  0xf0   : > { %5188 = vst [vmem:[#allocation16_spill] sm:$0xff] %v4716_v57  ;;  %2712 = vmatpush.bf16.msra.mxu3 %v3722_v37 }
  0xf1   : > { %v4714_v50 = vpop.f32.mrf.mxu1  ;;  %5192 = vst [vmem:[#allocation20_spill] sm:$0xff] %v4744_v16 }
  0xf2   : > { %501 = vst [vmem:[#allocation2 + $0x98] sm:$0x1] %v500_v1  ;;  %v1017_v22 = vld [vmem:[#allocation2 + $0x8c] sm:$0x1] }
  0xf3   : > { %1968 = vmatmul.bf16.gmra.mxu2 %v4712_v54  ;;  %v1172_v54 = vunpack.c.l.b16 %v1014_v52 }
  0xf5   : > { %v1190_v44 = vpack.c.b16 %v1172_v54, %v1172_v54 }
  0xf6   : > { %v4720_v27 = vpop.f32.mrf.mxu2  ;;  %v4725_v34 = vpop.f32.mrf.mxu0 }
  0xf7   : > { %5189 = vst [vmem:[#allocation17_spill] sm:$0xff] %v4720_v27  ;;  %v1327_v54 = vshll.u32 %v1190_v44, 16 }
  0xf9   : > { %2295 = vmatmul.bf16.gmra.mxu0 %v4691_v31  ;;  %v1329_v53 = vrot.slane %v1327_v54, 1  ;;  %v951_v1 = vld [vmem:[#allocation2 + $0x98] sm:$0x1] }
  0xfa   : > { %2201 = vmatmul.bf16.gmra.mxu3 %v4337_v41  ;;  %v1322_v41 = vshll.u32 %v4738_v29, 16 }
  0xfc   : > { %v1845_v57 = vpop.f32.mrf.mxu1 }
  0xfd   : > { %v4733_v0 = vpop.f32.mrf.mxu3  ;;  %v1846_v7 = vadd.f32 %v1845_v57, %v4535_v39  ;;  %v3714_v39 = vld [vmem:[%s5147_s3 + $0x190] sm:$0xff] }
  0xfe   : > { %5190 = vst [vmem:[#allocation18_spill] sm:$0xff] %v4733_v0  ;;  %v4735_v38 = vpop.f32.mrf.mxu2  ;;  %v4746_v61 = vpop.f32.mrf.mxu0  ;;  %v1324_v0 = vrot.slane %v1322_v41, 1  ;;  %v1465_v41 = vrot.slane %v1190_v44, 1  ;;  %2623 = vmatpush.bf16.msra.mxu2 %v3714_v39  ;;  %v502_v44 = vld [vmem:[#allocation2 + $0xa4] sm:$0x1] }
  0xff   : > { %5191 = vst [vmem:[#allocation19_spill] sm:$0xff] %v4735_v38  ;;  %1884 = vmatmul.bf16.gmra.mxu1 %v4729_v14 }
 0x100   : > { %v1325_v35 = vor.u32 %v1324_v0, %v1320_v63  ;;  %v1173_v0 = vunpack.c.l.b16 %v1017_v22  ;;  %v3730_v22 = vld [vmem:[%s5147_s3 + $0x210] sm:$0xff] }
 0x101   : > { %2801 = vmatpush.bf16.msra.mxu0 %v3730_v22 }
 0x103   : > { %1973 = vmatmul.bf16.gmra.mxu2 %v4744_v16  ;;  %v952_v16 = vsel %vm4028_vm2, %v751_v32, %v951_v1  ;;  %v3682_v32 = vld [vmem:[%s5147_s3 + $0x90] sm:$0xff]  ;;  %v1334_v1 = vshll.u32 %v4346_v4, 16 }
 0x104   : > { %v1847_v52 = vpop.f32.mrf.mxu1  ;;  %953 = vst [vmem:[#allocation2 + $0x98] sm:$0x1] %v952_v16  ;;  %2341 = vmatpush.bf16.msra.mxu1 %v3682_v32 }
 0x105   : > { %v4750_v31 = vpop.f32.mrf.mxu3  ;;  %v1848_v16 = vadd.f32 %v1847_v52, %v4568_v10  ;;  %v503_v10 = vsel %vm4395_vm8, 0, %v502_v44 }
 0x106   : > { %5193 = vst [vmem:[#allocation21_spill] sm:$0xff] %v4750_v31  ;;  %v1934_v38 = vpop.f32.mrf.mxu2  ;;  %v4756_v27 = vpop.f32.mrf.mxu0 }
 0x107   : > { %v1935_v25 = vadd.f32 %v1934_v38, %v1846_v7  ;;  %v4766_v7 = vsel %vm1198_vm9, %v1325_v35, %v1329_v53  ;;  %v1464_v38 = vrot.slane %v4738_v29, 1  ;;  %v1191_v53 = vpack.c.b16 %v1173_v0, %v1173_v0  ;;  %504 = vst [vmem:[#allocation2 + $0xa4] sm:$0x1] %v503_v10 }
 0x108   : > { %v1332_v0 = vshrl.u32 %v4346_v4, 16 }
 0x109   : > { %2300 = vmatmul.bf16.gmra.mxu0 %v4729_v14 }
 0x10a   : > { %2206 = vmatmul.bf16.gmra.mxu3 %v4429_v58 }
 0x10c   : > { %v1850_v57 = vpop.f32.mrf.mxu1 }
 0x10d   : > { %v2167_v58 = vpop.f32.mrf.mxu3  ;;  %v1851_v44 = vadd.f32 %v1850_v57, %v4583_v28 }
 0x10e   : > { %v2168_v63 = vadd.f32 %v2167_v58, %v1935_v25  ;;  %v1936_v54 = vpop.f32.mrf.mxu2  ;;  %v4782_v25 = vsel %vm1433_vm10, %v1464_v38, %v1465_v41  ;;  %v2263_v39 = vpop.f32.mrf.mxu0  ;;  %v1336_v58 = vrot.slane %v1334_v1, 1  ;;  %v768_v41 = vrot.slane %v4147_v62, 4 }
 0x10f   : > { %1889 = vmatmul.bf16.gmra.mxu1 %v4766_v7  ;;  %v1937_v35 = vadd.f32 %v1936_v54, %v1848_v16  ;;  %5194 = vst [vmem:[#allocation22_spill] sm:$0xff] %v4782_v25  ;;  %v1339_v16 = vshll.u32 %v1191_v53, 16 }
 0x110   : > { %v4785_v52 = vadd.f32 %v4725_v34, %v2168_v63  ;;  %v1337_v22 = vor.u32 %v1336_v58, %v1332_v0  ;;  %v958_v34 = vld [vmem:[#allocation2 + $0xa4] sm:$0x1]  ;;  %v1020_v63 = vld [vmem:[#allocation2 + $0x98] sm:$0x1]  ;;  %v1468_v0 = vrot.slane %v1191_v53, 1 }
 0x111   : > { %v1341_v10 = vrot.slane %v1339_v16, 1  ;;  %v1174_v62 = vunpack.c.l.b16 %v1020_v63 }
 0x112   : > { %5195 = vst [vmem:[#allocation23_spill] sm:$0xff] %v4785_v52  ;;  %v959_v52 = vsel %vm4028_vm2, %v768_v41, %v958_v34 }
 0x113   : > { %1978 = vmatmul.bf16.gmra.mxu2 %v4782_v25  ;;  %960 = vst [vmem:[#allocation2 + $0xa4] sm:$0x1] %v959_v52  ;;  %v4800_v57 = vsel %vm1198_vm9, %v1337_v22, %v1341_v10  ;;  %v505_v52 = vld [vmem:[#allocation2 + $0xb0] sm:$0x1] }
 0x114   : > { %v1852_v37 = vpop.f32.mrf.mxu1  ;;  %v506_v41 = vsel %vm4395_vm8, 0, %v505_v52 }
 0x115   : > { %v2169_v54 = vpop.f32.mrf.mxu3  ;;  %v1853_v16 = vadd.f32 %v1852_v37, %v4601_v46  ;;  %507 = vst [vmem:[#allocation2 + $0xb0] sm:$0x1] %v506_v41 }
 0x116   : > { %v2170_v31 = vadd.f32 %v2169_v54, %v1937_v35  ;;  %v1939_v38 = vpop.f32.mrf.mxu2  ;;  %v4796_v1 = vpop.f32.mrf.mxu0  ;;  %v1467_v35 = vrot.slane %v4346_v4, 1 }
 0x117   : > { %v1940_v32 = vadd.f32 %v1939_v38, %v1851_v44  ;;  %v1192_v44 = vpack.c.b16 %v1174_v62, %v1174_v62  ;;  %v1346_v38 = vshll.u32 %v4459_v33, 16 }
 0x118   : > { %v4794_v25 = vadd.f32 %v4746_v61, %v2170_v31  ;;  %v4810_v4 = vsel %vm1433_vm10, %v1467_v35, %v1468_v0 }
 0x119   : > { %2305 = vmatmul.bf16.gmra.mxu0 %v4766_v7  ;;  %v1348_v22 = vrot.slane %v1346_v38, 1  ;;  %v1351_v10 = vshll.u32 %v1192_v44, 16 }
 0x11a   : > { %2211 = vmatmul.bf16.gmra.mxu3 %v4706_v26  ;;  %v1023_v52 = vld [vmem:[#allocation2 + $0xa4] sm:$0x1] }
 0x11c   : > { %v1855_v28 = vpop.f32.mrf.mxu1 }
 0x11d   : > { %v2172_v58 = vpop.f32.mrf.mxu3  ;;  %v1856_v62 = vadd.f32 %v1855_v28, %v4636_v30  ;;  %v3713_v30 = vld [vmem:[%s5147_s3 + $0x188] sm:$0xff] }
 0x11e   : > { %v2173_v31 = vadd.f32 %v2172_v58, %v1940_v32  ;;  %v1941_v61 = vpop.f32.mrf.mxu2  ;;  %v4815_v46 = vpop.f32.mrf.mxu0  ;;  %v1344_v32 = vshrl.u32 %v4459_v33, 16  ;;  %v785_v58 = vrot.slane %v4251_v21, 4  ;;  %v3721_v21 = vld [vmem:[%s5147_s3 + $0x1c8] sm:$0xff]  ;;  %2624 = vmatpush.bf16.msra.mxu2 %v3713_v30 }
 0x11f   : > { %1894 = vmatmul.bf16.gmra.mxu1 %v4800_v57  ;;  %v1942_v54 = vadd.f32 %v1941_v61, %v1853_v16  ;;  %v965_v61 = vld [vmem:[#allocation2 + $0xb0] sm:$0x1]  ;;  %2713 = vmatpush.bf16.msra.mxu3 %v3721_v21 }
 0x120   : > { %v4813_v53 = vadd.f32 %v4756_v27, %v2173_v31  ;;  %v1349_v16 = vor.u32 %v1348_v22, %v1344_v32  ;;  %v1353_v31 = vrot.slane %v1351_v10, 1  ;;  %v966_v41 = vsel %vm4028_vm2, %v785_v58, %v965_v61  ;;  %v4848_v58 = vld [vmem:[#allocation2 + $0x9c] sm:$0xff] }
 0x121   : > { %967 = vst [vmem:[#allocation2 + $0xb0] sm:$0x1] %v966_v41  ;;  %v1471_v32 = vrot.slane %v1192_v44, 1  ;;  %v1356_v41 = vshrl.u32 %v4848_v58, 16 }
 0x122   : > { %5196 = vst [vmem:[#allocation24_spill] sm:$0xff] %v4813_v53  ;;  %v4836_v28 = vsel %vm1198_vm9, %v1349_v16, %v1353_v31  ;;  %v1358_v16 = vshll.u32 %v4848_v58, 16 }
 0x123   : > { %1983 = vmatmul.bf16.gmra.mxu2 %v4810_v4 }
 0x124   : > { %v1857_v37 = vpop.f32.mrf.mxu1  ;;  %v1360_v30 = vrot.slane %v1358_v16, 1 }
 0x125   : > { %v1858_v34 = vadd.f32 %v1857_v37, %v4653_v55  ;;  %v2174_v63 = vpop.f32.mrf.mxu3  ;;  %v1470_v37 = vrot.slane %v4459_v33, 1 }
 0x126   : > { %v2175_v35 = vadd.f32 %v2174_v63, %v1942_v54  ;;  %v1944_v0 = vpop.f32.mrf.mxu2  ;;  %v4826_v38 = vpop.f32.mrf.mxu0  ;;  %v1175_v54 = vunpack.c.l.b16 %v1023_v52 }
 0x127   : > { %v1945_v27 = vadd.f32 %v1944_v0, %v1856_v62  ;;  %v3681_v62 = vld [vmem:[%s5147_s3 + $0x88] sm:$0xff]  ;;  %v4854_v31 = vsel %vm1433_vm10, %v1470_v37, %v1471_v32  ;;  %v802_v32 = vrot.slane %v4340_v51, 4 }
 0x128   : > { %v4824_v53 = vadd.f32 %v2263_v39, %v2175_v35  ;;  %v508_v35 = vld [vmem:[#allocation2 + $0xbc] sm:$0x1]  ;;  %v1193_v44 = vpack.c.b16 %v1175_v54, %v1175_v54  ;;  %2342 = vmatpush.bf16.msra.mxu1 %v3681_v62  ;;  %v1361_v62 = vor.u32 %v1360_v30, %v1356_v41 }
 0x129   : > { %2310 = vmatmul.bf16.gmra.mxu0 %v4800_v57 }
 0x12a   : > { %2216 = vmatmul.bf16.gmra.mxu3 %v4738_v29  ;;  %v1363_v21 = vshll.u32 %v1193_v44, 16  ;;  %v1474_v41 = vrot.slane %v1193_v44, 1 }
 0x12c   : > { %v1860_v55 = vpop.f32.mrf.mxu1 }
 0x12d   : > { %v1861_v39 = vadd.f32 %v1860_v55, %v4672_v24  ;;  %v2177_v22 = vpop.f32.mrf.mxu3  ;;  %v3729_v24 = vld [vmem:[%s5147_s3 + $0x208] sm:$0xff] }
 0x12e   : > { %v2178_v10 = vadd.f32 %v2177_v22, %v1945_v27  ;;  %v1946_v63 = vpop.f32.mrf.mxu2  ;;  %v509_v27 = vsel %vm4395_vm8, 0, %v508_v35  ;;  %2802 = vmatpush.bf16.msra.mxu0 %v3729_v24  ;;  %v2273_v52 = vpop.f32.mrf.mxu0  ;;  %v1365_v24 = vrot.slane %v1363_v21, 1 }
 0x12f   : > { %1899 = vmatmul.bf16.gmra.mxu1 %v4836_v28  ;;  %v1947_v0 = vadd.f32 %v1946_v63, %v1858_v34  ;;  %510 = vst [vmem:[#allocation2 + $0xbc] sm:$0x1] %v509_v27 }
 0x130   : > { %v4857_v61 = vadd.f32 %v4796_v1, %v2178_v10  ;;  %v1026_v10 = vld [vmem:[#allocation2 + $0xb0] sm:$0x1]  ;;  %v4874_v51 = vsel %vm1198_vm9, %v1361_v62, %v1365_v24 }
 0x132   : > { %5197 = vst [vmem:[#allocation25_spill] sm:$0xff] %v4857_v61 }
 0x133   : > { %1988 = vmatmul.bf16.gmra.mxu2 %v4854_v31 }
 0x134   : > { %v1862_v34 = vpop.f32.mrf.mxu1 }
 0x135   : > { %v1863_v55 = vadd.f32 %v1862_v34, %v4704_v5  ;;  %v2179_v54 = vpop.f32.mrf.mxu3  ;;  %v4870_v5 = vld [vmem:[#allocation2 + $0x84] sm:$0xff]  ;;  %v1473_v34 = vrot.slane %v4848_v58, 1 }
 0x136   : > { %v2180_v22 = vadd.f32 %v2179_v54, %v1947_v0  ;;  %v1949_v37 = vpop.f32.mrf.mxu2  ;;  %v972_v1 = vld [vmem:[#allocation2 + $0xbc] sm:$0x1]  ;;  %v4868_v16 = vpop.f32.mrf.mxu0  ;;  %v511_v54 = vld [vmem:[#allocation2 + $0xc8] sm:$0x1] }
 0x137   : > { %v1950_v63 = vadd.f32 %v1949_v37, %v1861_v39  ;;  %v973_v35 = vsel %vm4028_vm2, %v802_v32, %v972_v1  ;;  %v1176_v39 = vunpack.c.l.b16 %v1026_v10  ;;  %v4879_v32 = vld [vmem:[#allocation2 + $0xa8] sm:$0xff]  ;;  %v512_v62 = vsel %vm4395_vm8, 0, %v511_v54 }
 0x138   : > { %v4866_v27 = vadd.f32 %v4815_v46, %v2180_v22  ;;  %974 = vst [vmem:[#allocation2 + $0xbc] sm:$0x1] %v973_v35  ;;  %v1370_v1 = vshll.u32 %v4879_v32, 16  ;;  %v4885_v24 = vsel %vm1433_vm10, %v1473_v34, %v1474_v41  ;;  %v819_v34 = vrot.slane %v4431_v6, 4  ;;  %v3720_v6 = vld [vmem:[%s5147_s3 + $0x1c0] sm:$0xff] }
 0x139   : > { %2315 = vmatmul.bf16.gmra.mxu0 %v4836_v28  ;;  %v1194_v37 = vpack.c.b16 %v1176_v39, %v1176_v39  ;;  %5199 = vst [vmem:[#allocation27_spill] sm:$0xff] %v4885_v24  ;;  %2714 = vmatpush.bf16.msra.mxu3 %v3720_v6 }
 0x13a   : > { %5198 = vst [vmem:[#allocation26_spill] sm:$0xff] %v4866_v27  ;;  %2221 = vmatmul.bf16.gmra.mxu3 %v4870_v5  ;;  %v1372_v35 = vrot.slane %v1370_v1, 1 }
 0x13b   : > { %513 = vst [vmem:[#allocation2 + $0xc8] sm:$0x1] %v512_v62  ;;  %v1375_v39 = vshll.u32 %v1194_v37, 16  ;;  %v1477_v1 = vrot.slane %v1194_v37, 1 }
 0x13c   : > { %v1865_v0 = vpop.f32.mrf.mxu1 }
 0x13d   : > { %v2182_v30 = vpop.f32.mrf.mxu3  ;;  %v1377_v27 = vrot.slane %v1375_v39, 1  ;;  %v3728_v39 = vld [vmem:[%s5147_s3 + $0x200] sm:$0xff] }
 0x13e   : > { %v2183_v46 = vadd.f32 %v2182_v30, %v1950_v63  ;;  %v1951_v21 = vpop.f32.mrf.mxu2  ;;  %v2278_v63 = vpop.f32.mrf.mxu0  ;;  %2803 = vmatpush.bf16.msra.mxu0 %v3728_v39 }
 0x13f   : > { %1904 = vmatmul.bf16.gmra.mxu1 %v4874_v51  ;;  %v1952_v22 = vadd.f32 %v1951_v21, %v1863_v55  ;;  %v1368_v55 = vshrl.u32 %v4879_v32, 16  ;;  %v1866_v21 = vadd.f32 %v1865_v0, %v4555_v49  ;;  %v3712_v49 = vld [vmem:[%s5147_s3 + $0x180] sm:$0xff] }
 0x140   : > { %v4888_v44 = vadd.f32 %v4826_v38, %v2183_v46  ;;  %v1029_v46 = vld [vmem:[#allocation2 + $0xbc] sm:$0x1]  ;;  %2625 = vmatpush.bf16.msra.mxu2 %v3712_v49 }
 0x141   : > { %v1373_v62 = vor.u32 %v1372_v35, %v1368_v55  ;;  %v1177_v3 = vunpack.c.l.b16 %v1029_v46 }
 0x142   : > { %5200 = vst [vmem:[#allocation28_spill] sm:$0xff] %v4888_v44  ;;  %v979_v38 = vld [vmem:[#allocation2 + $0xc8] sm:$0x1] }
 0x143   : > { %1993 = vmatmul.bf16.gmra.mxu2 %v4885_v24  ;;  %v980_v44 = vsel %vm4028_vm2, %v819_v34, %v979_v38 }
 0x144   : > { %v1867_v10 = vpop.f32.mrf.mxu1  ;;  %981 = vst [vmem:[#allocation2 + $0xc8] sm:$0x1] %v980_v44 }
 0x145   : > { %v2184_v30 = vpop.f32.mrf.mxu3  ;;  %v1868_v44 = vadd.f32 %v1867_v10, %v4571_v13 }
 0x146   : > { %v2185_v60 = vadd.f32 %v2184_v30, %v1952_v22  ;;  %v1954_v54 = vpop.f32.mrf.mxu2  ;;  %v2281_v24 = vpop.f32.mrf.mxu0  ;;  %v4906_v22 = vsel %vm1198_vm9, %v1373_v62, %v1377_v27  ;;  %v3680_v27 = vld [vmem:[%s5147_s3 + $0x80] sm:$0xff]  ;;  %v1195_v30 = vpack.c.b16 %v1177_v3, %v1177_v3 }
 0x147   : > { %v1955_v41 = vadd.f32 %v1954_v54, %v1866_v21  ;;  %v4918_v21 = vld [vmem:[#allocation2 + $0xb4] sm:$0xff]  ;;  %2343 = vmatpush.bf16.msra.mxu1 %v3680_v27 }
 0x148   : > { %v4896_v61 = vadd.f32 %v2273_v52, %v2185_v60  ;;  %v1476_v52 = vrot.slane %v4879_v32, 1  ;;  %v1382_v60 = vshll.u32 %v4918_v21, 16  ;;  %v1387_v38 = vshll.u32 %v1195_v30, 16 }
 0x149   : > { %2320 = vmatmul.bf16.gmra.mxu0 %v4874_v51 }
 0x14a   : > { %2226 = vmatmul.bf16.gmra.mxu3 %v4459_v33  ;;  %v4922_v13 = vsel %vm1433_vm10, %v1476_v52, %v1477_v1  ;;  %v1384_v62 = vrot.slane %v1382_v60, 1  ;;  %v1479_v60 = vrot.slane %v4918_v21, 1 }
 0x14c   : > { %v1870_v0 = vpop.f32.mrf.mxu1 }
 0x14d   : > { %v2187_v33 = vpop.f32.mrf.mxu3  ;;  %v1871_v49 = vadd.f32 %v1870_v0, %v4594_v36 }
 0x14e   : > { %v2188_v55 = vadd.f32 %v2187_v33, %v1955_v41  ;;  %v1956_v35 = vpop.f32.mrf.mxu2  ;;  %v2283_v54 = vpop.f32.mrf.mxu0  ;;  %v1380_v41 = vshrl.u32 %v4918_v21, 16  ;;  %v1389_v33 = vrot.slane %v1387_v38, 1  ;;  %v4940_v38 = vld [vmem:[#allocation2 + $0xc0] sm:$0xff] }
 0x14f   : > { %1909 = vmatmul.bf16.gmra.mxu1 %v4906_v22  ;;  %v1957_v37 = vadd.f32 %v1956_v35, %v1868_v44  ;;  %v1032_v44 = vld [vmem:[#allocation2 + $0xc8] sm:$0x1] }
 0x150   : > { %v4925_v10 = vadd.f32 %v4868_v16, %v2188_v55  ;;  %v1385_v1 = vor.u32 %v1384_v62, %v1380_v41  ;;  %v1178_v39 = vunpack.c.l.b16 %v1032_v44 }
 0x152   : > { %5201 = vst [vmem:[#allocation29_spill] sm:$0xff] %v4925_v10  ;;  %v4934_v27 = vsel %vm1198_vm9, %v1385_v1, %v1389_v33  ;;  %v1480_v10 = vrot.slane %v1195_v30, 1  ;;  %v1196_v62 = vpack.c.b16 %v1178_v39, %v1178_v39 }
 0x153   : > { %1998 = vmatmul.bf16.gmra.mxu2 %v4922_v13 }
 0x154   : > { %v1872_v34 = vpop.f32.mrf.mxu1 }
 0x155   : > { %v2189_v46 = vpop.f32.mrf.mxu3  ;;  %v1873_v0 = vadd.f32 %v1872_v34, %v4620_v48  ;;  %v1392_v48 = vshrl.u32 %v4940_v38, 16 }
 0x156   : > { %v2190_v6 = vadd.f32 %v2189_v46, %v1957_v37  ;;  %v1959_v3 = vpop.f32.mrf.mxu2  ;;  %v2286_v16 = vpop.f32.mrf.mxu0  ;;  %v1394_v46 = vshll.u32 %v4940_v38, 16 }
 0x157   : > { %v1960_v52 = vadd.f32 %v1959_v3, %v1871_v49  ;;  %v4944_v49 = vsel %vm1433_vm10, %v1479_v60, %v1480_v10 }
 0x158   : > { %v4930_v35 = vadd.f32 %v2278_v63, %v2190_v6  ;;  %v1396_v34 = vrot.slane %v1394_v46, 1  ;;  %v1482_v46 = vrot.slane %v4940_v38, 1 }
 0x159   : > { %2325 = vmatmul.bf16.gmra.mxu0 %v4906_v22 }
 0x15a   : > { %2231 = vmatmul.bf16.gmra.mxu3 %v4848_v58 }
 0x15c   : > { %v1875_v55 = vpop.f32.mrf.mxu1 }
 0x15d   : > { %v2192_v36 = vpop.f32.mrf.mxu3  ;;  %v1876_v33 = vadd.f32 %v1875_v55, %v4642_v2 }
 0x15e   : > { %v2193_v37 = vadd.f32 %v2192_v36, %v1960_v52  ;;  %v1961_v41 = vpop.f32.mrf.mxu2  ;;  %v2288_v30 = vpop.f32.mrf.mxu0  ;;  %v1399_v52 = vshll.u32 %v1196_v62, 16 }
 0x15f   : > { %1914 = vmatmul.bf16.gmra.mxu1 %v4934_v27  ;;  %v1962_v63 = vadd.f32 %v1961_v41, %v1873_v0  ;;  %v1397_v0 = vor.u32 %v1396_v34, %v1392_v48 }
 0x160   : > { %v4946_v6 = vadd.f32 %v2281_v24, %v2193_v37  ;;  %v1401_v41 = vrot.slane %v1399_v52, 1 }
 0x162   : > { %5202 = vst [vmem:[#allocation30_spill] sm:$0xff] %v4946_v6  ;;  %v4955_v37 = vsel %vm1198_vm9, %v1397_v0, %v1401_v41  ;;  %v1483_v6 = vrot.slane %v1196_v62, 1  ;;  %v1435_v41 = vrot.slane %v4466_v45, 1 }
 0x163   : > { %2003 = vmatmul.bf16.gmra.mxu2 %v4944_v49 }
 0x164   : > { %v1877_v3 = vpop.f32.mrf.mxu1  ;;  %v4962_v34 = vsel %vm1433_vm10, %v1482_v46, %v1483_v6 }
 0x165   : > { %v2194_v1 = vpop.f32.mrf.mxu3  ;;  %v1878_v55 = vadd.f32 %v1877_v3, %v4660_v15  ;;  %v3957_v3 = vld [vmem:[#allocation2] sm:$0xff] }
 0x166   : > { %v2195_v44 = vadd.f32 %v2194_v1, %v1962_v63  ;;  %v1964_v39 = vpop.f32.mrf.mxu2  ;;  %v2291_v24 = vpop.f32.mrf.mxu0 }
 0x167   : > { %v1965_v36 = vadd.f32 %v1964_v39, %v1876_v33 }
 0x168   : > { %v4951_v10 = vadd.f32 %v2283_v54, %v2195_v44 }
 0x169   : > { %2330 = vmatmul.bf16.gmra.mxu0 %v4934_v27 }
 0x16a   : > { %2236 = vmatmul.bf16.gmra.mxu3 %v4879_v32 }
 0x16c   : > { %v1880_v60 = vpop.f32.mrf.mxu1 }
 0x16d   : > { %v2197_v2 = vpop.f32.mrf.mxu3  ;;  %v1881_v44 = vadd.f32 %v1880_v60, %v4679_v40 }
 0x16e   : > { %v2198_v63 = vadd.f32 %v2197_v2, %v1965_v36  ;;  %v1966_v48 = vpop.f32.mrf.mxu2  ;;  %v2293_v1 = vpop.f32.mrf.mxu0  ;;  %v1434_v36 = vrot.slane %v3957_v3, 1 }
 0x16f   : > { %1919 = vmatmul.bf16.gmra.mxu1 %v4955_v37  ;;  %v1967_v54 = vadd.f32 %v1966_v48, %v1878_v55 }
 0x170   : > { %v4964_v52 = vadd.f32 %v2286_v16, %v2198_v63  ;;  %v1436_v46 = vsel %vm1433_vm10, %v1434_v36, %v1435_v41 }
 0x173   : > { %2008 = vmatmul.bf16.gmra.mxu2 %v4962_v34 }
 0x174   : > { %v1882_v33 = vpop.f32.mrf.mxu1 }
 0x175   : > { %v2199_v62 = vpop.f32.mrf.mxu3  ;;  %v1883_v40 = vadd.f32 %v1882_v33, %v4714_v50 }
 0x176   : > { %v2200_v39 = vadd.f32 %v2199_v62, %v1967_v54  ;;  %v1969_v0 = vpop.f32.mrf.mxu2  ;;  %v2296_v6 = vpop.f32.mrf.mxu0 }
 0x177   : > { %v1970_v15 = vadd.f32 %v1969_v0, %v1881_v44 }
 0x178   : > { %v4969_v2 = vadd.f32 %v2288_v30, %v2200_v39  ;;  %v3958_v30 = vld [vmem:[#allocation2 + $0x18] sm:$0xff] }
 0x179   : > { %2804 = vmatmul.bf16.vlgmr.msra.gmra.mxu0 %v4511_v56 }
 0x17a   : > { %5203 = vst [vmem:[#allocation31_spill] sm:$0xff] %v4969_v2  ;;  %2241 = vmatmul.bf16.gmra.mxu3 %v4918_v21 }
 0x17c   : > { %v1885_v16 = vpop.f32.mrf.mxu1 }
 0x17d   : > { %v2202_v55 = vpop.f32.mrf.mxu3  ;;  %v1886_v39 = vadd.f32 %v1885_v16, %v4576_v18 }
 0x17e   : > { %v2203_v60 = vadd.f32 %v2202_v55, %v1970_v15  ;;  %v1971_v63 = vpop.f32.mrf.mxu2  ;;  %v2298_v45 = vpop.f32.mrf.mxu0 }
 0x17f   : > { %2344 = vmatmul.bf16.vlgmr.msra.gmra.mxu1 %v1436_v46  ;;  %v1972_v48 = vadd.f32 %v1971_v63, %v1883_v40  ;;  %v3959_v40 = vld [vmem:[#allocation2 + $0x24] sm:$0xff] }
 0x180   : > { %v4975_v54 = vadd.f32 %v2291_v24, %v2203_v60 }
 0x183   : > { %2626 = vmatmul.bf16.vlgmr.msra.gmra.mxu2 %v3958_v30 }
 0x184   : > { %v1887_v62 = vpop.f32.mrf.mxu1 }
 0x185   : > { %v2204_v44 = vpop.f32.mrf.mxu3  ;;  %v1888_v33 = vadd.f32 %v1887_v62, %v4598_v9 }
 0x186   : > { %v2205_v0 = vadd.f32 %v2204_v44, %v1972_v48  ;;  %v1974_v3 = vpop.f32.mrf.mxu2  ;;  %v2301_v2 = vpop.f32.mrf.mxu0 }
 0x187   : > { %v1975_v36 = vadd.f32 %v1974_v3, %v1886_v39 }
 0x188   : > { %v4978_v41 = vadd.f32 %v2293_v1, %v2205_v0 }
 0x189   : > { %2809 = vmatmul.bf16.gmra.mxu0 %v4528_v23 }
 0x18a   : > { %2715 = vmatmul.bf16.vlgmr.msra.gmra.mxu3 %v4500_v42 }
 0x18c   : > { %v1890_v50 = vpop.f32.mrf.mxu1 }
 0x18d   : > { %v2207_v24 = vpop.f32.mrf.mxu3  ;;  %v1891_v42 = vadd.f32 %v1890_v50, %v4628_v17  ;;  %v3960_v50 = vld [vmem:[#allocation2 + $0x30] sm:$0xff] }
 0x18e   : > { %v2208_v15 = vadd.f32 %v2207_v24, %v1975_v36  ;;  %v1976_v46 = vpop.f32.mrf.mxu2  ;;  %v2303_v16 = vpop.f32.mrf.mxu0 }
 0x18f   : > { %2349 = vmatmul.bf16.gmra.mxu1 %v4482_v20  ;;  %v1977_v55 = vadd.f32 %v1976_v46, %v1888_v33 }
 0x190   : > { %v4984_v18 = vadd.f32 %v2296_v6, %v2208_v15 }
 0x193   : > { %2631 = vmatmul.bf16.gmra.mxu2 %v3959_v40 }
 0x194   : > { %v1892_v1 = vpop.f32.mrf.mxu1 }
 0x195   : > { %v2209_v60 = vpop.f32.mrf.mxu3  ;;  %v1893_v6 = vadd.f32 %v1892_v1, %v4645_v47 }
 0x196   : > { %v2210_v63 = vadd.f32 %v2209_v60, %v1977_v55  ;;  %v1979_v48 = vpop.f32.mrf.mxu2  ;;  %v2306_v9 = vpop.f32.mrf.mxu0 }
 0x197   : > { %v1980_v30 = vadd.f32 %v1979_v48, %v1891_v42  ;;  %v3961_v48 = vld [vmem:[#allocation2 + $0x3c] sm:$0xff] }
 0x198   : > { %v4987_v44 = vadd.f32 %v2298_v45, %v2210_v63 }
 0x199   : > { %2814 = vmatmul.bf16.gmra.mxu0 %v4564_v59 }
 0x19a   : > { %2720 = vmatmul.bf16.gmra.mxu3 %v4519_v12 }
 0x19c   : > { %v1895_v62 = vpop.f32.mrf.mxu1 }
 0x19d   : > { %v2212_v20 = vpop.f32.mrf.mxu3  ;;  %v1896_v12 = vadd.f32 %v1895_v62, %v4668_v19  ;;  %v5204_v62 = vld [vmem:[#allocation17_spill] sm:$0xff] }
 0x19e   : > { %v2213_v39 = vadd.f32 %v2212_v20, %v1980_v30  ;;  %v1981_v0 = vpop.f32.mrf.mxu2  ;;  %v2308_v36 = vpop.f32.mrf.mxu0 }
 0x19f   : > { %2354 = vmatmul.bf16.gmra.mxu1 %v4511_v56  ;;  %v1982_v3 = vadd.f32 %v1981_v0, %v1893_v6 }
 0x1a0   : > { %v4993_v17 = vadd.f32 %v2301_v2, %v2213_v39 }
 0x1a3   : > { %2636 = vmatmul.bf16.gmra.mxu2 %v3960_v50 }
 0x1a4   : > { %v1897_v45 = vpop.f32.mrf.mxu1 }
 0x1a5   : > { %v2214_v24 = vpop.f32.mrf.mxu3  ;;  %v1898_v2 = vadd.f32 %v1897_v45, %v4693_v11  ;;  %v5207_v45 = vld [vmem:[#allocation19_spill] sm:$0xff] }
 0x1a6   : > { %v2215_v33 = vadd.f32 %v2214_v24, %v1982_v3  ;;  %v1984_v15 = vpop.f32.mrf.mxu2  ;;  %v2311_v47 = vpop.f32.mrf.mxu0  ;;  %v5205_v3 = vld [vmem:[#allocation3_spill] sm:$0xff] }
 0x1a7   : > { %v1985_v46 = vadd.f32 %v1984_v15, %v1896_v12 }
 0x1a8   : > { %v4996_v55 = vadd.f32 %v2303_v16, %v2215_v33 }
 0x1a9   : > { %2819 = vmatmul.bf16.gmra.mxu0 %v4590_v8 }
 0x1aa   : > { %2725 = vmatmul.bf16.gmra.mxu3 %v4548_v43 }
 0x1ac   : > { %v1900_v40 = vpop.f32.mrf.mxu1 }
 0x1ad   : > { %v2217_v56 = vpop.f32.mrf.mxu3  ;;  %v1901_v43 = vadd.f32 %v1900_v40, %v5204_v62 }
 0x1ae   : > { %v2218_v1 = vadd.f32 %v2217_v56, %v1985_v46  ;;  %v1986_v60 = vpop.f32.mrf.mxu2  ;;  %v2313_v63 = vpop.f32.mrf.mxu0  ;;  %v5208_v56 = vld [vmem:[#allocation13_spill] sm:$0xff] }
 0x1af   : > { %2359 = vmatmul.bf16.gmra.mxu1 %v4528_v23  ;;  %v1987_v42 = vadd.f32 %v1986_v60, %v1898_v2  ;;  %v5206_v23 = vld [vmem:[#allocation7_spill] sm:$0xff] }
 0x1b0   : > { %v5002_v19 = vadd.f32 %v2306_v9, %v2218_v1  ;;  %v5209_v1 = vld [vmem:[#allocation4_spill] sm:$0xff] }
 0x1b3   : > { %2641 = vmatmul.bf16.gmra.mxu2 %v3961_v48 }
 0x1b4   : > { %v1902_v16 = vpop.f32.mrf.mxu1 }
 0x1b5   : > { %v2219_v30 = vpop.f32.mrf.mxu3  ;;  %v1903_v24 = vadd.f32 %v1902_v16, %v5207_v45 }
 0x1b6   : > { %v2220_v20 = vadd.f32 %v2219_v30, %v1987_v42  ;;  %v1989_v6 = vpop.f32.mrf.mxu2  ;;  %v2316_v11 = vpop.f32.mrf.mxu0 }
 0x1b7   : > { %v1990_v39 = vadd.f32 %v1989_v6, %v1901_v43  ;;  %v5210_v43 = vld [vmem:[#allocation6_spill] sm:$0xff]  ;;  %v5212_v6 = vld [vmem:[#allocation5_spill] sm:$0xff] }
 0x1b8   : > { %v5005_v0 = vadd.f32 %v2308_v36, %v2220_v20 }
 0x1b9   : > { %2824 = vmatmul.bf16.gmra.mxu0 %v5206_v23 }
 0x1ba   : > { %2730 = vmatmul.bf16.gmra.mxu3 %v5205_v3 }
 0x1bc   : > { %v1905_v50 = vpop.f32.mrf.mxu1 }
 0x1bd   : > { %v2222_v9 = vpop.f32.mrf.mxu3  ;;  %v1906_v60 = vadd.f32 %v1905_v50, %v5209_v1 }
 0x1be   : > { %v2223_v12 = vadd.f32 %v2222_v9, %v1990_v39  ;;  %v1991_v33 = vpop.f32.mrf.mxu2  ;;  %v2318_v40 = vpop.f32.mrf.mxu0 }
 0x1bf   : > { %2364 = vmatmul.bf16.gmra.mxu1 %v4564_v59  ;;  %v1992_v15 = vadd.f32 %v1991_v33, %v1903_v24  ;;  %v5211_v59 = vld [vmem:[#allocation11_spill] sm:$0xff] }
 0x1c0   : > { %v5011_v46 = vadd.f32 %v2311_v47, %v2223_v12  ;;  %v3962_v12 = vld [vmem:[#allocation2 + $0x54] sm:$0xff] }
 0x1c3   : > { %2646 = vmatmul.bf16.gmra.mxu2 %v5208_v56 }
 0x1c4   : > { %v1907_v36 = vpop.f32.mrf.mxu1 }
 0x1c5   : > { %v2224_v2 = vpop.f32.mrf.mxu3  ;;  %v1908_v39 = vadd.f32 %v1907_v36, %v5212_v6 }
 0x1c6   : > { %v2225_v42 = vadd.f32 %v2224_v2, %v1992_v15  ;;  %v1994_v48 = vpop.f32.mrf.mxu2  ;;  %v2321_v16 = vpop.f32.mrf.mxu0  ;;  %v5213_v15 = vld [vmem:[#allocation8_spill] sm:$0xff] }
 0x1c7   : > { %v1995_v30 = vadd.f32 %v1994_v48, %v1906_v60  ;;  %v5214_v48 = vld [vmem:[#allocation9_spill] sm:$0xff] }
 0x1c8   : > { %v5015_v62 = vadd.f32 %v2313_v63, %v2225_v42 }
 0x1c9   : > { %2829 = vmatmul.bf16.gmra.mxu0 %v5211_v59 }
 0x1ca   : > { %2735 = vmatmul.bf16.gmra.mxu3 %v5210_v43  ;;  %v5216_v43 = vld [vmem:[#allocation10_spill] sm:$0xff] }
 0x1cc   : > { %v1910_v20 = vpop.f32.mrf.mxu1 }
 0x1cd   : > { %v2227_v47 = vpop.f32.mrf.mxu3  ;;  %v1911_v56 = vadd.f32 %v1910_v20, %v5213_v15 }
 0x1ce   : > { %v2228_v3 = vadd.f32 %v2227_v47, %v1995_v30  ;;  %v1996_v9 = vpop.f32.mrf.mxu2  ;;  %v2323_v24 = vpop.f32.mrf.mxu0 }
 0x1cf   : > { %2369 = vmatmul.bf16.gmra.mxu1 %v4590_v8  ;;  %v1997_v45 = vadd.f32 %v1996_v9, %v1908_v39  ;;  %v5215_v8 = vld [vmem:[#allocation15_spill] sm:$0xff] }
 0x1d0   : > { %v5021_v50 = vadd.f32 %v2316_v11, %v2228_v3 }
 0x1d3   : > { %2651 = vmatmul.bf16.gmra.mxu2 %v3962_v12 }
 0x1d4   : > { %v1912_v63 = vpop.f32.mrf.mxu1 }
 0x1d5   : > { %v2229_v33 = vpop.f32.mrf.mxu3  ;;  %v1913_v47 = vadd.f32 %v1912_v63, %v5216_v43  ;;  %v5221_v43 = vld [vmem:[#allocation16_spill] sm:$0xff] }
 0x1d6   : > { %v2230_v2 = vadd.f32 %v2229_v33, %v1997_v45  ;;  %v1999_v1 = vpop.f32.mrf.mxu2  ;;  %v2326_v36 = vpop.f32.mrf.mxu0  ;;  %v3963_v45 = vld [vmem:[#allocation2 + $0x60] sm:$0xff] }
 0x1d7   : > { %v2000_v60 = vadd.f32 %v1999_v1, %v1911_v56  ;;  %v5217_v33 = vld [vmem:[#allocation12_spill] sm:$0xff] }
 0x1d8   : > { %v5024_v42 = vadd.f32 %v2318_v40, %v2230_v2 }
 0x1d9   : > { %2834 = vmatmul.bf16.gmra.mxu0 %v5215_v8 }
 0x1da   : > { %2740 = vmatmul.bf16.gmra.mxu3 %v5214_v48 }
 0x1dc   : > { %v1915_v30 = vpop.f32.mrf.mxu1 }
 0x1dd   : > { %v2232_v11 = vpop.f32.mrf.mxu3  ;;  %v1916_v15 = vadd.f32 %v1915_v30, %v5217_v33  ;;  %v5222_v33 = vld [vmem:[#allocation18_spill] sm:$0xff] }
 0x1de   : > { %v2233_v6 = vadd.f32 %v2232_v11, %v2000_v60  ;;  %v2001_v39 = vpop.f32.mrf.mxu2  ;;  %v2328_v9 = vpop.f32.mrf.mxu0  ;;  %v5219_v60 = vld [vmem:[#allocation14_spill] sm:$0xff] }
 0x1df   : > { %2374 = vmatmul.bf16.gmra.mxu1 %v5206_v23  ;;  %v2002_v3 = vadd.f32 %v2001_v39, %v1913_v47  ;;  %v5220_v23 = vld [vmem:[#allocation20_spill] sm:$0xff] }
 0x1e0   : > { %v5030_v20 = vadd.f32 %v2321_v16, %v2233_v6 }
 0x1e3   : > { %2656 = vmatmul.bf16.gmra.mxu2 %v3963_v45 }
 0x1e4   : > { %v1917_v40 = vpop.f32.mrf.mxu1 }
 0x1e5   : > { %v2234_v12 = vpop.f32.mrf.mxu3  ;;  %v1918_v47 = vadd.f32 %v1917_v40, %v5221_v43 }
 0x1e6   : > { %v2235_v56 = vadd.f32 %v2234_v12, %v2002_v3  ;;  %v2004_v2 = vpop.f32.mrf.mxu2  ;;  %v2331_v63 = vpop.f32.mrf.mxu0 }
 0x1e7   : > { %v2005_v1 = vadd.f32 %v2004_v2, %v1916_v15 }
 0x1e8   : > { %v5033_v48 = vadd.f32 %v2323_v24, %v2235_v56 }
 0x1e9   : > { %2839 = vmatmul.bf16.gmra.mxu0 %v5220_v23 }
 0x1ea   : > { %5218 = vst [vmem:[#allocation17_spill] sm:$0xff] %v5033_v48  ;;  %2745 = vmatmul.bf16.gmra.mxu3 %v5219_v60 }
 0x1ec   : > { %v1920_v11 = vpop.f32.mrf.mxu1 }
 0x1ed   : > { %v2237_v16 = vpop.f32.mrf.mxu3  ;;  %v1921_v15 = vadd.f32 %v1920_v11, %v5222_v33 }
 0x1ee   : > { %v2238_v6 = vadd.f32 %v2237_v16, %v2005_v1  ;;  %v2006_v39 = vpop.f32.mrf.mxu2  ;;  %v2333_v3 = vpop.f32.mrf.mxu0  ;;  %v5224_v16 = vld [vmem:[#allocation21_spill] sm:$0xff] }
 0x1ef   : > { %2379 = vmatmul.bf16.gmra.mxu1 %v5211_v59  ;;  %v2007_v45 = vadd.f32 %v2006_v39, %v1918_v47  ;;  %v5223_v59 = vld [vmem:[#allocation22_spill] sm:$0xff] }
 0x1f0   : > { %v5039_v30 = vadd.f32 %v2326_v36, %v2238_v6 }
 0x1f3   : > { %2661 = vmatmul.bf16.gmra.mxu2 %v4706_v26 }
 0x1f4   : > { %v1922_v24 = vpop.f32.mrf.mxu1 }
 0x1f5   : > { %v2239_v12 = vpop.f32.mrf.mxu3  ;;  %v1923_v43 = vadd.f32 %v1922_v24, %v5224_v16 }
 0x1f6   : > { %v2240_v56 = vadd.f32 %v2239_v12, %v2007_v45  ;;  %v2009_v2 = vpop.f32.mrf.mxu2  ;;  %v2805_v40 = vpop.f32.mrf.mxu0 }
 0x1f7   : > { %v2010_v60 = vadd.f32 %v2009_v2, %v1921_v15 }
 0x1f8   : > { %v5043_v48 = vadd.f32 %v2328_v9, %v2240_v56 }
 0x1f9   : > { %2844 = vmatmul.bf16.gmra.mxu0 %v5223_v59 }
 0x1fa   : > { %2750 = vmatmul.bf16.gmra.mxu3 %v4729_v14 }
 0x1fc   : > { %v2345_v1 = vpop.f32.mrf.mxu1 }
 0x1fd   : > { %v2242_v36 = vpop.f32.mrf.mxu3 }
 0x1fe   : > { %v2243_v47 = vadd.f32 %v2242_v36, %v2010_v60  ;;  %v2011_v26 = vpop.f32.mrf.mxu2  ;;  %v2807_v39 = vpop.f32.mrf.mxu0 }
 0x1ff   : > { %2384 = vmatmul.bf16.gmra.mxu1 %v5215_v8  ;;  %v2012_v6 = vadd.f32 %v2011_v26, %v1923_v43 }
 0x200   : > { %v5049_v11 = vadd.f32 %v2331_v63, %v2243_v47 }
 0x203   : > { %2666 = vmatmul.bf16.gmra.mxu2 %v4738_v29 }
 0x204   : > { %v2347_v9 = vpop.f32.mrf.mxu1 }
 0x205   : > { %v2244_v45 = vpop.f32.mrf.mxu3  ;;  %v2348_v26 = vadd.f32 %v2347_v9, %v4794_v25 }
 0x206   : > { %v2245_v12 = vadd.f32 %v2244_v45, %v2012_v6  ;;  %v2627_v14 = vpop.f32.mrf.mxu2  ;;  %v2810_v15 = vpop.f32.mrf.mxu0 }
 0x208   : > { %v5052_v33 = vadd.f32 %v2333_v3, %v2245_v12  ;;  %v5225_v3 = vld [vmem:[#allocation23_spill] sm:$0xff] }
 0x209   : > { %2849 = vmatmul.bf16.gmra.mxu0 %v4810_v4  ;;  %v2346_v16 = vadd.f32 %v2345_v1, %v5225_v3  ;;  %v3964_v3 = vld [vmem:[#allocation2 + $0x90] sm:$0xff] }
 0x20a   : > { %2755 = vmatmul.bf16.gmra.mxu3 %v4766_v7 }
 0x20c   : > { %v2350_v24 = vpop.f32.mrf.mxu1 }
 0x20d   : > { %v2716_v56 = vpop.f32.mrf.mxu3 }
 0x20e   : > { %v2629_v8 = vpop.f32.mrf.mxu2  ;;  %v2717_v63 = vadd.f32 %v2716_v56, %v2627_v14  ;;  %v2812_v2 = vpop.f32.mrf.mxu0 }
 0x20f   : > { %2389 = vmatmul.bf16.gmra.mxu1 %v5220_v23 }
 0x210   : > { %v2806_v60 = vadd.f32 %v2805_v40, %v2717_v63 }
 0x212   : > { %v2885_v7 = vadd.f32 %v2806_v60, %v2346_v16 }
 0x213   : > { %2671 = vmatmul.bf16.gmra.mxu2 %v4870_v5 }
 0x214   : > { %v2352_v29 = vpop.f32.mrf.mxu1  ;;  %v3018_v23 = vmul.f32 %v2885_v7, %v2885_v7 }
 0x215   : > { %v2718_v36 = vpop.f32.mrf.mxu3 }
 0x216   : > { %v2719_v43 = vadd.f32 %v2718_v36, %v2629_v8  ;;  %v2632_v47 = vpop.f32.mrf.mxu2  ;;  %v2815_v45 = vpop.f32.mrf.mxu0 }
 0x218   : > { %v2808_v6 = vadd.f32 %v2807_v39, %v2719_v43 }
 0x219   : > { %2854 = vmatmul.bf16.gmra.mxu0 %v4854_v31 }
 0x21a   : > { %v2886_v12 = vadd.f32 %v2808_v6, %v2348_v26  ;;  %2760 = vmatmul.bf16.gmra.mxu3 %v4800_v57  ;;  %v5226_v57 = vld [vmem:[#allocation24_spill] sm:$0xff] }
 0x21b   : > { %v2351_v8 = vadd.f32 %v2350_v24, %v5226_v57  ;;  %v5227_v57 = vld [vmem:[#allocation27_spill] sm:$0xff] }
 0x21c   : > { %v2355_v5 = vpop.f32.mrf.mxu1  ;;  %v3803_v40 = vpack.c.bf16 %v2886_v12, %v2885_v7  ;;  %v2981_v1 = vadd.f32 %v2886_v12, %v2885_v7  ;;  %v3019_v14 = vmul.f32 %v2886_v12, %v2886_v12 }
 0x21d   : > { %v2721_v25 = vpop.f32.mrf.mxu3 }
 0x21e   : > { %3804 = vst [vmem:[%s5066_s26] sm:$0xff] %v3803_v40   ;;  %v3050_v39 = vadd.f32 %v3019_v14, %v3018_v23  ;;  %v2722_v9 = vadd.f32 %v2721_v25, %v2632_v47  ;;  %v2634_v56 = vpop.f32.mrf.mxu2  ;;  %v2817_v60 = vpop.f32.mrf.mxu0  ;;  %v2353_v47 = vadd.f32 %v2352_v29, %v4824_v53 }
 0x21f   : > { %2394 = vmatmul.bf16.gmra.mxu1 %v5223_v59 }
 0x220   : > { %v2811_v63 = vadd.f32 %v2810_v15, %v2722_v9 }
 0x222   : > { %v2887_v36 = vadd.f32 %v2811_v63, %v2351_v8 }
 0x223   : > { %2676 = vmatmul.bf16.gmra.mxu2 %v3964_v3 }
 0x224   : > { %v2357_v16 = vpop.f32.mrf.mxu1  ;;  %v2982_v43 = vadd.f32 %v2981_v1, %v2887_v36  ;;  %v3020_v7 = vmul.f32 %v2887_v36, %v2887_v36 }
 0x225   : > { %v2723_v26 = vpop.f32.mrf.mxu3 }
 0x226   : > { %v3051_v6 = vadd.f32 %v3050_v39, %v3020_v7  ;;  %v2724_v12 = vadd.f32 %v2723_v26, %v2634_v56  ;;  %v2637_v40 = vpop.f32.mrf.mxu2  ;;  %v2820_v14 = vpop.f32.mrf.mxu0  ;;  %v5228_v56 = vld [vmem:[#allocation25_spill] sm:$0xff] }
 0x227   : > { %v2356_v53 = vadd.f32 %v2355_v5, %v5228_v56 }
 0x228   : > { %v2813_v23 = vadd.f32 %v2812_v2, %v2724_v12 }
 0x229   : > { %2859 = vmatmul.bf16.gmra.mxu0 %v5227_v57 }
 0x22a   : > { %v2888_v59 = vadd.f32 %v2813_v23, %v2353_v47  ;;  %2765 = vmatmul.bf16.gmra.mxu3 %v4836_v28 }
 0x22c   : > { %v2360_v15 = vpop.f32.mrf.mxu1  ;;  %v3808_v24 = vpack.c.bf16 %v2888_v59, %v2887_v36  ;;  %v2983_v25 = vadd.f32 %v2982_v43, %v2888_v59  ;;  %v3021_v9 = vmul.f32 %v2888_v59, %v2888_v59 }
 0x22d   : > { %v2726_v1 = vpop.f32.mrf.mxu3 }
 0x22e   : > { %3895 = vst [vmem:[%s5066_s26 + $0x8] sm:$0xff] %v3808_v24   ;;  %v3052_v8 = vadd.f32 %v3051_v6, %v3021_v9  ;;  %v2727_v63 = vadd.f32 %v2726_v1, %v2637_v40  ;;  %v2639_v39 = vpop.f32.mrf.mxu2  ;;  %v2822_v29 = vpop.f32.mrf.mxu0  ;;  %v5229_v6 = vld [vmem:[#allocation26_spill] sm:$0xff] }
 0x22f   : > { %2399 = vmatmul.bf16.gmra.mxu1 %v4810_v4  ;;  %v2358_v40 = vadd.f32 %v2357_v16, %v5229_v6 }
 0x230   : > { %v2816_v2 = vadd.f32 %v2815_v45, %v2727_v63  ;;  %v5230_v63 = vld [vmem:[#allocation28_spill] sm:$0xff] }
 0x231   : > { %v2361_v16 = vadd.f32 %v2360_v15, %v5230_v63 }
 0x232   : > { %v2889_v3 = vadd.f32 %v2816_v2, %v2356_v53 }
 0x233   : > { %2681 = vmatmul.bf16.gmra.mxu2 %v4848_v58 }
 0x234   : > { %v2362_v28 = vpop.f32.mrf.mxu1  ;;  %v2984_v36 = vadd.f32 %v2983_v25, %v2889_v3  ;;  %v3022_v43 = vmul.f32 %v2889_v3, %v2889_v3 }
 0x235   : > { %v2728_v7 = vpop.f32.mrf.mxu3 }
 0x236   : > { %v3053_v26 = vadd.f32 %v3052_v8, %v3022_v43  ;;  %v2729_v12 = vadd.f32 %v2728_v7, %v2639_v39  ;;  %v2642_v47 = vpop.f32.mrf.mxu2  ;;  %v2825_v59 = vpop.f32.mrf.mxu0 }
 0x238   : > { %v2818_v23 = vadd.f32 %v2817_v60, %v2729_v12 }
 0x239   : > { %2864 = vmatmul.bf16.gmra.mxu0 %v4922_v13 }
 0x23a   : > { %v2890_v4 = vadd.f32 %v2818_v23, %v2358_v40  ;;  %2770 = vmatmul.bf16.gmra.mxu3 %v4874_v51 }
 0x23c   : > { %v2365_v45 = vpop.f32.mrf.mxu1  ;;  %v3813_v5 = vpack.c.bf16 %v2890_v4, %v2889_v3  ;;  %v2985_v24 = vadd.f32 %v2984_v36, %v2890_v4  ;;  %v3023_v9 = vmul.f32 %v2890_v4, %v2890_v4 }
 0x23d   : > { %v2731_v58 = vpop.f32.mrf.mxu3 }
 0x23e   : > { %3896 = vst [vmem:[%s5066_s26 + $0x10] sm:$0xff] %v3813_v5   ;;  %v3054_v25 = vadd.f32 %v3053_v26, %v3023_v9  ;;  %v2732_v1 = vadd.f32 %v2731_v58, %v2642_v47  ;;  %v2644_v8 = vpop.f32.mrf.mxu2  ;;  %v2827_v39 = vpop.f32.mrf.mxu0  ;;  %v2363_v26 = vadd.f32 %v2362_v28, %v4896_v61 }
 0x23f   : > { %2404 = vmatmul.bf16.gmra.mxu1 %v4854_v31 }
 0x240   : > { %v2821_v60 = vadd.f32 %v2820_v14, %v2732_v1 }
 0x242   : > { %v2891_v56 = vadd.f32 %v2821_v60, %v2361_v16 }
 0x243   : > { %2686 = vmatmul.bf16.gmra.mxu2 %v4879_v32 }
 0x244   : > { %v2367_v51 = vpop.f32.mrf.mxu1  ;;  %v2986_v53 = vadd.f32 %v2985_v24, %v2891_v56  ;;  %v3024_v2 = vmul.f32 %v2891_v56, %v2891_v56  ;;  %v5231_v24 = vld [vmem:[#allocation29_spill] sm:$0xff] }
 0x245   : > { %v2733_v3 = vpop.f32.mrf.mxu3  ;;  %v2366_v61 = vadd.f32 %v2365_v45, %v5231_v24  ;;  %v2368_v60 = vadd.f32 %v2367_v51, %v4930_v35 }
 0x246   : > { %v3055_v36 = vadd.f32 %v3054_v25, %v3024_v2  ;;  %v2734_v43 = vadd.f32 %v2733_v3, %v2644_v8  ;;  %v2647_v7 = vpop.f32.mrf.mxu2  ;;  %v2830_v47 = vpop.f32.mrf.mxu0 }
 0x248   : > { %v2823_v12 = vadd.f32 %v2822_v29, %v2734_v43 }
 0x249   : > { %2869 = vmatmul.bf16.gmra.mxu0 %v4944_v49 }
 0x24a   : > { %v2892_v31 = vadd.f32 %v2823_v12, %v2363_v26  ;;  %2775 = vmatmul.bf16.gmra.mxu3 %v4906_v22 }
 0x24c   : > { %v2370_v14 = vpop.f32.mrf.mxu1  ;;  %v3818_v15 = vpack.c.bf16 %v2892_v31, %v2891_v56  ;;  %v2987_v6 = vadd.f32 %v2986_v53, %v2892_v31  ;;  %v3025_v40 = vmul.f32 %v2892_v31, %v2892_v31 }
 0x24d   : > { %v2736_v32 = vpop.f32.mrf.mxu3 }
 0x24e   : > { %3897 = vst [vmem:[%s5066_s26 + $0x18] sm:$0xff] %v3818_v15   ;;  %v3056_v23 = vadd.f32 %v3055_v36, %v3025_v40  ;;  %v2737_v4 = vadd.f32 %v2736_v32, %v2647_v7  ;;  %v2649_v5 = vpop.f32.mrf.mxu2  ;;  %v2832_v28 = vpop.f32.mrf.mxu0 }
 0x24f   : > { %2409 = vmatmul.bf16.gmra.mxu1 %v5227_v57 }
 0x250   : > { %v2826_v29 = vadd.f32 %v2825_v59, %v2737_v4 }
 0x252   : > { %v2893_v9 = vadd.f32 %v2826_v29, %v2366_v61 }
 0x253   : > { %2691 = vmatmul.bf16.gmra.mxu2 %v4918_v21  ;;  %v1035_v21 = vld [vmem:[#allocation2 + $0xd4] sm:$0x1] }
 0x254   : > { %v2372_v22 = vpop.f32.mrf.mxu1  ;;  %v2988_v58 = vadd.f32 %v2987_v6, %v2893_v9  ;;  %v3026_v25 = vmul.f32 %v2893_v9, %v2893_v9  ;;  %v1179_v35 = vunpack.c.l.b16 %v1035_v21  ;;  %v3663_v6 = vld [vmem:[#allocation2 + $0xcc] sm:$0xff] }
 0x255   : > { %v2738_v1 = vpop.f32.mrf.mxu3  ;;  %v1485_v4 = vrot.slane %v3663_v6, 1  ;;  %v2373_v29 = vadd.f32 %v2372_v22, %v4951_v10  ;;  %v1404_v10 = vshrl.u32 %v3663_v6, 16 }
 0x256   : > { %v3057_v8 = vadd.f32 %v3056_v23, %v3026_v25  ;;  %v2739_v63 = vadd.f32 %v2738_v1, %v2649_v5  ;;  %v2652_v16 = vpop.f32.mrf.mxu2  ;;  %v2835_v53 = vpop.f32.mrf.mxu0  ;;  %v1197_v40 = vpack.c.b16 %v1179_v35, %v1179_v35  ;;  %v1406_v25 = vshll.u32 %v3663_v6, 16 }
 0x258   : > { %v2828_v56 = vadd.f32 %v2827_v39, %v2739_v63  ;;  %v5232_v39 = vld [vmem:[#allocation30_spill] sm:$0xff]  ;;  %v1486_v5 = vrot.slane %v1197_v40, 1  ;;  %v1411_v22 = vshll.u32 %v1197_v40, 16 }
 0x259   : > { %2874 = vmatmul.bf16.gmra.mxu0 %v4962_v34  ;;  %v2371_v51 = vadd.f32 %v2370_v14, %v5232_v39 }
 0x25a   : > { %v2894_v57 = vadd.f32 %v2828_v56, %v2368_v60  ;;  %2780 = vmatmul.bf16.gmra.mxu3 %v4934_v27 }
 0x25c   : > { %v2375_v59 = vpop.f32.mrf.mxu1  ;;  %v3823_v45 = vpack.c.bf16 %v2894_v57, %v2893_v9  ;;  %v2989_v2 = vadd.f32 %v2988_v58, %v2894_v57  ;;  %v3027_v3 = vmul.f32 %v2894_v57, %v2894_v57  ;;  %v1487_v9 = vsel %vm1433_vm10, %v1485_v4, %v1486_v5 }
 0x25d   : > { %v2741_v36 = vpop.f32.mrf.mxu3 }
 0x25e   : > { %3898 = vst [vmem:[%s5066_s26 + $0x20] sm:$0xff] %v3823_v45   ;;  %v3058_v43 = vadd.f32 %v3057_v8, %v3027_v3  ;;  %v2742_v7 = vadd.f32 %v2741_v36, %v2652_v16  ;;  %v2654_v26 = vpop.f32.mrf.mxu2  ;;  %v2837_v31 = vpop.f32.mrf.mxu0  ;;  %v2376_v45 = vadd.f32 %v2375_v59, %v4964_v52  ;;  %v1413_v36 = vrot.slane %v1411_v22, 1 }
 0x25f   : > { %2414 = vmatmul.bf16.gmra.mxu1 %v4922_v13 }
 0x260   : > { %v2831_v12 = vadd.f32 %v2830_v47, %v2742_v7 }
 0x262   : > { %v2895_v27 = vadd.f32 %v2831_v12, %v2371_v51 }
 0x263   : > { %2696 = vmatmul.bf16.gmra.mxu2 %v4940_v38 }
 0x264   : > { %v2377_v15 = vpop.f32.mrf.mxu1  ;;  %v2990_v34 = vadd.f32 %v2989_v2, %v2895_v27  ;;  %v3028_v32 = vmul.f32 %v2895_v27, %v2895_v27 }
 0x265   : > { %v2743_v23 = vpop.f32.mrf.mxu3 }
 0x266   : > { %v3059_v24 = vadd.f32 %v3058_v43, %v3028_v32  ;;  %v2744_v61 = vadd.f32 %v2743_v23, %v2654_v26  ;;  %v2657_v13 = vpop.f32.mrf.mxu2  ;;  %v2840_v47 = vpop.f32.mrf.mxu0 }
 0x268   : > { %v2833_v14 = vadd.f32 %v2832_v28, %v2744_v61  ;;  %v1408_v28 = vrot.slane %v1406_v25, 1 }
 0x269   : > { %2879 = vmatmul.bf16.gmra.mxu0 %v1487_v9 }
 0x26a   : > { %v2896_v58 = vadd.f32 %v2833_v14, %v2373_v29  ;;  %2785 = vmatmul.bf16.gmra.mxu3 %v4955_v37  ;;  %v1409_v21 = vor.u32 %v1408_v28, %v1404_v10 }
 0x26c   : > { %v2380_v38 = vpop.f32.mrf.mxu1  ;;  %v3828_v1 = vpack.c.bf16 %v2896_v58, %v2895_v27  ;;  %v2991_v8 = vadd.f32 %v2990_v34, %v2896_v58  ;;  %v3029_v63 = vmul.f32 %v2896_v58, %v2896_v58  ;;  %v5233_v27 = vld [vmem:[#allocation31_spill] sm:$0xff] }
 0x26d   : > { %v2746_v16 = vpop.f32.mrf.mxu3  ;;  %v2378_v40 = vadd.f32 %v2377_v15, %v5233_v27 }
 0x26e   : > { %3899 = vst [vmem:[%s5066_s26 + $0x28] sm:$0xff] %v3828_v1   ;;  %v3060_v60 = vadd.f32 %v3059_v24, %v3029_v63  ;;  %v2747_v56 = vadd.f32 %v2746_v16, %v2657_v13  ;;  %v2659_v57 = vpop.f32.mrf.mxu2  ;;  %v2842_v37 = vpop.f32.mrf.mxu0  ;;  %v2381_v13 = vadd.f32 %v2380_v38, %v4975_v54 }
 0x26f   : > { %2419 = vmatmul.bf16.gmra.mxu1 %v4944_v49  ;;  %v1414_v49 = vsel %vm1198_vm9, %v1409_v21, %v1413_v36 }
 0x270   : > { %v2836_v2 = vadd.f32 %v2835_v53, %v2747_v56 }
 0x272   : > { %v2897_v3 = vadd.f32 %v2836_v2, %v2376_v45 }
 0x273   : > { %2701 = vmatmul.bf16.gmra.mxu2 %v3663_v6 }
 0x274   : > { %v2382_v43 = vpop.f32.mrf.mxu1  ;;  %v2992_v7 = vadd.f32 %v2991_v8, %v2897_v3  ;;  %v3030_v26 = vmul.f32 %v2897_v3, %v2897_v3 }
 0x275   : > { %v2748_v35 = vpop.f32.mrf.mxu3  ;;  %v2383_v16 = vadd.f32 %v2382_v43, %v4978_v41 }
 0x276   : > { %v3061_v39 = vadd.f32 %v3060_v60, %v3030_v26  ;;  %v2749_v51 = vadd.f32 %v2748_v35, %v2659_v57  ;;  %v2662_v12 = vpop.f32.mrf.mxu2  ;;  %v2845_v52 = vpop.f32.mrf.mxu0 }
 0x278   : > { %v2838_v34 = vadd.f32 %v2837_v31, %v2749_v51 }
 0x27a   : > { %v2898_v53 = vadd.f32 %v2838_v34, %v2378_v40  ;;  %2790 = vmatmul.bf16.gmra.mxu3 %v1414_v49 }
 0x27c   : > { %v2385_v59 = vpop.f32.mrf.mxu1  ;;  %v3833_v6 = vpack.c.bf16 %v2898_v53, %v2897_v3  ;;  %v2993_v32 = vadd.f32 %v2992_v7, %v2898_v53  ;;  %v3031_v23 = vmul.f32 %v2898_v53, %v2898_v53 }
 0x27d   : > { %v2751_v4 = vpop.f32.mrf.mxu3  ;;  %v2386_v3 = vadd.f32 %v2385_v59, %v4984_v18 }
 0x27e   : > { %3900 = vst [vmem:[%s5066_s26 + $0x30] sm:$0xff] %v3833_v6   ;;  %v3062_v5 = vadd.f32 %v3061_v39, %v3031_v23  ;;  %v2752_v24 = vadd.f32 %v2751_v4, %v2662_v12  ;;  %v2664_v61 = vpop.f32.mrf.mxu2  ;;  %v2847_v14 = vpop.f32.mrf.mxu0 }
 0x280   : > { %v2841_v29 = vadd.f32 %v2840_v47, %v2752_v24 }
 0x282   : > { %v2899_v9 = vadd.f32 %v2841_v29, %v2381_v13 }
 0x284   : > { %v2387_v58 = vpop.f32.mrf.mxu1  ;;  %v2994_v31 = vadd.f32 %v2993_v32, %v2899_v9  ;;  %v3032_v15 = vmul.f32 %v2899_v9, %v2899_v9 }
 0x285   : > { %v2753_v25 = vpop.f32.mrf.mxu3  ;;  %v2388_v12 = vadd.f32 %v2387_v58, %v4987_v44 }
 0x286   : > { %v3063_v1 = vadd.f32 %v3062_v5, %v3032_v15  ;;  %v2754_v8 = vadd.f32 %v2753_v25, %v2664_v61  ;;  %v2667_v63 = vpop.f32.mrf.mxu2  ;;  %v2850_v56 = vpop.f32.mrf.mxu0 }
 0x288   : > { %v2843_v60 = vadd.f32 %v2842_v37, %v2754_v8 }
 0x28a   : > { %v2900_v57 = vadd.f32 %v2843_v60, %v2383_v16 }
 0x28c   : > { %v2390_v10 = vpop.f32.mrf.mxu1  ;;  %v3838_v28 = vpack.c.bf16 %v2900_v57, %v2899_v9  ;;  %v2995_v22 = vadd.f32 %v2994_v31, %v2900_v57  ;;  %v3033_v54 = vmul.f32 %v2900_v57, %v2900_v57 }
 0x28d   : > { %v2756_v47 = vpop.f32.mrf.mxu3  ;;  %v2391_v4 = vadd.f32 %v2390_v10, %v4993_v17 }
 0x28e   : > { %3901 = vst [vmem:[%s5066_s26 + $0x38] sm:$0xff] %v3838_v28   ;;  %v3064_v38 = vadd.f32 %v3063_v1, %v3033_v54  ;;  %v2757_v45 = vadd.f32 %v2756_v47, %v2667_v63  ;;  %v2669_v2 = vpop.f32.mrf.mxu2  ;;  %v2852_v36 = vpop.f32.mrf.mxu0 }
 0x290   : > { %v2846_v21 = vadd.f32 %v2845_v52, %v2757_v45 }
 0x292   : > { %v2901_v7 = vadd.f32 %v2846_v21, %v2386_v3 }
 0x294   : > { %v2392_v26 = vpop.f32.mrf.mxu1  ;;  %v2996_v41 = vadd.f32 %v2995_v22, %v2901_v7  ;;  %v3034_v37 = vmul.f32 %v2901_v7, %v2901_v7 }
 0x295   : > { %v2758_v43 = vpop.f32.mrf.mxu3  ;;  %v2393_v15 = vadd.f32 %v2392_v26, %v4996_v55 }
 0x296   : > { %v3065_v35 = vadd.f32 %v3064_v38, %v3034_v37  ;;  %v2759_v39 = vadd.f32 %v2758_v43, %v2669_v2  ;;  %v2672_v51 = vpop.f32.mrf.mxu2  ;;  %v2855_v27 = vpop.f32.mrf.mxu0 }
 0x298   : > { %v2848_v49 = vadd.f32 %v2847_v14, %v2759_v39 }
 0x29a   : > { %v2902_v40 = vadd.f32 %v2848_v49, %v2388_v12 }
 0x29c   : > { %v2395_v34 = vpop.f32.mrf.mxu1  ;;  %v3843_v53 = vpack.c.bf16 %v2902_v40, %v2901_v7  ;;  %v2997_v6 = vadd.f32 %v2996_v41, %v2902_v40  ;;  %v3035_v18 = vmul.f32 %v2902_v40, %v2902_v40 }
 0x29d   : > { %v2761_v52 = vpop.f32.mrf.mxu3  ;;  %v2396_v22 = vadd.f32 %v2395_v34, %v5002_v19 }
 0x29e   : > { %3902 = vst [vmem:[%s5066_s26 + $0x40] sm:$0xff] %v3843_v53   ;;  %v3066_v59 = vadd.f32 %v3065_v35, %v3035_v18  ;;  %v2762_v32 = vadd.f32 %v2761_v52, %v2672_v51  ;;  %v2674_v23 = vpop.f32.mrf.mxu2  ;;  %v2857_v13 = vpop.f32.mrf.mxu0 }
 0x2a0   : > { %v2851_v5 = vadd.f32 %v2850_v56, %v2762_v32 }
 0x2a2   : > { %v2903_v24 = vadd.f32 %v2851_v5, %v2391_v4 }
 0x2a4   : > { %v2397_v61 = vpop.f32.mrf.mxu1  ;;  %v2998_v44 = vadd.f32 %v2997_v6, %v2903_v24  ;;  %v3036_v29 = vmul.f32 %v2903_v24, %v2903_v24 }
 0x2a5   : > { %v2763_v14 = vpop.f32.mrf.mxu3  ;;  %v2398_v26 = vadd.f32 %v2397_v61, %v5005_v0 }
 0x2a6   : > { %v3067_v9 = vadd.f32 %v3066_v59, %v3036_v29  ;;  %v2764_v58 = vadd.f32 %v2763_v14, %v2674_v23  ;;  %v2677_v31 = vpop.f32.mrf.mxu2  ;;  %v2860_v56 = vpop.f32.mrf.mxu0 }
 0x2a8   : > { %v2853_v25 = vadd.f32 %v2852_v36, %v2764_v58 }
 0x2aa   : > { %v2904_v1 = vadd.f32 %v2853_v25, %v2393_v15 }
 0x2ac   : > { %v2400_v8 = vpop.f32.mrf.mxu1  ;;  %v3848_v63 = vpack.c.bf16 %v2904_v1, %v2903_v24  ;;  %v2999_v16 = vadd.f32 %v2998_v44, %v2904_v1  ;;  %v3037_v60 = vmul.f32 %v2904_v1, %v2904_v1 }
 0x2ad   : > { %v2766_v17 = vpop.f32.mrf.mxu3  ;;  %v2401_v40 = vadd.f32 %v2400_v8, %v5011_v46 }
 0x2ae   : > { %3903 = vst [vmem:[%s5066_s26 + $0x48] sm:$0xff] %v3848_v63   ;;  %v3068_v57 = vadd.f32 %v3067_v9, %v3037_v60  ;;  %v2767_v10 = vadd.f32 %v2766_v17, %v2677_v31  ;;  %v2679_v28 = vpop.f32.mrf.mxu2  ;;  %v2862_v7 = vpop.f32.mrf.mxu0 }
 0x2b0   : > { %v2856_v54 = vadd.f32 %v2855_v27, %v2767_v10 }
 0x2b2   : > { %v2905_v47 = vadd.f32 %v2856_v54, %v2396_v22 }
 0x2b4   : > { %v3000_v38 = vadd.f32 %v2999_v16, %v2905_v47  ;;  %v3038_v45 = vmul.f32 %v2905_v47, %v2905_v47  ;;  %v2402_v2 = vpop.f32.mrf.mxu1 }
 0x2b5   : > { %v2768_v55 = vpop.f32.mrf.mxu3  ;;  %v2403_v4 = vadd.f32 %v2402_v2, %v5015_v62 }
 0x2b6   : > { %v3069_v3 = vadd.f32 %v3068_v57, %v3038_v45  ;;  %v2769_v21 = vadd.f32 %v2768_v55, %v2679_v28  ;;  %v2682_v36 = vpop.f32.mrf.mxu2  ;;  %v2865_v53 = vpop.f32.mrf.mxu0 }
 0x2b8   : > { %v2858_v41 = vadd.f32 %v2857_v13, %v2769_v21 }
 0x2ba   : > { %v2906_v37 = vadd.f32 %v2858_v41, %v2398_v26 }
 0x2bc   : > { %v3853_v43 = vpack.c.bf16 %v2906_v37, %v2905_v47  ;;  %v3001_v35 = vadd.f32 %v3000_v38, %v2906_v37  ;;  %v3039_v39 = vmul.f32 %v2906_v37, %v2906_v37  ;;  %v2405_v27 = vpop.f32.mrf.mxu1 }
 0x2bd   : > { %v2771_v51 = vpop.f32.mrf.mxu3  ;;  %v2406_v15 = vadd.f32 %v2405_v27, %v5021_v50 }
 0x2be   : > { %3904 = vst [vmem:[%s5066_s26 + $0x50] sm:$0xff] %v3853_v43   ;;  %v3070_v19 = vadd.f32 %v3069_v3, %v3039_v39  ;;  %v2772_v12 = vadd.f32 %v2771_v51, %v2682_v36  ;;  %v2684_v49 = vpop.f32.mrf.mxu2  ;;  %v2867_v13 = vpop.f32.mrf.mxu0 }
 0x2c0   : > { %v2861_v34 = vadd.f32 %v2860_v56, %v2772_v12 }
 0x2c2   : > { %v2907_v6 = vadd.f32 %v2861_v34, %v2401_v40 }
 0x2c4   : > { %v3002_v18 = vadd.f32 %v3001_v35, %v2907_v6  ;;  %v3040_v52 = vmul.f32 %v2907_v6, %v2907_v6  ;;  %v2407_v24 = vpop.f32.mrf.mxu1 }
 0x2c5   : > { %v2773_v0 = vpop.f32.mrf.mxu3  ;;  %v2408_v10 = vadd.f32 %v2407_v24, %v5024_v42 }
 0x2c6   : > { %v3071_v59 = vadd.f32 %v3070_v19, %v3040_v52  ;;  %v2774_v32 = vadd.f32 %v2773_v0, %v2684_v49  ;;  %v2687_v23 = vpop.f32.mrf.mxu2  ;;  %v2870_v60 = vpop.f32.mrf.mxu0  ;;  %v5234_v19 = vld [vmem:[#allocation17_spill] sm:$0xff] }
 0x2c8   : > { %v2863_v5 = vadd.f32 %v2862_v7, %v2774_v32 }
 0x2ca   : > { %v2908_v61 = vadd.f32 %v2863_v5, %v2403_v4 }
 0x2cc   : > { %v3858_v44 = vpack.c.bf16 %v2908_v61, %v2907_v6  ;;  %v3003_v29 = vadd.f32 %v3002_v18, %v2908_v61  ;;  %v3041_v14 = vmul.f32 %v2908_v61, %v2908_v61  ;;  %v2410_v8 = vpop.f32.mrf.mxu1 }
 0x2cd   : > { %v2776_v46 = vpop.f32.mrf.mxu3  ;;  %v2411_v36 = vadd.f32 %v2410_v8, %v5030_v20 }
 0x2ce   : > { %3905 = vst [vmem:[%s5066_s26 + $0x58] sm:$0xff] %v3858_v44   ;;  %v3072_v9 = vadd.f32 %v3071_v59, %v3041_v14  ;;  %v2777_v58 = vadd.f32 %v2776_v46, %v2687_v23  ;;  %v2689_v31 = vpop.f32.mrf.mxu2  ;;  %v2872_v21 = vpop.f32.mrf.mxu0 }
 0x2d0   : > { %v2866_v25 = vadd.f32 %v2865_v53, %v2777_v58 }
 0x2d2   : > { %v2909_v1 = vadd.f32 %v2866_v25, %v2406_v15 }
 0x2d4   : > { %v3004_v63 = vadd.f32 %v3003_v29, %v2909_v1  ;;  %v3042_v62 = vmul.f32 %v2909_v1, %v2909_v1  ;;  %v2412_v50 = vpop.f32.mrf.mxu1 }
 0x2d5   : > { %v2778_v16 = vpop.f32.mrf.mxu3  ;;  %v2413_v12 = vadd.f32 %v2412_v50, %v5234_v19 }
 0x2d6   : > { %v3073_v17 = vadd.f32 %v3072_v9, %v3042_v62  ;;  %v2779_v56 = vadd.f32 %v2778_v16, %v2689_v31  ;;  %v2692_v57 = vpop.f32.mrf.mxu2  ;;  %v2875_v27 = vpop.f32.mrf.mxu0 }
 0x2d8   : > { %v2868_v28 = vadd.f32 %v2867_v13, %v2779_v56 }
 0x2da   : > { %v2910_v22 = vadd.f32 %v2868_v28, %v2408_v10 }
 0x2dc   : > { %v3863_v54 = vpack.c.bf16 %v2910_v22, %v2909_v1  ;;  %v3005_v47 = vadd.f32 %v3004_v63, %v2910_v22  ;;  %v3043_v38 = vmul.f32 %v2910_v22, %v2910_v22  ;;  %v2415_v51 = vpop.f32.mrf.mxu1 }
 0x2dd   : > { %v2781_v45 = vpop.f32.mrf.mxu3  ;;  %v2416_v59 = vadd.f32 %v2415_v51, %v5039_v30 }
 0x2de   : > { %3906 = vst [vmem:[%s5066_s26 + $0x60] sm:$0xff] %v3863_v54   ;;  %v3074_v55 = vadd.f32 %v3073_v17, %v3043_v38  ;;  %v2782_v2 = vadd.f32 %v2781_v45, %v2692_v57  ;;  %v2694_v3 = vpop.f32.mrf.mxu2  ;;  %v2877_v5 = vpop.f32.mrf.mxu0 }
 0x2e0   : > { %v2871_v7 = vadd.f32 %v2870_v60, %v2782_v2 }
 0x2e2   : > { %v2911_v26 = vadd.f32 %v2871_v7, %v2411_v36 }
 0x2e4   : > { %v3006_v41 = vadd.f32 %v3005_v47, %v2911_v26  ;;  %v3044_v37 = vmul.f32 %v2911_v26, %v2911_v26  ;;  %v2417_v23 = vpop.f32.mrf.mxu1 }
 0x2e5   : > { %v2783_v42 = vpop.f32.mrf.mxu3  ;;  %v2418_v14 = vadd.f32 %v2417_v23, %v5043_v48 }
 0x2e6   : > { %v3075_v43 = vadd.f32 %v3074_v55, %v3044_v37  ;;  %v2784_v35 = vadd.f32 %v2783_v42, %v2694_v3  ;;  %v2697_v39 = vpop.f32.mrf.mxu2  ;;  %v2880_v30 = vpop.f32.mrf.mxu0 }
 0x2e8   : > { %v2873_v49 = vadd.f32 %v2872_v21, %v2784_v35 }
 0x2ea   : > { %v2912_v40 = vadd.f32 %v2873_v49, %v2413_v12 }
 0x2ec   : > { %v3868_v34 = vpack.c.bf16 %v2912_v40, %v2911_v26  ;;  %v3007_v53 = vadd.f32 %v3006_v41, %v2912_v40  ;;  %v3045_v6 = vmul.f32 %v2912_v40, %v2912_v40  ;;  %v2420_v31 = vpop.f32.mrf.mxu1 }
 0x2ed   : > { %v2786_v18 = vpop.f32.mrf.mxu3  ;;  %v2421_v16 = vadd.f32 %v2420_v31, %v5049_v11 }
 0x2ee   : > { %3907 = vst [vmem:[%s5066_s26 + $0x68] sm:$0xff] %v3868_v34   ;;  %v3076_v20 = vadd.f32 %v3075_v43, %v3045_v6  ;;  %v2787_v52 = vadd.f32 %v2786_v18, %v2697_v39  ;;  %v2699_v0 = vpop.f32.mrf.mxu2  ;;  %v2882_v47 = vpop.f32.mrf.mxu0 }
 0x2f0   : > { %v2876_v32 = vadd.f32 %v2875_v27, %v2787_v52 }
 0x2f2   : > { %v2913_v4 = vadd.f32 %v2876_v32, %v2416_v59 }
 0x2f4   : > { %v3008_v24 = vadd.f32 %v3007_v53, %v2913_v4  ;;  %v3046_v61 = vmul.f32 %v2913_v4, %v2913_v4  ;;  %v2422_v10 = vpop.f32.mrf.mxu1 }
 0x2f5   : > { %v2788_v13 = vpop.f32.mrf.mxu3  ;;  %v2423_v38 = vadd.f32 %v2422_v10, %v5052_v33 }
 0x2f6   : > { %v3077_v44 = vadd.f32 %v3076_v20, %v3046_v61  ;;  %v2789_v29 = vadd.f32 %v2788_v13, %v2699_v0  ;;  %v2702_v9 = vpop.f32.mrf.mxu2 }
 0x2f8   : > { %v2878_v46 = vadd.f32 %v2877_v5, %v2789_v29 }
 0x2fa   : > { %v2914_v58 = vadd.f32 %v2878_v46, %v2418_v14 }
 0x2fc   : > { %v3873_v15 = vpack.c.bf16 %v2914_v58, %v2913_v4  ;;  %v3009_v25 = vadd.f32 %v3008_v24, %v2914_v58  ;;  %v3047_v1 = vmul.f32 %v2914_v58, %v2914_v58 }
 0x2fd   : > { %v2791_v8 = vpop.f32.mrf.mxu3 }
 0x2fe   : > { %3908 = vst [vmem:[%s5066_s26 + $0x70] sm:$0xff] %v3873_v15   ;;  %v3078_v63 = vadd.f32 %v3077_v44, %v3047_v1  ;;  %v2792_v62 = vadd.f32 %v2791_v8, %v2702_v9  ;;  %v2704_v56 = vpop.f32.mrf.mxu2 }
 0x300   : > { %v2881_v60 = vadd.f32 %v2880_v30, %v2792_v62 }
 0x302   : > { %v2915_v17 = vadd.f32 %v2881_v60, %v2421_v16 }
 0x304   : > { %v3010_v57 = vadd.f32 %v3009_v25, %v2915_v17  ;;  %v3048_v48 = vmul.f32 %v2915_v17, %v2915_v17 }
 0x305   : > { %v2793_v28 = vpop.f32.mrf.mxu3 }
 0x306   : > { %v3079_v22 = vadd.f32 %v3078_v63, %v3048_v48  ;;  %v2794_v54 = vadd.f32 %v2793_v28, %v2704_v56 }
 0x308   : > { %v2883_v45 = vadd.f32 %v2882_v47, %v2794_v54 }
 0x30a   : > { %v2916_v50 = vadd.f32 %v2883_v45, %v2423_v38 }
 0x30c   : > { %v3878_v55 = vpack.c.bf16 %v2916_v50, %v2915_v17  ;;  %v3011_v2 = vadd.f32 %v3010_v57, %v2916_v50  ;;  %v3049_v3 = vmul.f32 %v2916_v50, %v2916_v50 }
 0x30e   : > { %3909 = vst [vmem:[%s5066_s26 + $0x78] sm:$0xff] %v3878_v55   ;;  %v3012_v11 = vrot.slane %v3011_v2, 4  ;;  %v3080_v21 = vadd.f32 %v3079_v22, %v3049_v3 }
 0x310   : > { %v3013_v36 = vadd.f32 %v3012_v11, %v3011_v2  ;;  %v3081_v7 = vrot.slane %v3080_v21, 4 }
 0x312   : > { %v3014_v26 = vrot.slane %v3013_v36, 2  ;;  %v3082_v41 = vadd.f32 %v3081_v7, %v3080_v21 }
 0x314   : > { %v3015_v37 = vadd.f32 %v3014_v26, %v3013_v36  ;;  %v3083_v42 = vrot.slane %v3082_v41, 2 }
 0x316   : > { %v3016_v43 = vrot.slane %v3015_v37, 1  ;;  %v3084_v35 = vadd.f32 %v3083_v42, %v3082_v41 }
 0x318   : > { %v3085_v39 = vrot.slane %v3084_v35, 1  ;;  %v3017_v33 = vadd.f32 %v3016_v43, %v3015_v37 }
 0x31a   : > { %v3086_v51 = vadd.f32 %v3085_v39, %v3084_v35 }
 0x31c   : > { %v3088_v19 = vsel %vm413_vm0, %v3017_v33, %v3086_v51 }
 0x31d   : > { %3089 = vst [vmem:[%s235_s30] sm:$0x3] %v3088_v19 }
 0x31e PF: > { %s16_s18 = sadd.s32 1, %s3971_s18  }
 0x31f   : > { %p13_p4 = scmp.ge.s32.totalorder %s16_s18, 4  }
 0x321   :  { %15 = sbr.rel (!%p13_p4) target bundleno = 1 (0x1), region = 82 }

</bundles_post_ra>
